<compile_context>
chip_gen: v5e
topology: v5e:2x2
jax: 0.10.0
libtpu: 0.0.40
codegen_flags: <defaults>
</compile_context>

<pallas_src>
import functools

import jax
import jax.numpy as jnp
from jax import lax
from jax.experimental import pallas as pl
from jax.experimental.pallas import tpu as pltpu


# ---------------------------------------------------------------------------
# Kernel 1: fused conv1 + ReLU + conv2 + ReLU
# ---------------------------------------------------------------------------
def _conv_kernel(pm_ref, wc1_ref, wc2_ref, bconv_ref, out_ref, pad_ref,
                 *, W, C1, C2, PAD, RB):
    # conv1: one matmul on precomputed 3x3 patches (zero-padded in wrapper).
    patches = pm_ref[:, 0:9]                                   # (RB, 9)
    a1 = jnp.dot(patches, wc1_ref[...], preferred_element_type=jnp.float32)
    a1 = jnp.maximum(a1 + bconv_ref[0:1, 0:C1], 0.0)           # (RB, C1)

    # Zero-padded flattened copy of a1 so each conv2 tap is a static row shift.
    pad_ref[...] = jnp.zeros((PAD + RB + PAD, C1), jnp.float32)
    pad_ref[PAD:PAD + RB, :] = a1

    acc = jnp.zeros((RB, C2), jnp.float32)
    for t in range(9):                                         # unrolled taps
        dy = t // 3 - 1
        dx = t % 3 - 1
        s = dy * W + dx                                        # row shift
        win = pad_ref[PAD + s:PAD + s + RB, :]                 # shifted window
        win = win * pm_ref[:, 9 + t:10 + t]                    # mask off-image rows
        acc = acc + jnp.dot(win, wc2_ref[t * C1:(t + 1) * C1, :],
                            preferred_element_type=jnp.float32)
    out_ref[...] = jnp.maximum(acc + bconv_ref[1:2, 0:C2], 0.0)


# ---------------------------------------------------------------------------
# Kernel 2: fused fc1 + ReLU + fc2 + ReLU + head (+ optional softmax)
# ---------------------------------------------------------------------------
def _mlp_kernel(h_ref, w1_ref, w2_ref, w3_ref, bias_ref, out_ref,
                *, F1, F2, O, out_softmax):
    h = h_ref[...]
    h1 = jnp.dot(h, w1_ref[...], preferred_element_type=jnp.float32)
    h1 = jnp.maximum(h1 + bias_ref[0:1, 0:F1], 0.0)
    h2 = jnp.dot(h1, w2_ref[...], preferred_element_type=jnp.float32)
    h2 = jnp.maximum(h2 + bias_ref[1:2, 0:F2], 0.0)
    logits = jnp.dot(h2, w3_ref[...], preferred_element_type=jnp.float32)
    logits = logits + bias_ref[2:3, 0:O]
    if out_softmax:
        m = jnp.max(logits, axis=-1, keepdims=True)
        e = jnp.exp(logits - m)
        logits = e / jnp.sum(e, axis=-1, keepdims=True)
    out_ref[...] = logits


# ---------------------------------------------------------------------------
# Wrapper-side layout plumbing
# ---------------------------------------------------------------------------
def _im2col_3x3(x):
    """x: (B, H, W) single channel -> (B*H*W, 9) patches, tap order (dy, dx)."""
    B, H, W = x.shape
    xp = jnp.pad(x, ((0, 0), (1, 1), (1, 1)))
    cols = [xp[:, dy:dy + H, dx:dx + W] for dy in range(3) for dx in range(3)]
    return jnp.stack(cols, axis=-1).reshape(B * H * W, 9)


def _tap_validity_mask(B, H, W):
    """(B*H*W, 9) f32: 1.0 where the tap's source pixel is inside the image."""
    ys = jnp.arange(H)[:, None]
    xs = jnp.arange(W)[None, :]
    cols = []
    for t in range(9):
        dy = t // 3 - 1
        dx = t % 3 - 1
        v = ((ys + dy >= 0) & (ys + dy < H) & (xs + dx >= 0) & (xs + dx < W))
        cols.append(jnp.broadcast_to(v, (B, H, W)).reshape(B * H * W))
    return jnp.stack(cols, axis=-1).astype(jnp.float32)


def cnn_forward(x, params, *, input_len, output_num, conv_size=(32, 64),
                fc_size=(128, 64), out_softmax=False, tile_b=None):
    wc1, wc2, bconv, w1, w2, w3, bmlp = params
    C1, C2 = conv_size
    F1, F2 = fc_size
    O = output_num
    H = W = input_len
    HW = H * W

    x = x.reshape(-1, H, W).astype(jnp.float32)
    B = x.shape[0]
    if tile_b is None:          # for large B choose a multiple of 8 (e.g. 256)
        tile_b = B
    assert B % tile_b == 0
    nb = B // tile_b
    RB = tile_b * HW
    PAD = -(-(W + 1) // 8) * 8  # margin >= max shift (W+1), multiple of 8

    # Pack per-row inputs (patches + tap mask) into ONE blocked array -> 1 DMA.
    pm = jnp.concatenate([_im2col_3x3(x), _tap_validity_mask(B, H, W)], axis=1)

    conv_cost = pl.CostEstimate(
        flops=2 * B * HW * 9 * C1 + 2 * B * HW * 9 * C1 * C2,
        transcendentals=0,
        bytes_accessed=4 * (pm.size + wc1.size + wc2.size + bconv.size + B * HW * C2))

    a2 = pl.pallas_call(
        functools.partial(_conv_kernel, W=W, C1=C1, C2=C2, PAD=PAD, RB=RB),
        out_shape=jax.ShapeDtypeStruct((B * HW, C2), jnp.float32),
        grid=(nb,),
        in_specs=[
            pl.BlockSpec((RB, 18), lambda i: (i, 0)),            # patches|mask
            pl.BlockSpec((9, C1), lambda i: (0, 0)),             # conv1 weight
            pl.BlockSpec((9 * C1, C2), lambda i: (0, 0)),        # conv2 weight
            pl.BlockSpec(bconv.shape, lambda i: (0, 0)),         # packed biases
        ],
        out_specs=pl.BlockSpec((RB, C2), lambda i: (i, 0)),
        scratch_shapes=[pltpu.VMEM((PAD + RB + PAD, C1), jnp.float32)],
        compiler_params=pltpu.CompilerParams(dimension_semantics=("parallel",)),
        cost_estimate=conv_cost,
    )(pm, wc1, wc2, bconv)

    # Flatten: free row-major reshape in HBM; features ordered (y, x, c).
    D = HW * C2
    h = a2.reshape(B, D)

    mlp_cost = pl.CostEstimate(
        flops=2 * B * (D * F1 + F1 * F2 + F2 * O),
        transcendentals=B * O if out_softmax else 0,
        bytes_accessed=4 * (B * D + D * F1 + F1 * F2 + F2 * O + bmlp.size + B * O))

    out = pl.pallas_call(
        functools.partial(_mlp_kernel, F1=F1, F2=F2, O=O, out_softmax=out_softmax),
        out_shape=jax.ShapeDtypeStruct((B, O), jnp.float32),
        grid=(nb,),
        in_specs=[
            pl.BlockSpec((tile_b, D), lambda i: (i, 0)),         # activations
            pl.BlockSpec((D, F1), lambda i: (0, 0)),             # fc1 weight
            pl.BlockSpec((F1, F2), lambda i: (0, 0)),            # fc2 weight
            pl.BlockSpec((F2, O), lambda i: (0, 0)),             # head weight
            pl.BlockSpec(bmlp.shape, lambda i: (0, 0)),          # packed biases
        ],
        out_specs=pl.BlockSpec((tile_b, O), lambda i: (i, 0)),
        compiler_params=pltpu.CompilerParams(dimension_semantics=("parallel",)),
        cost_estimate=mlp_cost,
    )(h, w1, w2, w3, bmlp)
    return out


# ---------------------------------------------------------------------------
# Parameter init (PyTorch-Linear/Conv style U(-1/sqrt(fan_in), 1/sqrt(fan_in)))
# ---------------------------------------------------------------------------
def init_params(key, input_len, output_num, conv_size=(32, 64), fc_size=(128, 64)):
    C1, C2 = conv_size
    F1, F2 = fc_size
    O = output_num
    D = input_len * input_len * C2

    def uni(k, shape, fan_in):
        b = 1.0 / jnp.sqrt(jnp.float32(fan_in))
        return jax.random.uniform(k, shape, jnp.float32, -b, b)

    ks = jax.random.split(key, 10)
    wc1 = uni(ks[0], (9, C1), 9)                 # (kh*kw*1, C1)
    bc1 = uni(ks[1], (C1,), 9)
    wc2 = uni(ks[2], (9 * C1, C2), 9 * C1)       # rows ordered (kh, kw, cin)
    bc2 = uni(ks[3], (C2,), 9 * C1)
    w1 = uni(ks[4], (D, F1), D)                  # flatten order (y, x, c)
    b1 = uni(ks[5], (F1,), D)
    w2 = uni(ks[6], (F1, F2), F1)
    b2 = uni(ks[7], (F2,), F1)
    w3 = uni(ks[8], (F2, O), F2)
    b3 = uni(ks[9], (O,), F2)

    bconv = jnp.zeros((2, max(C1, C2)), jnp.float32)
    bconv = bconv.at[0, :C1].set(bc1).at[1, :C2].set(bc2)
    bmlp = jnp.zeros((3, max(F1, F2, O)), jnp.float32)
    bmlp = bmlp.at[0, :F1].set(b1).at[1, :F2].set(b2).at[2, :O].set(b3)
    return (wc1, wc2, bconv, w1, w2, w3, bmlp)


# ---------------------------------------------------------------------------
# Pure-JAX reference (same math, independent conv implementation)
# ---------------------------------------------------------------------------
def reference_forward(x, params, *, input_len, output_num, conv_size=(32, 64),
                      fc_size=(128, 64), out_softmax=False):
    wc1, wc2, bconv, w1, w2, w3, bmlp = params
    C1, C2 = conv_size
    F1, F2 = fc_size
    O = output_num
    H = W = input_len
    hp = lax.Precision.HIGHEST

    x4 = x.reshape(-1, H, W, 1).astype(jnp.float32)
    B = x4.shape[0]
    dn = ('NHWC', 'HWIO', 'NHWC')
    k1 = wc1.reshape(3, 3, 1, C1)
    k2 = wc2.reshape(3, 3, C1, C2)
    a1 = jax.nn.relu(lax.conv_general_dilated(x4, k1, (1, 1), 'SAME',
                                              dimension_numbers=dn,
                                              precision=hp) + bconv[0, :C1])
    a2 = jax.nn.relu(lax.conv_general_dilated(a1, k2, (1, 1), 'SAME',
                                              dimension_numbers=dn,
                                              precision=hp) + bconv[1, :C2])
    h = a2.reshape(B, H * W * C2)
    h1 = jax.nn.relu(jnp.dot(h, w1, precision=hp) + bmlp[0, :F1])
    h2 = jax.nn.relu(jnp.dot(h1, w2, precision=hp) + bmlp[1, :F2])
    out = jnp.dot(h2, w3, precision=hp) + bmlp[2, :O]
    if out_softmax:
        out = jax.nn.softmax(out, axis=-1)
    return out


if __name__ == "__main__":
    INPUT_LEN = 8
    OUTPUT_NUM = 4
    CONV_SIZE = (32, 64)      # module default conv widths
    FC_SIZE = (128, 64)       # small fc widths for the demo
    BATCH = 4

    key = jax.random.PRNGKey(0)
    kp, kx = jax.random.split(key)
    params = init_params(kp, INPUT_LEN, OUTPUT_NUM, CONV_SIZE, FC_SIZE)
    x = jax.random.normal(kx, (BATCH, 1, INPUT_LEN, INPUT_LEN), jnp.float32)

    out = cnn_forward(x, params, input_len=INPUT_LEN, output_num=OUTPUT_NUM,
                      conv_size=CONV_SIZE, fc_size=FC_SIZE, out_softmax=False)
    out = jax.block_until_ready(out)

    ref = reference_forward(x, params, input_len=INPUT_LEN, output_num=OUTPUT_NUM,
                            conv_size=CONV_SIZE, fc_size=FC_SIZE, out_softmax=False)
    assert out.shape == (BATCH, OUTPUT_NUM)
    assert jnp.allclose(out, ref, atol=2e-3, rtol=2e-3), \
        f"mismatch vs reference, max abs diff = {jnp.max(jnp.abs(out - ref))}"
    print("KERNEL_OK")
</pallas_src>

<mosaic_0001>
module attributes {stable_mosaic.version = 11 : i64} {
  func.func @_conv_kernel(%arg0: i32, %arg1: memref<256x18xf32, #tpu.memory_space<vmem>>, %arg2: memref<9x32xf32, #tpu.memory_space<vmem>>, %arg3: memref<288x64xf32, #tpu.memory_space<vmem>>, %arg4: memref<2x64xf32, #tpu.memory_space<vmem>>, %arg5: memref<256x64xf32, #tpu.memory_space<vmem>>, %arg6: memref<288x32xf32, #tpu.memory_space<vmem>>) attributes {dimension_semantics = [#tpu.dimension_semantics<parallel>], iteration_bounds = array<i64: 1>, scalar_prefetch = 0 : i64, scratch_operands = 1 : i64, tpu.core_type = #tpu.core_type<tc>, window_params = [{transform_indices = @transform_0, window_bounds = array<i64: 256, 18>}, {pipeline_mode = #tpu.pipeline_mode<synchronous>, transform_indices = @transform_1, window_bounds = array<i64: 9, 32>}, {pipeline_mode = #tpu.pipeline_mode<synchronous>, transform_indices = @transform_2, window_bounds = array<i64: 288, 64>}, {pipeline_mode = #tpu.pipeline_mode<synchronous>, transform_indices = @transform_3, window_bounds = array<i64: 2, 64>}, {transform_indices = @transform_4, window_bounds = array<i64: 256, 64>}]} {
    %c0 = arith.constant 0 : index
    %c0_0 = arith.constant 0 : index
    %0 = vector.load %arg1[%c0, %c0_0] : memref<256x18xf32, #tpu.memory_space<vmem>>, vector<256x9xf32>
    %c0_1 = arith.constant 0 : index
    %c0_2 = arith.constant 0 : index
    %1 = vector.load %arg2[%c0_1, %c0_2] : memref<9x32xf32, #tpu.memory_space<vmem>>, vector<9x32xf32>
    %cst = arith.constant dense<0.000000e+00> : vector<256x32xf32>
    %2 = tpu.matmul %0, %1, %cst {dimension_numbers = #tpu.dot_dimension_numbers<[1], [0], [0], [1], [0, 0, 1, 1], [], []>} : vector<256x9xf32>, vector<9x32xf32>, vector<256x32xf32> -> vector<256x32xf32>
    %c0_3 = arith.constant 0 : index
    %c0_4 = arith.constant 0 : index
    %3 = vector.load %arg4[%c0_3, %c0_4] : memref<2x64xf32, #tpu.memory_space<vmem>>, vector<1x32xf32>
    %4 = vector.broadcast %3 : vector<1x32xf32> to vector<256x32xf32>
    %5 = arith.addf %2, %4 : vector<256x32xf32>
    %cst_5 = arith.constant 0.000000e+00 : f32
    %6 = vector.broadcast %cst_5 : f32 to vector<256x32xf32>
    %7 = arith.maximumf %5, %6 : vector<256x32xf32>
    %cst_6 = arith.constant 0.000000e+00 : f32
    %8 = vector.broadcast %cst_6 : f32 to vector<288x32xf32>
    %c0_7 = arith.constant 0 : index
    %c0_8 = arith.constant 0 : index
    %9 = vector.load %arg6[%c0_7, %c0_8] : memref<288x32xf32, #tpu.memory_space<vmem>>, vector<288x32xf32>
    tpu.vector_store %arg6[%c0_7, %c0_8], %8 {strides = array<i32>} : memref<288x32xf32, #tpu.memory_space<vmem>>, vector<288x32xf32>,
    %c16 = arith.constant 16 : index
    %c0_9 = arith.constant 0 : index
    %10 = vector.load %arg6[%c16, %c0_9] : memref<288x32xf32, #tpu.memory_space<vmem>>, vector<256x32xf32>
    tpu.vector_store %arg6[%c16, %c0_9], %7 {strides = array<i32>} : memref<288x32xf32, #tpu.memory_space<vmem>>, vector<256x32xf32>,
    %cst_10 = arith.constant 0.000000e+00 : f32
    %11 = vector.broadcast %cst_10 : f32 to vector<256x64xf32>
    %c7 = arith.constant 7 : index
    %c0_11 = arith.constant 0 : index
    %12 = vector.load %arg6[%c7, %c0_11] : memref<288x32xf32, #tpu.memory_space<vmem>>, vector<256x32xf32>
    %c0_12 = arith.constant 0 : index
    %c9 = arith.constant 9 : index
    %13 = vector.load %arg1[%c0_12, %c9] : memref<256x18xf32, #tpu.memory_space<vmem>>, vector<256x1xf32>
    %14 = vector.broadcast %13 : vector<256x1xf32> to vector<256x32xf32>
    %15 = arith.mulf %12, %14 : vector<256x32xf32>
    %c0_13 = arith.constant 0 : index
    %c0_14 = arith.constant 0 : index
    %16 = vector.load %arg3[%c0_13, %c0_14] : memref<288x64xf32, #tpu.memory_space<vmem>>, vector<32x64xf32>
    %cst_15 = arith.constant dense<0.000000e+00> : vector<256x64xf32>
    %17 = tpu.matmul %15, %16, %cst_15 {dimension_numbers = #tpu.dot_dimension_numbers<[1], [0], [0], [1], [0, 0, 1, 1], [], []>} : vector<256x32xf32>, vector<32x64xf32>, vector<256x64xf32> -> vector<256x64xf32>
    %18 = arith.addf %11, %17 : vector<256x64xf32>
    %c8 = arith.constant 8 : index
    %c0_16 = arith.constant 0 : index
    %19 = vector.load %arg6[%c8, %c0_16] : memref<288x32xf32, #tpu.memory_space<vmem>>, vector<256x32xf32>
    %c0_17 = arith.constant 0 : index
    %c10 = arith.constant 10 : index
    %20 = vector.load %arg1[%c0_17, %c10] : memref<256x18xf32, #tpu.memory_space<vmem>>, vector<256x1xf32>
    %21 = vector.broadcast %20 : vector<256x1xf32> to vector<256x32xf32>
    %22 = arith.mulf %19, %21 : vector<256x32xf32>
    %c32 = arith.constant 32 : index
    %c0_18 = arith.constant 0 : index
    %23 = vector.load %arg3[%c32, %c0_18] : memref<288x64xf32, #tpu.memory_space<vmem>>, vector<32x64xf32>
    %cst_19 = arith.constant dense<0.000000e+00> : vector<256x64xf32>
    %24 = tpu.matmul %22, %23, %cst_19 {dimension_numbers = #tpu.dot_dimension_numbers<[1], [0], [0], [1], [0, 0, 1, 1], [], []>} : vector<256x32xf32>, vector<32x64xf32>, vector<256x64xf32> -> vector<256x64xf32>
    %25 = arith.addf %18, %24 : vector<256x64xf32>
    %c9_20 = arith.constant 9 : index
    %c0_21 = arith.constant 0 : index
    %26 = vector.load %arg6[%c9_20, %c0_21] : memref<288x32xf32, #tpu.memory_space<vmem>>, vector<256x32xf32>
    %c0_22 = arith.constant 0 : index
    %c11 = arith.constant 11 : index
    %27 = vector.load %arg1[%c0_22, %c11] : memref<256x18xf32, #tpu.memory_space<vmem>>, vector<256x1xf32>
    %28 = vector.broadcast %27 : vector<256x1xf32> to vector<256x32xf32>
    %29 = arith.mulf %26, %28 : vector<256x32xf32>
    %c64 = arith.constant 64 : index
    %c0_23 = arith.constant 0 : index
    %30 = vector.load %arg3[%c64, %c0_23] : memref<288x64xf32, #tpu.memory_space<vmem>>, vector<32x64xf32>
    %cst_24 = arith.constant dense<0.000000e+00> : vector<256x64xf32>
    %31 = tpu.matmul %29, %30, %cst_24 {dimension_numbers = #tpu.dot_dimension_numbers<[1], [0], [0], [1], [0, 0, 1, 1], [], []>} : vector<256x32xf32>, vector<32x64xf32>, vector<256x64xf32> -> vector<256x64xf32>
    %32 = arith.addf %25, %31 : vector<256x64xf32>
    %c15 = arith.constant 15 : index
    %c0_25 = arith.constant 0 : index
    %33 = vector.load %arg6[%c15, %c0_25] : memref<288x32xf32, #tpu.memory_space<vmem>>, vector<256x32xf32>
    %c0_26 = arith.constant 0 : index
    %c12 = arith.constant 12 : index
    %34 = vector.load %arg1[%c0_26, %c12] : memref<256x18xf32, #tpu.memory_space<vmem>>, vector<256x1xf32>
    %35 = vector.broadcast %34 : vector<256x1xf32> to vector<256x32xf32>
    %36 = arith.mulf %33, %35 : vector<256x32xf32>
    %c96 = arith.constant 96 : index
    %c0_27 = arith.constant 0 : index
    %37 = vector.load %arg3[%c96, %c0_27] : memref<288x64xf32, #tpu.memory_space<vmem>>, vector<32x64xf32>
    %cst_28 = arith.constant dense<0.000000e+00> : vector<256x64xf32>
    %38 = tpu.matmul %36, %37, %cst_28 {dimension_numbers = #tpu.dot_dimension_numbers<[1], [0], [0], [1], [0, 0, 1, 1], [], []>} : vector<256x32xf32>, vector<32x64xf32>, vector<256x64xf32> -> vector<256x64xf32>
    %39 = arith.addf %32, %38 : vector<256x64xf32>
    %c16_29 = arith.constant 16 : index
    %c0_30 = arith.constant 0 : index
    %40 = vector.load %arg6[%c16_29, %c0_30] : memref<288x32xf32, #tpu.memory_space<vmem>>, vector<256x32xf32>
    %c0_31 = arith.constant 0 : index
    %c13 = arith.constant 13 : index
    %41 = vector.load %arg1[%c0_31, %c13] : memref<256x18xf32, #tpu.memory_space<vmem>>, vector<256x1xf32>
    %42 = vector.broadcast %41 : vector<256x1xf32> to vector<256x32xf32>
    %43 = arith.mulf %40, %42 : vector<256x32xf32>
    %c128 = arith.constant 128 : index
    %c0_32 = arith.constant 0 : index
    %44 = vector.load %arg3[%c128, %c0_32] : memref<288x64xf32, #tpu.memory_space<vmem>>, vector<32x64xf32>
    %cst_33 = arith.constant dense<0.000000e+00> : vector<256x64xf32>
    %45 = tpu.matmul %43, %44, %cst_33 {dimension_numbers = #tpu.dot_dimension_numbers<[1], [0], [0], [1], [0, 0, 1, 1], [], []>} : vector<256x32xf32>, vector<32x64xf32>, vector<256x64xf32> -> vector<256x64xf32>
    %46 = arith.addf %39, %45 : vector<256x64xf32>
    %c17 = arith.constant 17 : index
    %c0_34 = arith.constant 0 : index
    %47 = vector.load %arg6[%c17, %c0_34] : memref<288x32xf32, #tpu.memory_space<vmem>>, vector<256x32xf32>
    %c0_35 = arith.constant 0 : index
    %c14 = arith.constant 14 : index
    %48 = vector.load %arg1[%c0_35, %c14] : memref<256x18xf32, #tpu.memory_space<vmem>>, vector<256x1xf32>
    %49 = vector.broadcast %48 : vector<256x1xf32> to vector<256x32xf32>
    %50 = arith.mulf %47, %49 : vector<256x32xf32>
    %c160 = arith.constant 160 : index
    %c0_36 = arith.constant 0 : index
    %51 = vector.load %arg3[%c160, %c0_36] : memref<288x64xf32, #tpu.memory_space<vmem>>, vector<32x64xf32>
    %cst_37 = arith.constant dense<0.000000e+00> : vector<256x64xf32>
    %52 = tpu.matmul %50, %51, %cst_37 {dimension_numbers = #tpu.dot_dimension_numbers<[1], [0], [0], [1], [0, 0, 1, 1], [], []>} : vector<256x32xf32>, vector<32x64xf32>, vector<256x64xf32> -> vector<256x64xf32>
    %53 = arith.addf %46, %52 : vector<256x64xf32>
    %c23 = arith.constant 23 : index
    %c0_38 = arith.constant 0 : index
    %54 = vector.load %arg6[%c23, %c0_38] : memref<288x32xf32, #tpu.memory_space<vmem>>, vector<256x32xf32>
    %c0_39 = arith.constant 0 : index
    %c15_40 = arith.constant 15 : index
    %55 = vector.load %arg1[%c0_39, %c15_40] : memref<256x18xf32, #tpu.memory_space<vmem>>, vector<256x1xf32>
    %56 = vector.broadcast %55 : vector<256x1xf32> to vector<256x32xf32>
    %57 = arith.mulf %54, %56 : vector<256x32xf32>
    %c192 = arith.constant 192 : index
    %c0_41 = arith.constant 0 : index
    %58 = vector.load %arg3[%c192, %c0_41] : memref<288x64xf32, #tpu.memory_space<vmem>>, vector<32x64xf32>
    %cst_42 = arith.constant dense<0.000000e+00> : vector<256x64xf32>
    %59 = tpu.matmul %57, %58, %cst_42 {dimension_numbers = #tpu.dot_dimension_numbers<[1], [0], [0], [1], [0, 0, 1, 1], [], []>} : vector<256x32xf32>, vector<32x64xf32>, vector<256x64xf32> -> vector<256x64xf32>
    %60 = arith.addf %53, %59 : vector<256x64xf32>
    %c24 = arith.constant 24 : index
    %c0_43 = arith.constant 0 : index
    %61 = vector.load %arg6[%c24, %c0_43] : memref<288x32xf32, #tpu.memory_space<vmem>>, vector<256x32xf32>
    %c0_44 = arith.constant 0 : index
    %c16_45 = arith.constant 16 : index
    %62 = vector.load %arg1[%c0_44, %c16_45] : memref<256x18xf32, #tpu.memory_space<vmem>>, vector<256x1xf32>
    %63 = vector.broadcast %62 : vector<256x1xf32> to vector<256x32xf32>
    %64 = arith.mulf %61, %63 : vector<256x32xf32>
    %c224 = arith.constant 224 : index
    %c0_46 = arith.constant 0 : index
    %65 = vector.load %arg3[%c224, %c0_46] : memref<288x64xf32, #tpu.memory_space<vmem>>, vector<32x64xf32>
    %cst_47 = arith.constant dense<0.000000e+00> : vector<256x64xf32>
    %66 = tpu.matmul %64, %65, %cst_47 {dimension_numbers = #tpu.dot_dimension_numbers<[1], [0], [0], [1], [0, 0, 1, 1], [], []>} : vector<256x32xf32>, vector<32x64xf32>, vector<256x64xf32> -> vector<256x64xf32>
    %67 = arith.addf %60, %66 : vector<256x64xf32>
    %c25 = arith.constant 25 : index
    %c0_48 = arith.constant 0 : index
    %68 = vector.load %arg6[%c25, %c0_48] : memref<288x32xf32, #tpu.memory_space<vmem>>, vector<256x32xf32>
    %c0_49 = arith.constant 0 : index
    %c17_50 = arith.constant 17 : index
    %69 = vector.load %arg1[%c0_49, %c17_50] : memref<256x18xf32, #tpu.memory_space<vmem>>, vector<256x1xf32>
    %70 = vector.broadcast %69 : vector<256x1xf32> to vector<256x32xf32>
    %71 = arith.mulf %68, %70 : vector<256x32xf32>
    %c256 = arith.constant 256 : index
    %c0_51 = arith.constant 0 : index
    %72 = vector.load %arg3[%c256, %c0_51] : memref<288x64xf32, #tpu.memory_space<vmem>>, vector<32x64xf32>
    %cst_52 = arith.constant dense<0.000000e+00> : vector<256x64xf32>
    %73 = tpu.matmul %71, %72, %cst_52 {dimension_numbers = #tpu.dot_dimension_numbers<[1], [0], [0], [1], [0, 0, 1, 1], [], []>} : vector<256x32xf32>, vector<32x64xf32>, vector<256x64xf32> -> vector<256x64xf32>
    %74 = arith.addf %67, %73 : vector<256x64xf32>
    %c1 = arith.constant 1 : index
    %c0_53 = arith.constant 0 : index
    %75 = vector.load %arg4[%c1, %c0_53] : memref<2x64xf32, #tpu.memory_space<vmem>>, vector<1x64xf32>
    %76 = vector.broadcast %75 : vector<1x64xf32> to vector<256x64xf32>
    %77 = arith.addf %74, %76 : vector<256x64xf32>
    %cst_54 = arith.constant 0.000000e+00 : f32
    %78 = vector.broadcast %cst_54 : f32 to vector<256x64xf32>
    %79 = arith.maximumf %77, %78 : vector<256x64xf32>
    %c0_55 = arith.constant 0 : index
    %c0_56 = arith.constant 0 : index
    %80 = vector.load %arg5[%c0_55, %c0_56] : memref<256x64xf32, #tpu.memory_space<vmem>>, vector<256x64xf32>
    tpu.vector_store %arg5[%c0_55, %c0_56], %79 {strides = array<i32>} : memref<256x64xf32, #tpu.memory_space<vmem>>, vector<256x64xf32>,
    return
  }
  func.func @transform_0(%arg0: i32) -> (i32, i32) {
    %c0_i32 = arith.constant 0 : i32
    %c0_i32_0 = arith.constant 0 : i32
    return %arg0, %c0_i32 : i32, i32
  }
  func.func @transform_1(%arg0: i32) -> (i32, i32) {
    %c0_i32 = arith.constant 0 : i32
    %c0_i32_0 = arith.constant 0 : i32
    %c0_i32_1 = arith.constant 0 : i32
    return %c0_i32, %c0_i32_0 : i32, i32
  }
  func.func @transform_2(%arg0: i32) -> (i32, i32) {
    %c0_i32 = arith.constant 0 : i32
    %c0_i32_0 = arith.constant 0 : i32
    %c0_i32_1 = arith.constant 0 : i32
    return %c0_i32, %c0_i32_0 : i32, i32
  }
  func.func @transform_3(%arg0: i32) -> (i32, i32) {
    %c0_i32 = arith.constant 0 : i32
    %c0_i32_0 = arith.constant 0 : i32
    %c0_i32_1 = arith.constant 0 : i32
    return %c0_i32, %c0_i32_0 : i32, i32
  }
  func.func @transform_4(%arg0: i32) -> (i32, i32) {
    %c0_i32 = arith.constant 0 : i32
    %c0_i32_0 = arith.constant 0 : i32
    return %arg0, %c0_i32 : i32, i32
  }
}

</mosaic_0001>

<bundles_post_ra>
// kernel: tpu_custom_call.1
= control target key start
LH: loop header
LB: loop body
LE: loop exit
PB: predicated region body
PF: predicated region fallthrough
CT: control target
= control target key end

     0   :  { %vm150_vm0 = vcmask 1040384   ;;  %v4868_v0 = vmov 9   ;;  %vm53_vm1 = vcmask 72704   ;;  %v4869_v35 = vmov 10   ;;  %s7757_s1 = inlined_call_operand.vmem [shape: f32[9,32], index: 1, kind: input, shape index: {}]   ;;  %s7758_s0 = inlined_call_operand.vmem [shape: f32[256,18], index: 0, kind: input, shape index: {}]   ;;  %s7759_s3 = inlined_call_operand.vmem [shape: f32[2,64], index: 3, kind: input, shape index: {}]   ;;  %s7760_s2 = inlined_call_operand.vmem [shape: f32[288,64], index: 2, kind: input, shape index: {}]   ;;  %s7761_s4 = inlined_call_operand.vmem [shape: f32[256,64], index: 4, kind: output, shape index: {}]  }
   0x1   :  { %4743 = vset.pattern.permute.xlu2 %v4868_v0  ;;  %4742 = vset.pattern.permute.xlu1 %v4868_v0  ;;  %v50_v1 = vld [vmem:[%s7757_s1 + $0x8] sm:$0x1]  ;;  %v4909_v2 = vld [vmem:[%s7758_s0 + $0x20] sm:$0xff]  ;;  %v4914_v3 = vld [vmem:[%s7758_s0 + $0x10] sm:$0xff]  ;;  %vm299_vm2 = vcmask 261120   ;;  %v4870_v36 = vmov 0.0  }
   0x2   :  { %4741 = vset.pattern.permute.xlu0 %v4868_v0  ;;  %4404 = vmatpush.msk.msra.mxu0 %vm150_vm0, %v50_v1  ;;  %v4919_v4 = vld [vmem:[%s7758_s0] sm:$0xff]  ;;  %v4928_v6 = vld [vmem:[%s7758_s0 + $0x88] sm:$0xff]  ;;  %v4944_v8 = vld [vmem:[%s7758_s0 + $0x18] sm:$0xff]  ;;  %300 = vst.msk [vmem:[#allocation2] sm:$0xff] %vm299_vm2, %v4870_v36  ;;  %vm4367_vm3 = vcmask 523264  }
   0x3   :  { %v49_v5 = vld [vmem:[%s7757_s1] sm:$0xff]  ;;  %4725 = vmatpush.msk.msra.mxu3 %vm150_vm0, %v50_v1  ;;  %454 = vperm.xlu2 %4743, %v4909_v2   ;;  %v4939_v7 = vld [vmem:[%s7758_s0 + $0x28] sm:$0xff]  ;;  %v4955_v10 = vld [vmem:[%s7758_s0 + $0x90] sm:$0xff]  ;;  %301 = vst.msk [vmem:[#allocation2 + $0x8] sm:$0xff] %vm299_vm2, %v4870_v36 }
   0x4   :  { %444 = vperm.xlu1 %4742, %v4914_v3   ;;  %434 = vperm.xlu0 %4741, %v4919_v4   ;;  %v4949_v9 = vld [vmem:[%s7758_s0 + $0x8] sm:$0xff]  ;;  %v4966_v11 = vld [vmem:[%s7758_s0 + $0x40] sm:$0xff]  ;;  %v4971_v12 = vld [vmem:[%s7758_s0 + $0x38] sm:$0xff]  ;;  %302 = vst.msk [vmem:[#allocation2 + $0x10] sm:$0xff] %vm299_vm2, %v4870_v36 }
   0x5   :  { %169 = vmatpush.msra.mxu0 %v49_v5  ;;  %4726 = vmatpush.msra.mxu3 %v49_v5  ;;  %v4976_v13 = vld [vmem:[%s7758_s0 + $0x30] sm:$0xff]  ;;  %v4982_v14 = vld [vmem:[%s7758_s0 + $0x98] sm:$0xff]  ;;  %v5003_v17 = vld [vmem:[%s7758_s0 + $0x48] sm:$0xff]  ;;  %303 = vst.msk [vmem:[#allocation2 + $0x18] sm:$0xff] %vm299_vm2, %v4870_v36 }
   0x6   :  { %4405 = vmatmul.msk.f32.vlgmr.msra.gmra.mxu0 %vm53_vm1, %v4919_v4  ;;  %4422 = vmatmul.msk.f32.vlgmr.msra.gmra.mxu3 %vm53_vm1, %v4928_v6  ;;  %v4993_v15 = vld [vmem:[%s7758_s0 + $0x58] sm:$0xff]  ;;  %v4998_v16 = vld [vmem:[%s7758_s0 + $0x50] sm:$0xff]  ;;  %v5009_v18 = vld [vmem:[%s7758_s0 + $0xa0] sm:$0xff]  ;;  %304 = vst.msk [vmem:[#allocation2 + $0x20] sm:$0xff] %vm299_vm2, %v4870_v36 }
   0x7   :  { %v5020_v19 = vld [vmem:[%s7758_s0 + $0x70] sm:$0xff]  ;;  %v5025_v20 = vld [vmem:[%s7758_s0 + $0x68] sm:$0xff]  ;;  %v5030_v21 = vld [vmem:[%s7758_s0 + $0x60] sm:$0xff]  ;;  %305 = vst.msk [vmem:[#allocation2 + $0x28] sm:$0xff] %vm299_vm2, %v4870_v36 }
   0x8   :  { %v5036_v22 = vld [vmem:[%s7758_s0 + $0xa8] sm:$0xff]  ;;  %v5047_v23 = vld [vmem:[%s7758_s0 + $0x80] sm:$0xff]  ;;  %v5052_v24 = vld [vmem:[%s7758_s0 + $0x78] sm:$0xff]  ;;  %306 = vst.msk [vmem:[#allocation2 + $0x30] sm:$0xff] %vm299_vm2, %v4870_v36 }
   0x9   :  { %v5058_v25 = vld [vmem:[%s7758_s0 + $0xb0] sm:$0xff]  ;;  %v5070_v26 = vld [vmem:[%s7758_s0 + $0xb8] sm:$0xff]  ;;  %v5082_v27 = vld [vmem:[%s7758_s0 + $0xc0] sm:$0xff]  ;;  %307 = vst.msk [vmem:[#allocation2 + $0x38] sm:$0xff] %vm299_vm2, %v4870_v36 }
   0xa   :  { %v5093_v28 = vld [vmem:[%s7758_s0 + $0xd0] sm:$0xff]  ;;  %v5098_v29 = vld [vmem:[%s7758_s0 + $0xc8] sm:$0xff]  ;;  %v5115_v31 = vld [vmem:[%s7758_s0 + $0xe0] sm:$0xff]  ;;  %308 = vst.msk [vmem:[#allocation2 + $0x40] sm:$0xff] %vm299_vm2, %v4870_v36 }
   0xb   :  { %459 = vperm.xlu2 %4743, %v4939_v7   ;;  %v5110_v30 = vld [vmem:[%s7758_s0 + $0xe8] sm:$0xff]  ;;  %v5120_v32 = vld [vmem:[%s7758_s0 + $0xd8] sm:$0xff]  ;;  %v5137_v34 = vld [vmem:[%s7758_s0 + $0xf0] sm:$0xff]  ;;  %309 = vst.msk [vmem:[#allocation2 + $0x48] sm:$0xff] %vm299_vm2, %v4870_v36 }
   0xc   :  { %449 = vperm.xlu1 %4742, %v4944_v8   ;;  %439 = vperm.xlu0 %4741, %v4949_v9   ;;  %v5132_v33 = vld [vmem:[%s7758_s0 + $0xf8] sm:$0xff]  ;;  %310 = vst.msk [vmem:[#allocation2 + $0x50] sm:$0xff] %vm299_vm2, %v4870_v36  ;;  %v5272_v46 = vld [vmem:[%s7759_s3] ss:$0 sm:$0xff] }
   0xd   :  { %311 = vst.msk [vmem:[#allocation2 + $0x58] sm:$0xff] %vm299_vm2, %v4870_v36 }
   0xe   :  { %4406 = vmatmul.msk.f32.gmra.mxu0 %vm53_vm1, %v4949_v9  ;;  %4423 = vmatmul.msk.f32.gmra.mxu3 %vm53_vm1, %v4955_v10  ;;  %312 = vst.msk [vmem:[#allocation2 + $0x60] sm:$0xff] %vm299_vm2, %v4870_v36 }
   0xf   :  { %313 = vst.msk [vmem:[#allocation2 + $0x68] sm:$0xff] %vm299_vm2, %v4870_v36 }
  0x10   :  { %314 = vst.msk [vmem:[#allocation2 + $0x70] sm:$0xff] %vm299_vm2, %v4870_v36 }
  0x11   :  { %315 = vst.msk [vmem:[#allocation2 + $0x78] sm:$0xff] %vm299_vm2, %v4870_v36 }
  0x12   :  { %316 = vst.msk [vmem:[#allocation2 + $0x80] sm:$0xff] %vm299_vm2, %v4870_v36 }
  0x13   :  { %474 = vperm.xlu2 %4743, %v4966_v11   ;;  %317 = vst.msk [vmem:[#allocation2 + $0x88] sm:$0xff] %vm299_vm2, %v4870_v36 }
  0x14   :  { %469 = vperm.xlu1 %4742, %v4971_v12   ;;  %464 = vperm.xlu0 %4741, %v4976_v13   ;;  %318 = vst.msk [vmem:[#allocation2 + $0x90] sm:$0xff] %vm299_vm2, %v4870_v36 }
  0x15   :  { %319 = vst.msk [vmem:[#allocation2 + $0x98] sm:$0xff] %vm299_vm2, %v4870_v36 }
  0x16   :  { %4407 = vmatmul.msk.f32.gmra.mxu0 %vm53_vm1, %v4914_v3  ;;  %4424 = vmatmul.msk.f32.gmra.mxu3 %vm53_vm1, %v4982_v14  ;;  %320 = vst.msk [vmem:[#allocation2 + $0xa0] sm:$0xff] %vm299_vm2, %v4870_v36 }
  0x17   :  { %321 = vst.msk [vmem:[#allocation2 + $0xa8] sm:$0xff] %vm299_vm2, %v4870_v36 }
  0x18   :  { %322 = vst.msk [vmem:[#allocation2 + $0xb0] sm:$0xff] %vm299_vm2, %v4870_v36 }
  0x19   :  { %323 = vst.msk [vmem:[#allocation2 + $0xb8] sm:$0xff] %vm299_vm2, %v4870_v36 }
  0x1a   :  { %324 = vst.msk [vmem:[#allocation2 + $0xc0] sm:$0xff] %vm299_vm2, %v4870_v36 }
  0x1b   :  { %489 = vperm.xlu2 %4743, %v4993_v15   ;;  %325 = vst.msk [vmem:[#allocation2 + $0xc8] sm:$0xff] %vm299_vm2, %v4870_v36 }
  0x1c   :  { %484 = vperm.xlu1 %4742, %v4998_v16   ;;  %479 = vperm.xlu0 %4741, %v5003_v17   ;;  %326 = vst.msk [vmem:[#allocation2 + $0xd0] sm:$0xff] %vm299_vm2, %v4870_v36 }
  0x1d   :  { %327 = vst.msk [vmem:[#allocation2 + $0xd8] sm:$0xff] %vm299_vm2, %v4870_v36 }
  0x1e   :  { %4408 = vmatmul.msk.f32.gmra.mxu0 %vm53_vm1, %v4944_v8  ;;  %4425 = vmatmul.msk.f32.gmra.mxu3 %vm53_vm1, %v5009_v18  ;;  %328 = vst.msk [vmem:[#allocation2 + $0xe0] sm:$0xff] %vm299_vm2, %v4870_v36 }
  0x1f   :  { %329 = vst.msk [vmem:[#allocation2 + $0xe8] sm:$0xff] %vm299_vm2, %v4870_v36 }
  0x20   :  { %330 = vst.msk [vmem:[#allocation2 + $0xf0] sm:$0xff] %vm299_vm2, %v4870_v36 }
  0x21   :  { %331 = vst.msk [vmem:[#allocation2 + $0xf8] sm:$0xff] %vm299_vm2, %v4870_v36 }
  0x22   :  { %332 = vst.msk [vmem:[#allocation2 + $0x100] sm:$0xff] %vm299_vm2, %v4870_v36 }
  0x23   :  { %504 = vperm.xlu2 %4743, %v5020_v19   ;;  %333 = vst.msk [vmem:[#allocation2 + $0x108] sm:$0xff] %vm299_vm2, %v4870_v36 }
  0x24   :  { %499 = vperm.xlu1 %4742, %v5025_v20   ;;  %494 = vperm.xlu0 %4741, %v5030_v21   ;;  %334 = vst.msk [vmem:[#allocation2 + $0x110] sm:$0xff] %vm299_vm2, %v4870_v36 }
  0x25   :  { %335 = vst.msk [vmem:[#allocation2 + $0x118] sm:$0xff] %vm299_vm2, %v4870_v36 }
  0x26   :  { %4409 = vmatmul.msk.f32.gmra.mxu0 %vm53_vm1, %v4909_v2  ;;  %4426 = vmatmul.msk.f32.gmra.mxu3 %vm53_vm1, %v5036_v22 }
  0x2b   :  { %519 = vperm.xlu2 %4743, %v4928_v6  }
  0x2c   :  { %514 = vperm.xlu1 %4742, %v5047_v23   ;;  %509 = vperm.xlu0 %4741, %v5052_v24  }
  0x2e   :  { %4410 = vmatmul.msk.f32.gmra.mxu0 %vm53_vm1, %v4939_v7  ;;  %4427 = vmatmul.msk.f32.gmra.mxu3 %vm53_vm1, %v5058_v25 }
  0x33   :  { %534 = vperm.xlu2 %4743, %v5009_v18  }
  0x34   :  { %529 = vperm.xlu1 %4742, %v4982_v14   ;;  %524 = vperm.xlu0 %4741, %v4955_v10  }
  0x36   :  { %4411 = vmatmul.msk.f32.gmra.mxu0 %vm53_vm1, %v4976_v13  ;;  %4428 = vmatmul.msk.f32.gmra.mxu3 %vm53_vm1, %v5070_v26 }
  0x3b   :  { %549 = vperm.xlu2 %4743, %v5070_v26  }
  0x3c   :  { %544 = vperm.xlu1 %4742, %v5058_v25   ;;  %539 = vperm.xlu0 %4741, %v5036_v22  }
  0x3e   :  { %4412 = vmatmul.msk.f32.gmra.mxu0 %vm53_vm1, %v4971_v12  ;;  %4429 = vmatmul.msk.f32.gmra.mxu3 %vm53_vm1, %v5082_v27 }
  0x43   :  { %564 = vperm.xlu2 %4743, %v5093_v28  }
  0x44   :  { %559 = vperm.xlu1 %4742, %v5098_v29   ;;  %554 = vperm.xlu0 %4741, %v5082_v27  }
  0x46   :  { %4413 = vmatmul.msk.f32.gmra.mxu0 %vm53_vm1, %v4966_v11  ;;  %4430 = vmatmul.msk.f32.gmra.mxu3 %vm53_vm1, %v5098_v29 }
  0x4b   :  { %579 = vperm.xlu2 %4743, %v5110_v30  }
  0x4c   :  { %574 = vperm.xlu1 %4742, %v5115_v31   ;;  %569 = vperm.xlu0 %4741, %v5120_v32  }
  0x4e   :  { %4414 = vmatmul.msk.f32.gmra.mxu0 %vm53_vm1, %v5003_v17  ;;  %4431 = vmatmul.msk.f32.gmra.mxu3 %vm53_vm1, %v5093_v28 }
  0x53   :  { %4744 = vset.pattern.permute.xlu2 %v4869_v35 }
  0x54   :  { %589 = vperm.xlu1 %4742, %v5132_v33   ;;  %584 = vperm.xlu0 %4741, %v5137_v34  }
  0x55   :  { %661 = vperm.xlu2 %4744, %v4919_v4  }
  0x56   :  { %4415 = vmatmul.msk.f32.gmra.mxu0 %vm53_vm1, %v4998_v16  ;;  %4432 = vmatmul.msk.f32.gmra.mxu3 %vm53_vm1, %v5120_v32 }
  0x5c   :  { %4746 = vset.pattern.permute.xlu1 %v4869_v35  ;;  %4745 = vset.pattern.permute.xlu0 %v4869_v35 }
  0x5d   :  { %669 = vperm.xlu1 %4746, %v4914_v3   ;;  %673 = vperm.xlu2 %4744, %v4944_v8   ;;  %v5160_v37 = vpop.permute.xlu2 %454 }
  0x5e   :  { %665 = vperm.xlu0 %4745, %v4949_v9   ;;  %4416 = vmatmul.msk.f32.gmra.mxu0 %vm53_vm1, %v4993_v15 }
  0x5f   :  { %4433 = vmatmul.msk.f32.gmra.mxu3 %vm53_vm1, %v5115_v31 }
  0x65   :  { %677 = vperm.xlu1 %4746, %v4909_v2   ;;  %681 = vperm.xlu2 %4744, %v4939_v7   ;;  %v5185_v38 = vpop.permute.xlu2 %459 }
  0x66   :  { %685 = vperm.xlu0 %4745, %v4976_v13   ;;  %4417 = vmatmul.msk.f32.gmra.mxu0 %vm53_vm1, %v5030_v21 }
  0x67   :  { %4434 = vmatmul.msk.f32.gmra.mxu3 %vm53_vm1, %v5110_v30 }
  0x6d   :  { %689 = vperm.xlu1 %4746, %v4971_v12   ;;  %693 = vperm.xlu2 %4744, %v4966_v11   ;;  %v5210_v39 = vpop.permute.xlu2 %474 }
  0x6e   :  { %697 = vperm.xlu0 %4745, %v5003_v17   ;;  %4418 = vmatmul.msk.f32.gmra.mxu0 %vm53_vm1, %v5025_v20 }
  0x6f   :  { %4435 = vmatmul.msk.f32.gmra.mxu3 %vm53_vm1, %v5137_v34 }
  0x75   :  { %701 = vperm.xlu1 %4746, %v4998_v16   ;;  %705 = vperm.xlu2 %4744, %v4993_v15   ;;  %v5235_v40 = vpop.permute.xlu2 %489 }
  0x76   :  { %7781 = vst [vmem:[#allocation3_spill] sm:$0xff] %v5235_v40  ;;  %709 = vperm.xlu0 %4745, %v5030_v21   ;;  %v5240_v41 = vpop.permute.xlu1 %444  ;;  %v5242_v42 = vpop.permute.xlu0 %434  ;;  %4419 = vmatmul.msk.f32.gmra.mxu0 %vm53_vm1, %v5020_v19 }
  0x77   :  { %4436 = vmatmul.msk.f32.gmra.mxu3 %vm53_vm1, %v5132_v33 }
  0x7d   :  { %713 = vperm.xlu1 %4746, %v5025_v20   ;;  %717 = vperm.xlu2 %4744, %v5020_v19   ;;  %v5260_v43 = vpop.permute.xlu2 %504 }
  0x7e   :  { %7782 = vst [vmem:[#allocation4_spill] sm:$0xff] %v5260_v43  ;;  %721 = vperm.xlu0 %4745, %v5052_v24   ;;  %v5263_v44 = vpop.permute.xlu1 %449  ;;  %v5265_v45 = vpop.permute.xlu0 %439  ;;  %4420 = vmatmul.msk.f32.gmra.mxu0 %vm53_vm1, %v5052_v24 }
  0x83   :  { %v171_v47 = vpop.f32.mrf.mxu0 }
  0x84   :  { %v172_v48 = vadd.f32 %v5272_v46, %v171_v47 }
  0x85   :  { %725 = vperm.xlu1 %4746, %v5047_v23   ;;  %729 = vperm.xlu2 %4744, %v4928_v6   ;;  %v5277_v49 = vpop.permute.xlu2 %519 }
  0x86   :  { %7783 = vst [vmem:[#allocation5_spill] sm:$0xff] %v5277_v49  ;;  %v267_v50 = vmax.f32 %v172_v48, 0.0  ;;  %733 = vperm.xlu0 %4745, %v4955_v10   ;;  %v5280_v51 = vpop.permute.xlu1 %469  ;;  %v5282_v52 = vpop.permute.xlu0 %464  ;;  %4421 = vmatmul.msk.f32.gmra.mxu0 %vm53_vm1, %v5047_v23 }
  0x88   :  { %336 = vst.msk [vmem:[#allocation2 + $0x10] sm:$0xff] %vm299_vm2, %v267_v50 }
  0x89   :  { %v222_v53 = vpop.f32.mrf.mxu3 }
  0x8a   :  { %v223_v54 = vadd.f32 %v5272_v46, %v222_v53 }
  0x8b   :  { %v174_v55 = vpop.f32.mrf.mxu0 }
  0x8c   :  { %v284_v56 = vmax.f32 %v223_v54, 0.0  ;;  %v175_v57 = vadd.f32 %v5272_v46, %v174_v55 }
  0x8d   :  { %737 = vperm.xlu1 %4746, %v4982_v14   ;;  %741 = vperm.xlu2 %4744, %v5009_v18   ;;  %v5291_v58 = vpop.permute.xlu2 %534 }
  0x8e   :  { %7784 = vst [vmem:[#allocation6_spill] sm:$0xff] %v5291_v58  ;;  %v268_v59 = vmax.f32 %v175_v57, 0.0  ;;  %745 = vperm.xlu0 %4745, %v5036_v22   ;;  %v5295_v60 = vpop.permute.xlu1 %484  ;;  %v5297_v61 = vpop.permute.xlu0 %479 }
  0x8f   :  { %353 = vst.msk [vmem:[#allocation2 + $0x98] sm:$0xff] %vm299_vm2, %v284_v56 }
  0x90   :  { %337 = vst.msk [vmem:[#allocation2 + $0x18] sm:$0xff] %vm299_vm2, %v268_v59 }
  0x91   :  { %v225_v62 = vpop.f32.mrf.mxu3 }
  0x92   :  { %v226_v63 = vadd.f32 %v5272_v46, %v225_v62 }
  0x93   :  { %v177_v0 = vpop.f32.mrf.mxu0 }
  0x94   :  { %v285_v1 = vmax.f32 %v226_v63, 0.0  ;;  %v178_v5 = vadd.f32 %v5272_v46, %v177_v0  ;;  %v823_v0 = vld [vmem:[%s7760_s2 + $0x38] sm:$0xff] }
  0x95   :  { %749 = vperm.xlu1 %4746, %v5058_v25   ;;  %753 = vperm.xlu2 %4744, %v5070_v26   ;;  %v5304_v35 = vpop.permute.xlu2 %549 }
  0x96   :  { %7785 = vst [vmem:[#allocation7_spill] sm:$0xff] %v5304_v35  ;;  %v269_v36 = vmax.f32 %v178_v5, 0.0  ;;  %757 = vperm.xlu0 %4745, %v5082_v27   ;;  %v5308_v47 = vpop.permute.xlu1 %499  ;;  %v5310_v48 = vpop.permute.xlu0 %494  ;;  %932 = vmatpush.msra.mxu1 %v823_v0  ;;  %v628_v35 = vld [vmem:[#allocation2 + $0x8] sm:$0xff] }
  0x97   :  { %354 = vst.msk [vmem:[#allocation2 + $0xa0] sm:$0xff] %vm299_vm2, %v285_v1  ;;  %4727 = vmatpush.msra.mxu2 %v823_v0 }
  0x98   :  { %7786 = vst [vmem:[#allocation8_spill] sm:$0xff] %v5308_v47 }
  0x99   :  { %7787 = vst [vmem:[#allocation9_spill] sm:$0xff] %v5310_v48  ;;  %v228_v50 = vpop.f32.mrf.mxu3 }
  0x9a   :  { %338 = vst.msk [vmem:[#allocation2 + $0x20] sm:$0xff] %vm299_vm2, %v269_v36  ;;  %v229_v53 = vadd.f32 %v5272_v46, %v228_v50  ;;  %v822_v36 = vld [vmem:[%s7760_s2 + $0x30] sm:$0xff] }
  0x9b   :  { %v180_v54 = vpop.f32.mrf.mxu0  ;;  %933 = vmatpush.msra.mxu1 %v822_v36  ;;  %4728 = vmatpush.msra.mxu2 %v822_v36 }
  0x9c   :  { %v286_v55 = vmax.f32 %v229_v53, 0.0  ;;  %v181_v56 = vadd.f32 %v5272_v46, %v180_v54 }
  0x9d   :  { %761 = vperm.xlu1 %4746, %v5098_v29   ;;  %765 = vperm.xlu2 %4744, %v5093_v28   ;;  %v5317_v57 = vpop.permute.xlu2 %564 }
  0x9e   :  { %7788 = vst [vmem:[#allocation10_spill] sm:$0xff] %v5317_v57  ;;  %v270_v59 = vmax.f32 %v181_v56, 0.0  ;;  %769 = vperm.xlu0 %4745, %v5120_v32   ;;  %v5321_v62 = vpop.permute.xlu1 %514  ;;  %v5323_v63 = vpop.permute.xlu0 %509  ;;  %v4871_v57 = vmov 11  }
  0x9f   :  { %355 = vst.msk [vmem:[#allocation2 + $0xa8] sm:$0xff] %vm299_vm2, %v286_v55  ;;  %v821_v55 = vld [vmem:[%s7760_s2 + $0x28] sm:$0xff] }
  0xa0   :  { %7789 = vst [vmem:[#allocation11_spill] sm:$0xff] %v5321_v62  ;;  %934 = vmatpush.msra.mxu1 %v821_v55  ;;  %4729 = vmatpush.msra.mxu2 %v821_v55  ;;  %v630_v62 = vld [vmem:[#allocation2 + $0x18] sm:$0xff] }
  0xa1   :  { %7790 = vst [vmem:[#allocation12_spill] sm:$0xff] %v5323_v63  ;;  %v231_v1 = vpop.f32.mrf.mxu3  ;;  %v631_v43 = vld [vmem:[#allocation2 + $0x20] sm:$0xff] }
  0xa2   :  { %339 = vst.msk [vmem:[#allocation2 + $0x28] sm:$0xff] %vm299_vm2, %v270_v59  ;;  %v232_v5 = vadd.f32 %v5272_v46, %v231_v1 }
  0xa3   :  { %v183_v50 = vpop.f32.mrf.mxu0 }
  0xa4   :  { %v287_v53 = vmax.f32 %v232_v5, 0.0  ;;  %v184_v54 = vadd.f32 %v5272_v46, %v183_v50  ;;  %v820_v5 = vld [vmem:[%s7760_s2 + $0x20] sm:$0xff] }
  0xa5   :  { %773 = vperm.xlu1 %4746, %v5115_v31   ;;  %777 = vperm.xlu2 %4744, %v5110_v30   ;;  %v5339_v56 = vpop.permute.xlu2 %579 }
  0xa6   :  { %7791 = vst [vmem:[#allocation13_spill] sm:$0xff] %v5339_v56  ;;  %v271_v59 = vmax.f32 %v184_v54, 0.0  ;;  %781 = vperm.xlu0 %4745, %v5137_v34   ;;  %v5343_v0 = vpop.permute.xlu1 %529  ;;  %v5345_v1 = vpop.permute.xlu0 %524  ;;  %935 = vmatpush.msra.mxu1 %v820_v5 }
  0xa7   :  { %356 = vst.msk [vmem:[#allocation2 + $0xb0] sm:$0xff] %vm299_vm2, %v287_v53  ;;  %4730 = vmatpush.msra.mxu2 %v820_v5 }
  0xa8   :  { %7792 = vst [vmem:[#allocation14_spill] sm:$0xff] %v5343_v0 }
  0xa9   :  { %7793 = vst [vmem:[#allocation15_spill] sm:$0xff] %v5345_v1  ;;  %v234_v36 = vpop.f32.mrf.mxu3  ;;  %v632_v48 = vld [vmem:[#allocation2 + $0x28] sm:$0xff] }
  0xaa   :  { %340 = vst.msk [vmem:[#allocation2 + $0x30] sm:$0xff] %vm299_vm2, %v271_v59  ;;  %v235_v50 = vadd.f32 %v5272_v46, %v234_v36 }
  0xab   :  { %v186_v53 = vpop.f32.mrf.mxu0 }
  0xac   :  { %v288_v54 = vmax.f32 %v235_v50, 0.0  ;;  %v187_v56 = vadd.f32 %v5272_v46, %v186_v53 }
  0xad   :  { %785 = vperm.xlu1 %4746, %v5132_v33   ;;  %4747 = vset.pattern.permute.xlu2 %v4871_v57 }
  0xae   :  { %357 = vst.msk [vmem:[#allocation2 + $0xb8] sm:$0xff] %vm299_vm2, %v288_v54  ;;  %v272_v58 = vmax.f32 %v187_v56, 0.0  ;;  %4748 = vset.pattern.permute.xlu0 %v4871_v57  ;;  %v5355_v55 = vpop.permute.xlu1 %544  ;;  %1275 = vperm.xlu2 %4747, %v4919_v4   ;;  %v5358_v59 = vpop.permute.xlu0 %539 }
  0xaf   :  { %7794 = vst [vmem:[#allocation16_spill] sm:$0xff] %v5355_v55  ;;  %1279 = vperm.xlu0 %4748, %v4949_v9   ;;  %v662_v5 = vpop.permute.xlu2 %661 }
  0xb0   :  { %7795 = vst [vmem:[#allocation17_spill] sm:$0xff] %v5358_v59  ;;  %v788_v36 = vmul.f32 %v662_v5, %v628_v35 }
  0xb1   :  { %341 = vst.msk [vmem:[#allocation2 + $0x38] sm:$0xff] %vm299_vm2, %v272_v58  ;;  %v237_v50 = vpop.f32.mrf.mxu3 }
  0xb2   :  { %v238_v53 = vadd.f32 %v5272_v46, %v237_v50  ;;  %4437 = vmatmul.msk.f32.vlgmr.msra.gmra.mxu1 %vm299_vm2, %v788_v36 }
  0xb3   :  { %v189_v54 = vpop.f32.mrf.mxu0 }
  0xb4   :  { %v289_v56 = vmax.f32 %v238_v53, 0.0  ;;  %v190_v0 = vadd.f32 %v5272_v46, %v189_v54 }
  0xb5   :  { %4749 = vset.pattern.permute.xlu1 %v4871_v57 }
  0xb6   :  { %358 = vst.msk [vmem:[#allocation2 + $0xc0] sm:$0xff] %vm299_vm2, %v289_v56  ;;  %v273_v55 = vmax.f32 %v190_v0, 0.0  ;;  %1283 = vperm.xlu1 %4749, %v4914_v3   ;;  %v5367_v59 = vpop.permute.xlu1 %559  ;;  %1287 = vperm.xlu2 %4747, %v4944_v8   ;;  %v5370_v58 = vpop.permute.xlu0 %554 }
  0xb7   :  { %7796 = vst [vmem:[#allocation18_spill] sm:$0xff] %v5367_v59  ;;  %1299 = vperm.xlu0 %4748, %v4976_v13   ;;  %v5373_v35 = vpop.permute.xlu2 %673 }
  0xb8   :  { %7797 = vst [vmem:[#allocation19_spill] sm:$0xff] %v5370_v58 }
  0xb9   :  { %342 = vst.msk [vmem:[#allocation2 + $0x40] sm:$0xff] %vm299_vm2, %v273_v55  ;;  %v240_v5 = vpop.f32.mrf.mxu3 }
  0xba   :  { %v241_v57 = vadd.f32 %v5272_v46, %v240_v5 }
  0xbb   :  { %v192_v36 = vpop.f32.mrf.mxu0 }
  0xbc   :  { %v290_v50 = vmax.f32 %v241_v57, 0.0  ;;  %v193_v0 = vadd.f32 %v5272_v46, %v192_v36 }
  0xbe   :  { %359 = vst.msk [vmem:[#allocation2 + $0xc8] sm:$0xff] %vm299_vm2, %v290_v50  ;;  %v274_v53 = vmax.f32 %v193_v0, 0.0  ;;  %1291 = vperm.xlu1 %4749, %v4909_v2   ;;  %v5380_v54 = vpop.permute.xlu1 %574  ;;  %1295 = vperm.xlu2 %4747, %v4939_v7   ;;  %v5383_v56 = vpop.permute.xlu0 %569 }
  0xbf   :  { %7798 = vst [vmem:[#allocation20_spill] sm:$0xff] %v5380_v54  ;;  %1311 = vperm.xlu0 %4748, %v5003_v17   ;;  %v5386_v55 = vpop.permute.xlu2 %681 }
  0xc0   :  { %7799 = vst [vmem:[#allocation21_spill] sm:$0xff] %v5383_v56 }
  0xc1   :  { %343 = vst.msk [vmem:[#allocation2 + $0x48] sm:$0xff] %vm299_vm2, %v274_v53  ;;  %v243_v5 = vpop.f32.mrf.mxu3 }
  0xc2   :  { %v244_v57 = vadd.f32 %v5272_v46, %v243_v5 }
  0xc3   :  { %v195_v36 = vpop.f32.mrf.mxu0 }
  0xc4   :  { %v291_v50 = vmax.f32 %v244_v57, 0.0  ;;  %v196_v0 = vadd.f32 %v5272_v46, %v195_v36 }
  0xc6   :  { %360 = vst.msk [vmem:[#allocation2 + $0xd0] sm:$0xff] %vm299_vm2, %v291_v50  ;;  %v275_v54 = vmax.f32 %v196_v0, 0.0  ;;  %1303 = vperm.xlu1 %4749, %v4971_v12   ;;  %v5393_v59 = vpop.permute.xlu1 %589  ;;  %1307 = vperm.xlu2 %4747, %v4966_v11   ;;  %v5396_v56 = vpop.permute.xlu0 %584 }
  0xc7   :  { %7800 = vst [vmem:[#allocation22_spill] sm:$0xff] %v5393_v59  ;;  %1323 = vperm.xlu0 %4748, %v5030_v21   ;;  %v5399_v53 = vpop.permute.xlu2 %693 }
  0xc8   :  { %7801 = vst [vmem:[#allocation23_spill] sm:$0xff] %v5396_v56 }
  0xc9   :  { %344 = vst.msk [vmem:[#allocation2 + $0x50] sm:$0xff] %vm299_vm2, %v275_v54  ;;  %v246_v5 = vpop.f32.mrf.mxu3 }
  0xca   :  { %v247_v57 = vadd.f32 %v5272_v46, %v246_v5  ;;  %v629_v5 = vld [vmem:[#allocation2 + $0x10] sm:$0xff] }
  0xcb   :  { %v198_v36 = vpop.f32.mrf.mxu0 }
  0xcc   :  { %v292_v50 = vmax.f32 %v247_v57, 0.0  ;;  %v199_v0 = vadd.f32 %v5272_v46, %v198_v36 }
  0xce   :  { %361 = vst.msk [vmem:[#allocation2 + $0xd8] sm:$0xff] %vm299_vm2, %v292_v50  ;;  %v276_v59 = vmax.f32 %v199_v0, 0.0  ;;  %1315 = vperm.xlu1 %4749, %v4998_v16   ;;  %1319 = vperm.xlu2 %4747, %v4993_v15  }
  0xcf   :  { %1335 = vperm.xlu0 %4748, %v5052_v24   ;;  %v670_v56 = vpop.permute.xlu1 %669  ;;  %v5408_v58 = vpop.permute.xlu2 %705 }
  0xd0   :  { %345 = vst.msk [vmem:[#allocation2 + $0x58] sm:$0xff] %vm299_vm2, %v276_v59  ;;  %v666_v54 = vpop.permute.xlu0 %665 }
  0xd1   :  { %v789_v1 = vmul.f32 %v666_v54, %v629_v5  ;;  %v249_v57 = vpop.f32.mrf.mxu3  ;;  %v790_v5 = vmul.f32 %v670_v56, %v630_v62 }
  0xd2   :  { %v250_v36 = vadd.f32 %v5272_v46, %v249_v57 }
  0xd3   :  { %4438 = vmatmul.msk.f32.gmra.mxu1 %vm299_vm2, %v789_v1  ;;  %v201_v50 = vpop.f32.mrf.mxu0 }
  0xd4   :  { %v293_v0 = vmax.f32 %v250_v36, 0.0  ;;  %v202_v49 = vadd.f32 %v5272_v46, %v201_v50 }
  0xd6   :  { %362 = vst.msk [vmem:[#allocation2 + $0xe0] sm:$0xff] %vm299_vm2, %v293_v0  ;;  %v277_v63 = vmax.f32 %v202_v49, 0.0  ;;  %1327 = vperm.xlu1 %4749, %v5025_v20   ;;  %1331 = vperm.xlu2 %4747, %v5020_v19  }
  0xd7   :  { %1347 = vperm.xlu0 %4748, %v4955_v10   ;;  %v678_v59 = vpop.permute.xlu1 %677  ;;  %v5418_v54 = vpop.permute.xlu2 %717 }
  0xd8   :  { %346 = vst.msk [vmem:[#allocation2 + $0x60] sm:$0xff] %vm299_vm2, %v277_v63  ;;  %v5421_v1 = vpop.permute.xlu0 %685 }
  0xd9   :  { %v252_v57 = vpop.f32.mrf.mxu3 }
  0xda   :  { %v253_v36 = vadd.f32 %v5272_v46, %v252_v57 }
  0xdb   :  { %4439 = vmatmul.msk.f32.gmra.mxu1 %vm299_vm2, %v790_v5  ;;  %v204_v49 = vpop.f32.mrf.mxu0  ;;  %v791_v5 = vmul.f32 %v5373_v35, %v631_v43  ;;  %v1436_v43 = vld [vmem:[%s7760_s2 + $0x50] sm:$0xff] }
  0xdc   :  { %v294_v50 = vmax.f32 %v253_v36, 0.0  ;;  %v205_v0 = vadd.f32 %v5272_v46, %v204_v49 }
  0xde   :  { %363 = vst.msk [vmem:[#allocation2 + $0xe8] sm:$0xff] %vm299_vm2, %v294_v50  ;;  %v278_v47 = vmax.f32 %v205_v0, 0.0  ;;  %1339 = vperm.xlu1 %4749, %v5047_v23   ;;  %1343 = vperm.xlu2 %4747, %v4928_v6   ;;  %v1437_v50 = vld [vmem:[%s7760_s2 + $0x58] sm:$0xff] }
  0xdf   :  { %1359 = vperm.xlu0 %4748, %v5036_v22   ;;  %v5430_v62 = vpop.permute.xlu1 %689  ;;  %v5432_v63 = vpop.permute.xlu2 %729  ;;  %1546 = vmatpush.msrb.mxu3 %v1437_v50 }
  0xe0   :  { %347 = vst.msk [vmem:[#allocation2 + $0x68] sm:$0xff] %vm299_vm2, %v278_v47  ;;  %v5435_v56 = vpop.permute.xlu0 %697 }
  0xe1   :  { %1547 = vmatpush.msrb.mxu3 %v1436_v43  ;;  %v633_v43 = vld [vmem:[#allocation2 + $0x30] sm:$0xff] }
  0xe2   :  { %v255_v57 = vpop.f32.mrf.mxu3 }
  0xe3   :  { %v256_v36 = vadd.f32 %v5272_v46, %v255_v57  ;;  %4440 = vmatmul.msk.f32.gmra.mxu1 %vm299_vm2, %v791_v5  ;;  %v207_v49 = vpop.f32.mrf.mxu0 }
  0xe4   :  { %v208_v6 = vadd.f32 %v5272_v46, %v207_v49  ;;  %v1434_v49 = vld [vmem:[%s7760_s2 + $0x40] sm:$0xff] }
  0xe5   :  { %v295_v0 = vmax.f32 %v256_v36, 0.0 }
  0xe6   :  { %v279_v47 = vmax.f32 %v208_v6, 0.0  ;;  %1351 = vperm.xlu1 %4749, %v4982_v14   ;;  %1355 = vperm.xlu2 %4747, %v5009_v18   ;;  %v1435_v14 = vld [vmem:[%s7760_s2 + $0x48] sm:$0xff]  ;;  %v792_v18 = vmul.f32 %v678_v59, %v632_v48 }
  0xe7   :  { %364 = vst.msk [vmem:[#allocation2 + $0xf0] sm:$0xff] %vm299_vm2, %v295_v0  ;;  %1371 = vperm.xlu0 %4748, %v5082_v27   ;;  %v5451_v35 = vpop.permute.xlu1 %701  ;;  %v5453_v5 = vpop.permute.xlu2 %741  ;;  %1548 = vmatpush.msrb.mxu3 %v1435_v14 }
  0xe8   :  { %348 = vst.msk [vmem:[#allocation2 + $0x70] sm:$0xff] %vm299_vm2, %v279_v47  ;;  %v5456_v57 = vpop.permute.xlu0 %709 }
  0xe9   :  { %1549 = vmatpush.msrb.mxu3 %v1434_v49 }
  0xea   :  { %v258_v36 = vpop.f32.mrf.mxu3 }
  0xeb   :  { %v259_v6 = vadd.f32 %v5272_v46, %v258_v36  ;;  %4441 = vmatmul.msk.f32.gmra.mxu1 %vm299_vm2, %v792_v18  ;;  %v210_v50 = vpop.f32.mrf.mxu0  ;;  %v793_v18 = vmul.f32 %v5386_v55, %v633_v43 }
  0xec   :  { %v211_v0 = vadd.f32 %v5272_v46, %v210_v50  ;;  %v634_v50 = vld [vmem:[#allocation2 + $0x38] sm:$0xff] }
  0xed   :  { %v296_v47 = vmax.f32 %v259_v6, 0.0  ;;  %v794_v43 = vmul.f32 %v5421_v1, %v634_v50 }
  0xee   :  { %v280_v40 = vmax.f32 %v211_v0, 0.0  ;;  %1363 = vperm.xlu1 %4749, %v5058_v25   ;;  %1367 = vperm.xlu2 %4747, %v5070_v26  }
  0xef   :  { %365 = vst.msk [vmem:[#allocation2 + $0xf8] sm:$0xff] %vm299_vm2, %v296_v47  ;;  %1383 = vperm.xlu0 %4748, %v5120_v32   ;;  %v5471_v48 = vpop.permute.xlu1 %713  ;;  %v5473_v59 = vpop.permute.xlu2 %753 }
  0xf0   :  { %349 = vst.msk [vmem:[#allocation2 + $0x78] sm:$0xff] %vm299_vm2, %v280_v40  ;;  %v5476_v14 = vpop.permute.xlu0 %721 }
  0xf2   :  { %v261_v36 = vpop.f32.mrf.mxu3 }
  0xf3   :  { %v262_v49 = vadd.f32 %v5272_v46, %v261_v36  ;;  %4442 = vmatmul.msk.f32.gmra.mxu1 %vm299_vm2, %v793_v18  ;;  %v213_v25 = vpop.f32.mrf.mxu0 }
  0xf4   :  { %v214_v26 = vadd.f32 %v5272_v46, %v213_v25 }
  0xf5   :  { %v297_v6 = vmax.f32 %v262_v49, 0.0 }
  0xf6   :  { %v281_v0 = vmax.f32 %v214_v26, 0.0  ;;  %1375 = vperm.xlu1 %4749, %v5098_v29   ;;  %1379 = vperm.xlu2 %4747, %v5093_v28   ;;  %v635_v29 = vld [vmem:[#allocation2 + $0x40] sm:$0xff]  ;;  %v4872_v28 = vmov 12  }
  0xf7   :  { %366 = vst.msk [vmem:[#allocation2 + $0x100] sm:$0xff] %vm299_vm2, %v297_v6  ;;  %1395 = vperm.xlu0 %4748, %v5137_v34   ;;  %v726_v40 = vpop.permute.xlu1 %725  ;;  %v5486_v55 = vpop.permute.xlu2 %765  ;;  %v795_v6 = vmul.f32 %v5430_v62, %v635_v29 }
  0xf8   :  { %350 = vst.msk [vmem:[#allocation2 + $0x80] sm:$0xff] %vm299_vm2, %v281_v0  ;;  %v734_v47 = vpop.permute.xlu0 %733  ;;  %v636_v0 = vld [vmem:[#allocation2 + $0x48] sm:$0xff] }
  0xfb   :  { %4443 = vmatmul.msk.f32.gmra.mxu1 %vm299_vm2, %v794_v43  ;;  %v216_v18 = vpop.f32.mrf.mxu0 }
  0xfc   :  { %v217_v36 = vadd.f32 %v5272_v46, %v216_v18 }
  0xfe   :  { %v282_v49 = vmax.f32 %v217_v36, 0.0  ;;  %1387 = vperm.xlu1 %4749, %v5115_v31   ;;  %1391 = vperm.xlu2 %4747, %v5110_v30   ;;  %v1242_v36 = vld [vmem:[#allocation2 + $0x9] sm:$0xff] }
  0xff   :  { %4751 = vset.pattern.permute.xlu0 %v4872_v28  ;;  %v738_v25 = vpop.permute.xlu1 %737  ;;  %v5494_v26 = vpop.permute.xlu2 %777 }
 0x100   :  { %351 = vst.msk [vmem:[#allocation2 + $0x88] sm:$0xff] %vm299_vm2, %v282_v49  ;;  %1716 = vperm.xlu0 %4751, %v4949_v9   ;;  %v5498_v1 = vpop.permute.xlu0 %745  ;;  %v796_v49 = vmul.f32 %v5399_v53, %v636_v0 }
 0x103   :  { %4444 = vmatmul.msk.f32.gmra.mxu1 %vm299_vm2, %v795_v6  ;;  %v219_v50 = vpop.f32.mrf.mxu0 }
 0x104   :  { %v220_v31 = vadd.f32 %v5272_v46, %v219_v50 }
 0x106   :  { %v283_v30 = vmax.f32 %v220_v31, 0.0  ;;  %1399 = vperm.xlu1 %4749, %v5132_v33   ;;  %4750 = vset.pattern.permute.xlu2 %v4872_v28 }
 0x107   :  { %v5504_v43 = vpop.permute.xlu1 %749  ;;  %1712 = vperm.xlu2 %4750, %v4919_v4   ;;  %v644_v18 = vld [vmem:[#allocation2 + $0x88] sm:$0xff]  ;;  %v637_v4 = vld [vmem:[#allocation2 + $0x50] sm:$0xff] }
 0x108   :  { %352 = vst.msk [vmem:[#allocation2 + $0x90] sm:$0xff] %vm299_vm2, %v283_v30  ;;  %1736 = vperm.xlu0 %4751, %v4976_v13   ;;  %v5509_v9 = vpop.permute.xlu0 %757  ;;  %v1276_v62 = vpop.permute.xlu2 %1275  ;;  %v804_v29 = vmul.f32 %v726_v40, %v644_v18  ;;  %v797_v31 = vmul.f32 %v5435_v56, %v637_v4  ;;  %v647_v30 = vld [vmem:[#allocation2 + $0xa0] sm:$0xff] }
 0x109   :  { %v1402_v6 = vmul.f32 %v1276_v62, %v1242_v36  ;;  %v639_v18 = vld [vmem:[#allocation2 + $0x60] sm:$0xff]  ;;  %v1243_v62 = vld [vmem:[#allocation2 + $0x11] sm:$0xff] }
 0x10a   :  { %4453 = vmatmul.msk.f32.vlgmr.msra.gmra.mxu2 %vm299_vm2, %v804_v29  ;;  %v1244_v29 = vld [vmem:[#allocation2 + $0x19] sm:$0xff] }
 0x10b   :  { %4445 = vmatmul.msk.f32.gmra.mxu1 %vm299_vm2, %v796_v49  ;;  %4501 = vmatmul.msk.f32.vlgmr.msrb.gmra.mxu3 %vm299_vm2, %v1402_v6  ;;  %v1874_v6 = vld [vmem:[%s7760_s2 + $0x78] sm:$0xff] }
 0x10c   :  { %1983 = vmatpush.msrb.mxu0 %v1874_v6  ;;  %v5647_v6 = vld [vmem:[%s7758_s0 + $0xb8] sm:$0xff] }
 0x10e   :  { %4752 = vset.pattern.permute.xlu1 %v4872_v28  ;;  %v646_v28 = vld [vmem:[#allocation2 + $0x98] sm:$0xff] }
 0x10f   :  { %1720 = vperm.xlu1 %4752, %v4914_v3   ;;  %v5516_v33 = vpop.permute.xlu1 %761  ;;  %1724 = vperm.xlu2 %4750, %v4944_v8   ;;  %v645_v13 = vld [vmem:[#allocation2 + $0x90] sm:$0xff]  ;;  %v638_v3 = vld [vmem:[#allocation2 + $0x58] sm:$0xff]  ;;  %v806_v8 = vmul.f32 %v734_v47, %v646_v28  ;;  %v1245_v28 = vld [vmem:[#allocation2 + $0x21] sm:$0xff] }
 0x110   :  { %1748 = vperm.xlu0 %4751, %v5003_v17   ;;  %v5520_v40 = vpop.permute.xlu0 %769  ;;  %v1288_v53 = vpop.permute.xlu2 %1287  ;;  %v805_v50 = vmul.f32 %v5432_v63, %v645_v13  ;;  %v798_v56 = vmul.f32 %v5451_v35, %v638_v3  ;;  %v799_v35 = vmul.f32 %v5408_v58, %v639_v18 }
 0x112   :  { %4454 = vmatmul.msk.f32.gmra.mxu2 %vm299_vm2, %v805_v50 }
 0x113   :  { %4446 = vmatmul.msk.f32.gmra.mxu1 %vm299_vm2, %v797_v31 }
 0x117   :  { %1728 = vperm.xlu1 %4752, %v4909_v2   ;;  %v5527_v0 = vpop.permute.xlu1 %773  ;;  %1732 = vperm.xlu2 %4750, %v4939_v7   ;;  %v807_v7 = vmul.f32 %v738_v25, %v647_v30  ;;  %v1246_v30 = vld [vmem:[#allocation2 + $0x29] sm:$0xff] }
 0x118   :  { %1760 = vperm.xlu0 %4751, %v5030_v21   ;;  %v5531_v17 = vpop.permute.xlu0 %781  ;;  %v5533_v63 = vpop.permute.xlu2 %1295 }
 0x11a   :  { %4455 = vmatmul.msk.f32.gmra.mxu2 %vm299_vm2, %v806_v8  ;;  %v1405_v8 = vmul.f32 %v1288_v53, %v1245_v28  ;;  %v653_v28 = vld [vmem:[#allocation2 + $0xd0] sm:$0xff] }
 0x11b   :  { %4447 = vmatmul.msk.f32.gmra.mxu1 %vm299_vm2, %v798_v56 }
 0x11f   :  { %1740 = vperm.xlu1 %4752, %v4971_v12   ;;  %v5539_v2 = vpop.permute.xlu1 %785  ;;  %1744 = vperm.xlu2 %4750, %v4966_v11   ;;  %v627_v11 = vld [vmem:[%s7760_s2 + $0x18] sm:$0xff]  ;;  %v648_v12 = vld [vmem:[#allocation2 + $0xa8] sm:$0xff] }
 0x120   :  { %1772 = vperm.xlu0 %4751, %v5052_v24   ;;  %v5543_v21 = vpop.permute.xlu2 %1307  ;;  %1141 = vmatpush.msrb.mxu2 %v627_v11  ;;  %v640_v24 = vld [vmem:[#allocation2 + $0x68] sm:$0xff]  ;;  %v808_v58 = vmul.f32 %v5453_v5, %v648_v12  ;;  %v1247_v12 = vld [vmem:[#allocation2 + $0x31] sm:$0xff] }
 0x121   :  { %v1280_v47 = vpop.permute.xlu0 %1279  ;;  %v800_v4 = vmul.f32 %v5456_v57, %v640_v24 }
 0x122   :  { %v1403_v36 = vmul.f32 %v1280_v47, %v1243_v62  ;;  %4456 = vmatmul.msk.f32.gmra.mxu2 %vm299_vm2, %v807_v7  ;;  %v643_v47 = vld [vmem:[#allocation2 + $0x80] sm:$0xff]  ;;  %v5607_v62 = vld [vmem:[%s7758_s0 + $0x98] sm:$0xff] }
 0x123   :  { %4448 = vmatmul.msk.f32.gmra.mxu1 %vm299_vm2, %v799_v35 }
 0x124   :  { %4502 = vmatmul.msk.f32.gmra.mxu3 %vm299_vm2, %v1403_v36 }
 0x127   :  { %1752 = vperm.xlu1 %4752, %v4998_v16   ;;  %1756 = vperm.xlu2 %4750, %v4993_v15   ;;  %v641_v15 = vld [vmem:[#allocation2 + $0x70] sm:$0xff] }
 0x128   :  { %1784 = vperm.xlu0 %4751, %v4955_v10   ;;  %v1284_v25 = vpop.permute.xlu1 %1283  ;;  %v5556_v49 = vpop.permute.xlu2 %1319  ;;  %v649_v10 = vld [vmem:[#allocation2 + $0xb0] sm:$0xff]  ;;  %v801_v31 = vmul.f32 %v5471_v48, %v641_v15  ;;  %v5586_v48 = vld [vmem:[%s7758_s0 + $0x88] sm:$0xff]  ;;  %v1248_v15 = vld [vmem:[#allocation2 + $0x39] sm:$0xff] }
 0x129   :  { %v1404_v13 = vmul.f32 %v1284_v25, %v1244_v29  ;;  %v5562_v50 = vpop.permute.xlu0 %1299  ;;  %v809_v16 = vmul.f32 %v5498_v1, %v649_v10  ;;  %7802 = vst [vmem:[#allocation24_spill] sm:$0xff] %v5586_v48  ;;  %v1872_v25 = vld [vmem:[%s7760_s2 + $0x68] sm:$0xff]  ;;  %v1407_v29 = vmul.f32 %v5533_v63, %v1247_v12  ;;  %v5641_v63 = vld [vmem:[%s7758_s0 + $0xb0] sm:$0xff] }
 0x12a   :  { %4457 = vmatmul.msk.f32.gmra.mxu2 %vm299_vm2, %v808_v58  ;;  %v803_v58 = vmul.f32 %v5476_v14, %v643_v47  ;;  %v652_v14 = vld [vmem:[#allocation2 + $0xc8] sm:$0xff] }
 0x12b   :  { %4449 = vmatmul.msk.f32.gmra.mxu1 %vm299_vm2, %v800_v4  ;;  %v812_v4 = vmul.f32 %v5509_v9, %v652_v14  ;;  %v5671_v9 = vld [vmem:[%s7758_s0 + $0xd0] sm:$0xff] }
 0x12c   :  { %4503 = vmatmul.msk.f32.gmra.mxu3 %vm299_vm2, %v1404_v13  ;;  %v1250_v12 = vld [vmem:[#allocation2 + $0x49] sm:$0xff] }
 0x12f   :  { %1764 = vperm.xlu1 %4752, %v5025_v20   ;;  %1768 = vperm.xlu2 %4750, %v5020_v19   ;;  %v2311_v20 = vld [vmem:[%s7760_s2 + $0x98] sm:$0xff] }
 0x130   :  { %1796 = vperm.xlu0 %4751, %v5036_v22   ;;  %v1292_v5 = vpop.permute.xlu1 %1291  ;;  %v5571_v57 = vpop.permute.xlu2 %1331  ;;  %2420 = vmatpush.msrb.mxu1 %v2311_v20  ;;  %v650_v19 = vld [vmem:[#allocation2 + $0xb8] sm:$0xff]  ;;  %v813_v20 = vmul.f32 %v5516_v33, %v653_v28  ;;  %v5745_v28 = vld [vmem:[#allocation2 + $0xf] sm:$0xff] }
 0x131   :  { %v5574_v3 = vpop.permute.xlu0 %1311  ;;  %v642_v22 = vld [vmem:[#allocation2 + $0x78] sm:$0xff]  ;;  %v810_v1 = vmul.f32 %v5504_v43, %v650_v19  ;;  %v1406_v7 = vmul.f32 %v1292_v5, %v1246_v30  ;;  %v651_v43 = vld [vmem:[#allocation2 + $0xc0] sm:$0xff]  ;;  %v1408_v5 = vmul.f32 %v5562_v50, %v1248_v15  ;;  %v4873_v19 = vmov 13   ;;  %v5682_v30 = vld [vmem:[%s7758_s0 + $0x8] sm:$0xff] }
 0x132   :  { %4458 = vmatmul.msk.f32.gmra.mxu2 %vm299_vm2, %v809_v16  ;;  %v811_v35 = vmul.f32 %v5473_v59, %v651_v43  ;;  %v626_v59 = vld [vmem:[%s7760_s2 + $0x10] sm:$0xff]  ;;  %v5697_v43 = vld [vmem:[%s7758_s0 + $0xe0] sm:$0xff] }
 0x133   :  { %4450 = vmatmul.msk.f32.gmra.mxu1 %vm299_vm2, %v801_v31  ;;  %1142 = vmatpush.msrb.mxu2 %v626_v59  ;;  %v264_v31 = vpop.f32.mrf.mxu3  ;;  %v5725_v59 = vld [vmem:[%s7758_s0 + $0xf8] sm:$0xff] }
 0x134   :  { %4504 = vmatmul.msk.f32.gmra.mxu3 %vm299_vm2, %v1405_v8  ;;  %v265_v8 = vadd.f32 %v5272_v46, %v264_v31  ;;  %v1251_v15 = vld [vmem:[#allocation2 + $0x51] sm:$0xff] }
 0x136   :  { %v298_v50 = vmax.f32 %v265_v8, 0.0  ;;  %v1411_v8 = vmul.f32 %v5574_v3, %v1251_v15  ;;  %v5759_v3 = vld [vmem:[%s7758_s0 + $0x10] sm:$0xff] }
 0x137   :  { %1776 = vperm.xlu1 %4752, %v5047_v23   ;;  %1780 = vperm.xlu2 %4750, %v5586_v48   ;;  %v802_v23 = vmul.f32 %v5418_v54, %v642_v22  ;;  %v5613_v54 = vld [vmem:[%s7758_s0 + $0xa0] sm:$0xff] }
 0x138   :  { %1808 = vperm.xlu0 %4751, %v5082_v27   ;;  %v5591_v53 = vpop.permute.xlu1 %1303  ;;  %v5593_v56 = vpop.permute.xlu2 %1343  ;;  %v1873_v27 = vld [vmem:[%s7760_s2 + $0x70] sm:$0xff]  ;;  %v1249_v22 = vld [vmem:[#allocation2 + $0x41] sm:$0xff]  ;;  %367 = vst.msk [vmem:[#allocation2 + $0x108] sm:$0xff] %vm299_vm2, %v298_v50 }
 0x139   :  { %v5595_v18 = vpop.permute.xlu0 %1323  ;;  %1984 = vmatpush.msrb.mxu0 %v1873_v27  ;;  %v1409_v33 = vmul.f32 %v5591_v53, %v1249_v22  ;;  %v654_v27 = vld [vmem:[#allocation2 + $0xd8] sm:$0xff]  ;;  %v5703_v53 = vld [vmem:[%s7758_s0 + $0xe8] sm:$0xff] }
 0x13a   :  { %4459 = vmatmul.msk.f32.gmra.mxu2 %vm299_vm2, %v810_v1  ;;  %v814_v47 = vmul.f32 %v5486_v55, %v654_v27  ;;  %v655_v55 = vld [vmem:[#allocation2 + $0xe0] sm:$0xff]  ;;  %v656_v22 = vld [vmem:[#allocation2 + $0xe8] sm:$0xff]  ;;  %v5767_v27 = vld [vmem:[%s7758_s0 + $0x18] sm:$0xff] }
 0x13b   :  { %4451 = vmatmul.msk.f32.gmra.mxu1 %vm299_vm2, %v802_v23  ;;  %1985 = vmatpush.msrb.mxu0 %v1872_v25  ;;  %v5714_v25 = vld [vmem:[%s7758_s0 + $0x30] sm:$0xff]  ;;  %v815_v14 = vmul.f32 %v5520_v40, %v655_v55  ;;  %v624_v55 = vld [vmem:[%s7760_s2] sm:$0xff] }
 0x13c   :  { %4505 = vmatmul.msk.f32.gmra.mxu3 %vm299_vm2, %v1406_v7  ;;  %v2310_v7 = vld [vmem:[%s7760_s2 + $0x90] sm:$0xff] }
 0x13d   :  { %2421 = vmatpush.msrb.mxu1 %v2310_v7 }
 0x13f   :  { %1788 = vperm.xlu1 %4752, %v5607_v62   ;;  %1792 = vperm.xlu2 %4750, %v5613_v54  }
 0x140   :  { %1820 = vperm.xlu0 %4751, %v5120_v32   ;;  %v5618_v36 = vpop.permute.xlu1 %1315  ;;  %v5620_v11 = vpop.permute.xlu2 %1355  ;;  %v1871_v32 = vld [vmem:[%s7760_s2 + $0x60] sm:$0xff] }
 0x141   :  { %v5622_v24 = vpop.permute.xlu0 %1335  ;;  %1986 = vmatpush.msrb.mxu0 %v1871_v32  ;;  %v1410_v32 = vmul.f32 %v5543_v21, %v1250_v12  ;;  %v5734_v21 = vld [vmem:[%s7758_s0] sm:$0xff] }
 0x142   :  { %4460 = vmatmul.msk.f32.gmra.mxu2 %vm299_vm2, %v811_v35 }
 0x143   :  { %4452 = vmatmul.msk.f32.gmra.mxu1 %vm299_vm2, %v803_v58 }
 0x144   :  { %4506 = vmatmul.msk.f32.gmra.mxu3 %vm299_vm2, %v1407_v29 }
 0x147   :  { %1800 = vperm.xlu1 %4752, %v5641_v63   ;;  %1804 = vperm.xlu2 %4750, %v5647_v6  }
 0x148   :  { %1832 = vperm.xlu0 %4751, %v5137_v34   ;;  %v5652_v13 = vpop.permute.xlu1 %1327  ;;  %v5654_v10 = vpop.permute.xlu2 %1367  ;;  %v5665_v34 = vld [vmem:[%s7758_s0 + $0xc8] sm:$0xff] }
 0x149   :  { %v5656_v16 = vpop.permute.xlu0 %1347 }
 0x14a   :  { %4461 = vmatmul.msk.f32.gmra.mxu2 %vm299_vm2, %v812_v4 }
 0x14c   :  { %4507 = vmatmul.msk.f32.gmra.mxu3 %vm299_vm2, %v1408_v5  ;;  %v5740_v5 = vld [vmem:[%s7758_s0 + $0x48] sm:$0xff] }
 0x14f   :  { %1812 = vperm.xlu1 %4752, %v5665_v34   ;;  %1816 = vperm.xlu2 %4750, %v5671_v9  }
 0x150   :  { %4754 = vset.pattern.permute.xlu0 %v4873_v19  ;;  %v5675_v46 = vpop.permute.xlu1 %1339  ;;  %v5677_v1 = vpop.permute.xlu2 %1379 }
 0x151   :  { %7803 = vst [vmem:[#allocation25_spill] sm:$0xff] %v5677_v1  ;;  %2153 = vperm.xlu0 %4754, %v5682_v30   ;;  %v5685_v23 = vpop.permute.xlu0 %1359 }
 0x152   :  { %4462 = vmatmul.msk.f32.gmra.mxu2 %vm299_vm2, %v813_v20  ;;  %v625_v20 = vld [vmem:[%s7760_s2 + $0x8] sm:$0xff] }
 0x153   :  { %1143 = vmatpush.msrb.mxu2 %v625_v20 }
 0x154   :  { %4508 = vmatmul.msk.f32.gmra.mxu3 %vm299_vm2, %v1409_v33  ;;  %v816_v33 = vmul.f32 %v5527_v0, %v656_v22  ;;  %v5773_v0 = vld [vmem:[%s7758_s0 + $0x60] sm:$0xff] }
 0x155   :  { %1144 = vmatpush.msrb.mxu2 %v624_v55  ;;  %v2309_v55 = vld [vmem:[%s7760_s2 + $0x88] sm:$0xff] }
 0x156   :  { %2422 = vmatpush.msrb.mxu1 %v2309_v55 }
 0x157   :  { %1824 = vperm.xlu1 %4752, %v5697_v43   ;;  %1828 = vperm.xlu2 %4750, %v5703_v53  }
 0x158   :  { %v5707_v35 = vpop.permute.xlu1 %1351  ;;  %v5709_v58 = vpop.permute.xlu2 %1391 }
 0x159   :  { %7804 = vst [vmem:[#allocation26_spill] sm:$0xff] %v5709_v58  ;;  %2173 = vperm.xlu0 %4754, %v5714_v25   ;;  %v5717_v29 = vpop.permute.xlu0 %1371  ;;  %v5851_v58 = vld [vmem:[%s7758_s0 + $0x50] sm:$0xff] }
 0x15a   :  { %7805 = vst [vmem:[#allocation27_spill] sm:$0xff] %v5717_v29  ;;  %4463 = vmatmul.msk.f32.gmra.mxu2 %vm299_vm2, %v814_v47  ;;  %v1252_v47 = vld [vmem:[#allocation2 + $0x59] sm:$0xff] }
 0x15b   :  { %7811 = vst [vmem:[#allocation33_spill] sm:$0xff] %v5851_v58  ;;  %v1256_v29 = vld [vmem:[#allocation2 + $0x79] sm:$0xff] }
 0x15c   :  { %4509 = vmatmul.msk.f32.gmra.mxu3 %vm299_vm2, %v1410_v32  ;;  %v1412_v32 = vmul.f32 %v5618_v36, %v1252_v47  ;;  %v5810_v47 = vld [vmem:[#allocation2 + $0x17] sm:$0xff] }
 0x15f   :  { %1836 = vperm.xlu1 %4752, %v5725_v59   ;;  %4753 = vset.pattern.permute.xlu2 %v4873_v19 }
 0x160   :  { %v5729_v4 = vpop.permute.xlu1 %1363  ;;  %2149 = vperm.xlu2 %4753, %v5734_v21  }
 0x161   :  { %2185 = vperm.xlu0 %4754, %v5740_v5   ;;  %v5743_v31 = vpop.permute.xlu0 %1383  ;;  %v1713_v40 = vpop.permute.xlu2 %1712 }
 0x162   :  { %7806 = vst [vmem:[#allocation28_spill] sm:$0xff] %v5743_v31  ;;  %v1839_v50 = vmul.f32 %v1713_v40, %v5745_v28  ;;  %4464 = vmatmul.msk.f32.gmra.mxu2 %vm299_vm2, %v815_v14  ;;  %v657_v14 = vld [vmem:[#allocation2 + $0xf0] sm:$0xff]  ;;  %v5790_v40 = vld [vmem:[%s7758_s0 + $0x20] sm:$0xff] }
 0x163   :  { %v817_v15 = vmul.f32 %v5494_v26, %v657_v14  ;;  %v5804_v26 = vld [vmem:[%s7758_s0 + $0x78] sm:$0xff] }
 0x164   :  { %4510 = vmatmul.msk.f32.gmra.mxu3 %vm299_vm2, %v1411_v8  ;;  %4533 = vmatmul.msk.f32.vlgmr.msrb.gmra.mxu0 %vm299_vm2, %v1839_v50  ;;  %v5798_v8 = vld [vmem:[%s7758_s0 + $0x28] sm:$0xff]  ;;  %v658_v14 = vld [vmem:[#allocation2 + $0xf8] sm:$0xff] }
 0x165   :  { %v1253_v50 = vld [vmem:[#allocation2 + $0x61] sm:$0xff] }
 0x166   :  { %v1413_v22 = vmul.f32 %v5556_v49, %v1253_v50  ;;  %v5823_v49 = vld [vmem:[%s7758_s0 + $0x38] sm:$0xff]  ;;  %v5831_v50 = vld [vmem:[%s7758_s0 + $0x40] sm:$0xff] }
 0x167   :  { %4755 = vset.pattern.permute.xlu1 %v4873_v19 }
 0x168   :  { %2157 = vperm.xlu1 %4755, %v5759_v3   ;;  %v5762_v7 = vpop.permute.xlu1 %1375  ;;  %2161 = vperm.xlu2 %4753, %v5767_v27  }
 0x169   :  { %7807 = vst [vmem:[#allocation29_spill] sm:$0xff] %v5762_v7  ;;  %2197 = vperm.xlu0 %4754, %v5773_v0   ;;  %v5776_v19 = vpop.permute.xlu0 %1395  ;;  %v5778_v12 = vpop.permute.xlu2 %1724  ;;  %v368_v7 = vld [vmem:[#allocation2 + $0x7] sm:$0xff] }
 0x16a   :  { %7808 = vst [vmem:[#allocation30_spill] sm:$0xff] %v5776_v19  ;;  %4465 = vmatmul.msk.f32.gmra.mxu2 %vm299_vm2, %v816_v33  ;;  %v818_v19 = vmul.f32 %v5531_v17, %v658_v14  ;;  %v5837_v17 = vld [vmem:[%s7758_s0 + $0x90] sm:$0xff]  ;;  %v659_v14 = vld [vmem:[#allocation2 + $0x100] sm:$0xff] }
 0x16c   :  { %4511 = vmatmul.msk.f32.gmra.mxu3 %vm299_vm2, %v1412_v32 }
 0x170   :  { %2165 = vperm.xlu1 %4755, %v5790_v40   ;;  %v5793_v36 = vpop.permute.xlu1 %1387  ;;  %2169 = vperm.xlu2 %4753, %v5798_v8  }
 0x171   :  { %7809 = vst [vmem:[#allocation31_spill] sm:$0xff] %v5793_v36  ;;  %2209 = vperm.xlu0 %4754, %v5804_v26   ;;  %v5807_v20 = vpop.permute.xlu2 %1732 }
 0x172   :  { %v1717_v33 = vpop.permute.xlu0 %1716  ;;  %4466 = vmatmul.msk.f32.gmra.mxu2 %vm299_vm2, %v817_v15 }
 0x173   :  { %v1840_v32 = vmul.f32 %v1717_v33, %v5810_v47 }
 0x174   :  { %4512 = vmatmul.msk.f32.gmra.mxu3 %vm299_vm2, %v1413_v22  ;;  %v1254_v22 = vld [vmem:[#allocation2 + $0x69] sm:$0xff] }
 0x175   :  { %4534 = vmatmul.msk.f32.gmra.mxu0 %vm299_vm2, %v1840_v32  ;;  %v1414_v32 = vmul.f32 %v5595_v18, %v1254_v22  ;;  %v5857_v18 = vld [vmem:[%s7758_s0 + $0x58] sm:$0xff]  ;;  %v5863_v22 = vld [vmem:[%s7758_s0 + $0xa8] sm:$0xff] }
 0x176   :  { %7812 = vst [vmem:[#allocation34_spill] sm:$0xff] %v5857_v18 }
 0x178   :  { %2177 = vperm.xlu1 %4755, %v5823_v49   ;;  %v5826_v15 = vpop.permute.xlu1 %1399  ;;  %2181 = vperm.xlu2 %4753, %v5831_v50  }
 0x179   :  { %7810 = vst [vmem:[#allocation32_spill] sm:$0xff] %v5826_v15  ;;  %2221 = vperm.xlu0 %4754, %v5837_v17   ;;  %v5840_v33 = vpop.permute.xlu2 %1744  ;;  %v819_v15 = vmul.f32 %v5539_v2, %v659_v14 }
 0x17a   :  { %v5843_v55 = vpop.permute.xlu0 %1736  ;;  %4467 = vmatmul.msk.f32.gmra.mxu2 %vm299_vm2, %v818_v19  ;;  %v1255_v19 = vld [vmem:[#allocation2 + $0x71] sm:$0xff] }
 0x17b   :  { %v1415_v36 = vmul.f32 %v5652_v13, %v1255_v19  ;;  %v5887_v13 = vld [vmem:[%s7758_s0 + $0x70] sm:$0xff] }
 0x17c   :  { %4513 = vmatmul.msk.f32.gmra.mxu3 %vm299_vm2, %v1414_v32  ;;  %v5866_v32 = vld [vmem:[#allocation2 + $0x1f] sm:$0xff]  ;;  %7814 = vst [vmem:[#allocation36_spill] sm:$0xff] %v5887_v13 }
 0x180   :  { %2189 = vperm.xlu1 %4755, %v5851_v58   ;;  %2193 = vperm.xlu2 %4753, %v5857_v18   ;;  %v592_v18 = vmul.f32 %v5242_v42, %v368_v7  ;;  %v5881_v58 = vld [vmem:[%s7758_s0 + $0x68] sm:$0xff]  ;;  %v5895_v42 = vld [vmem:[%s7758_s0 + $0xc0] sm:$0xff] }
 0x181   :  { %2233 = vperm.xlu0 %4754, %v5863_v22   ;;  %v1721_v2 = vpop.permute.xlu1 %1720  ;;  %v5868_v14 = vpop.permute.xlu2 %1756  ;;  %7813 = vst [vmem:[#allocation35_spill] sm:$0xff] %v5881_v58 }
 0x182   :  { %v1841_v31 = vmul.f32 %v1721_v2, %v5866_v32  ;;  %v5872_v1 = vpop.permute.xlu0 %1748  ;;  %4468 = vmatmul.msk.f32.gmra.mxu2 %vm299_vm2, %v819_v15  ;;  %v1416_v15 = vmul.f32 %v5571_v57, %v1256_v29  ;;  %v593_v57 = vmul.f32 %v5745_v28, %v5265_v45  ;;  %v1257_v29 = vld [vmem:[#allocation2 + $0x81] sm:$0xff] }
 0x183   :  { %v2308_v45 = vld [vmem:[%s7760_s2 + $0x80] sm:$0xff] }
 0x184   :  { %4514 = vmatmul.msk.f32.gmra.mxu3 %vm299_vm2, %v1415_v36  ;;  %4535 = vmatmul.msk.f32.gmra.mxu0 %vm299_vm2, %v1841_v31  ;;  %v5890_v36 = vld [vmem:[#allocation2 + $0x27] sm:$0xff] }
 0x185   :  { %v1842_v19 = vmul.f32 %v5778_v12, %v5890_v36  ;;  %v5919_v12 = vld [vmem:[#allocation2 + $0x2f] sm:$0xff]  ;;  %2423 = vmatpush.msrb.mxu1 %v2308_v45 }
 0x188   :  { %2201 = vperm.xlu1 %4755, %v5881_v58   ;;  %2205 = vperm.xlu2 %4753, %v5887_v13   ;;  %v5913_v58 = vld [vmem:[%s7758_s0 + $0x80] sm:$0xff] }
 0x189   :  { %2245 = vperm.xlu0 %4754, %v5895_v42   ;;  %v1729_v31 = vpop.permute.xlu1 %1728  ;;  %v5898_v7 = vpop.permute.xlu2 %1768  ;;  %7816 = vst [vmem:[#allocation38_spill] sm:$0xff] %v5913_v58 }
 0x18a   :  { %v5903_v2 = vpop.permute.xlu0 %1760  ;;  %4469 = vmatmul.msk.f32.vlgmr.msrb.gmra.mxu2 %vm299_vm2, %v592_v18  ;;  %v5924_v18 = vld [vmem:[%s7758_s0 + $0xd8] sm:$0xff] }
 0x18c   :  { %4515 = vmatmul.msk.f32.gmra.mxu3 %vm299_vm2, %v1416_v15  ;;  %4536 = vmatmul.msk.f32.gmra.mxu0 %vm299_vm2, %v1842_v19 }
 0x18d   :  { %v5908_v13 = vpop.f32.mrf.mxu2 }
 0x18e   :  { %7815 = vst [vmem:[#allocation37_spill] sm:$0xff] %v5908_v13  ;;  %v1417_v13 = vmul.f32 %v5622_v24, %v1257_v29  ;;  %v594_v24 = vmul.f32 %v5810_v47, %v5240_v41  ;;  %v5950_v29 = vld [vmem:[%s7758_s0 + $0xf0] sm:$0xff] }
 0x190   :  { %2213 = vperm.xlu1 %4755, %v5913_v58   ;;  %2217 = vperm.xlu2 %4753, %v5586_v48   ;;  %v1843_v48 = vmul.f32 %v1729_v31, %v5919_v12  ;;  %v1258_v31 = vld [vmem:[#allocation2 + $0x89] sm:$0xff] }
 0x191   :  { %2257 = vperm.xlu0 %4754, %v5924_v18   ;;  %v1741_v15 = vpop.permute.xlu1 %1740  ;;  %v5927_v19 = vpop.permute.xlu2 %1780  ;;  %v1418_v45 = vmul.f32 %v5675_v46, %v1258_v31  ;;  %v595_v46 = vmul.f32 %v5866_v32, %v5263_v44  ;;  %v5971_v31 = vld [vmem:[#allocation2 + $0x3f] sm:$0xff] }
 0x192   :  { %7817 = vst [vmem:[#allocation39_spill] sm:$0xff] %v5927_v19  ;;  %v5931_v58 = vpop.permute.xlu0 %1772  ;;  %4470 = vmatmul.msk.f32.gmra.mxu2 %vm299_vm2, %v593_v57  ;;  %v5945_v57 = vld [vmem:[#allocation2 + $0x37] sm:$0xff] }
 0x193   :  { %v1259_v19 = vld [vmem:[#allocation2 + $0x91] sm:$0xff]  ;;  %v1260_v32 = vld [vmem:[#allocation2 + $0x99] sm:$0xff] }
 0x194   :  { %4516 = vmatmul.msk.f32.gmra.mxu3 %vm299_vm2, %v1417_v13  ;;  %4537 = vmatmul.msk.f32.gmra.mxu0 %vm299_vm2, %v1843_v48 }
 0x195   :  { %v5939_v28 = vpop.f32.mrf.mxu2 }
 0x196   :  { %7818 = vst [vmem:[#allocation40_spill] sm:$0xff] %v5939_v28  ;;  %v1844_v28 = vmul.f32 %v5807_v20, %v5945_v57  ;;  %v7773_v20 = vmov 14  }
 0x198   :  { %2225 = vperm.xlu1 %4755, %v5607_v62   ;;  %2229 = vperm.xlu2 %4753, %v5613_v54  }
 0x199   :  { %2269 = vperm.xlu0 %4754, %v5950_v29   ;;  %v5953_v48 = vpop.permute.xlu1 %1752  ;;  %v5955_v13 = vpop.permute.xlu2 %1792 }
 0x19a   :  { %7819 = vst [vmem:[#allocation41_spill] sm:$0xff] %v5955_v13  ;;  %v5960_v41 = vpop.permute.xlu0 %1784  ;;  %4471 = vmatmul.msk.f32.gmra.mxu2 %vm299_vm2, %v594_v24 }
 0x19c   :  { %4517 = vmatmul.msk.f32.gmra.mxu3 %vm299_vm2, %v1418_v45  ;;  %4538 = vmatmul.msk.f32.gmra.mxu0 %vm299_vm2, %v1844_v28  ;;  %v1419_v28 = vmul.f32 %v5593_v56, %v1259_v19  ;;  %v2748_v56 = vld [vmem:[%s7760_s2 + $0xb8] sm:$0xff]  ;;  %v596_v19 = vmul.f32 %v5890_v36, %v5160_v37  ;;  %v1261_v36 = vld [vmem:[#allocation2 + $0xa1] sm:$0xff] }
 0x19d   :  { %v5965_v47 = vpop.f32.mrf.mxu2  ;;  %2857 = vmatpush.msra.mxu2 %v2748_v56 }
 0x19e   :  { %7820 = vst [vmem:[#allocation42_spill] sm:$0xff] %v5965_v47  ;;  %v1845_v47 = vmul.f32 %v5843_v55, %v5971_v31  ;;  %v3185_v55 = vld [vmem:[%s7760_s2 + $0xd8] sm:$0xff] }
 0x19f   :  { %3294 = vmatpush.msra.mxu3 %v3185_v55 }
 0x1a0   :  { %2237 = vperm.xlu1 %4755, %v5641_v63   ;;  %2241 = vperm.xlu2 %4753, %v5647_v6  }
 0x1a1   :  { %4757 = vset.pattern.permute.xlu0 %v7773_v20  ;;  %v5974_v24 = vpop.permute.xlu1 %1764  ;;  %v5976_v45 = vpop.permute.xlu2 %1804  ;;  %v1420_v20 = vmul.f32 %v5656_v16, %v1260_v32  ;;  %v3622_v16 = vld [vmem:[%s7760_s2 + $0xf8] sm:$0xff]  ;;  %v6024_v32 = vld [vmem:[#allocation2 + $0x4f] sm:$0xff] }
 0x1a2   :  { %7821 = vst [vmem:[#allocation43_spill] sm:$0xff] %v5976_v45  ;;  %2590 = vperm.xlu0 %4757, %v5682_v30   ;;  %v5982_v13 = vpop.permute.xlu0 %1796  ;;  %4472 = vmatmul.msk.f32.gmra.mxu2 %vm299_vm2, %v595_v46  ;;  %v5999_v46 = vld [vmem:[#allocation2 + $0x47] sm:$0xff]  ;;  %v1847_v55 = vmul.f32 %v5840_v33, %v6024_v32 }
 0x1a3   :  { %7822 = vst [vmem:[#allocation44_spill] sm:$0xff] %v5982_v13  ;;  %v6011_v13 = vpop.f32.mrf.mxu1  ;;  %3731 = vmatpush.msra.mxu0 %v3622_v16  ;;  %v1262_v33 = vld [vmem:[#allocation2 + $0xa9] sm:$0xff]  ;;  %v598_v16 = vmul.f32 %v5945_v57, %v5282_v52 }
 0x1a4   :  { %4518 = vmatmul.msk.f32.gmra.mxu3 %vm299_vm2, %v1419_v28  ;;  %4539 = vmatmul.msk.f32.gmra.mxu0 %vm299_vm2, %v1845_v47  ;;  %7825 = vst [vmem:[#allocation47_spill] sm:$0xff] %v6011_v13  ;;  %v2116_v13 = vld [vmem:[#allocation2 + $0x10] sm:$0xff] }
 0x1a5   :  { %v5987_v44 = vpop.f32.mrf.mxu2 }
 0x1a6   :  { %7823 = vst [vmem:[#allocation45_spill] sm:$0xff] %v5987_v44  ;;  %v1846_v44 = vmul.f32 %v1741_v15, %v5999_v46  ;;  %v597_v15 = vmul.f32 %v5919_v12, %v5185_v38  ;;  %v4059_v38 = vld [vmem:[%s7760_s2 + $0x118] sm:$0xff] }
 0x1a7   :  { %4168 = vmatpush.msra.mxu1 %v4059_v38 }
 0x1a8   :  { %2249 = vperm.xlu1 %4755, %v5665_v34   ;;  %2253 = vperm.xlu2 %4753, %v5671_v9  }
 0x1a9   :  { %v6001_v47 = vpop.permute.xlu1 %1776  ;;  %v6003_v28 = vpop.permute.xlu2 %1816 }
 0x1aa   :  { %7824 = vst [vmem:[#allocation46_spill] sm:$0xff] %v6003_v28  ;;  %2610 = vperm.xlu0 %4757, %v5714_v25   ;;  %v6008_v45 = vpop.permute.xlu0 %1808  ;;  %4473 = vmatmul.msk.f32.gmra.mxu2 %vm299_vm2, %v596_v19  ;;  %v6164_v28 = vld [vmem:[#allocation2 + $0x7f] sm:$0xff] }
 0x1ab   :  { %v6040_v12 = vpop.f32.mrf.mxu1 }
 0x1ac   :  { %4519 = vmatmul.msk.f32.gmra.mxu3 %vm299_vm2, %v1420_v20  ;;  %4540 = vmatmul.msk.f32.gmra.mxu0 %vm299_vm2, %v1846_v44  ;;  %v1421_v44 = vmul.f32 %v5707_v35, %v1261_v36  ;;  %v7830_v36 = vmov 14  }
 0x1ad   :  { %v6015_v37 = vpop.f32.mrf.mxu2 }
 0x1ae   :  { %7826 = vst [vmem:[#allocation48_spill] sm:$0xff] %v6015_v37 }
 0x1b0   :  { %2261 = vperm.xlu1 %4755, %v5697_v43   ;;  %2265 = vperm.xlu2 %4753, %v5703_v53  }
 0x1b1   :  { %v6026_v56 = vpop.permute.xlu1 %1788  ;;  %v6028_v20 = vpop.permute.xlu2 %1828 }
 0x1b2   :  { %7827 = vst [vmem:[#allocation49_spill] sm:$0xff] %v6028_v20  ;;  %2622 = vperm.xlu0 %4757, %v5740_v5   ;;  %v6034_v19 = vpop.permute.xlu0 %1820  ;;  %4474 = vmatmul.msk.f32.gmra.mxu2 %vm299_vm2, %v597_v15  ;;  %v6050_v15 = vld [vmem:[#allocation2 + $0x57] sm:$0xff] }
 0x1b3   :  { %7828 = vst [vmem:[#allocation50_spill] sm:$0xff] %v6034_v19 }
 0x1b4   :  { %4520 = vmatmul.msk.f32.gmra.mxu3 %vm299_vm2, %v1421_v44  ;;  %4541 = vmatmul.msk.f32.gmra.mxu0 %vm299_vm2, %v1847_v55  ;;  %v1422_v44 = vmul.f32 %v5620_v11, %v1262_v33  ;;  %v1848_v55 = vmul.f32 %v5872_v1, %v6050_v15  ;;  %v6067_v11 = vpop.f32.mrf.mxu1  ;;  %v1263_v1 = vld [vmem:[#allocation2 + $0xb1] sm:$0xff]  ;;  %v599_v33 = vmul.f32 %v5971_v31, %v5280_v51 }
 0x1b5   :  { %v6044_v35 = vpop.f32.mrf.mxu2  ;;  %v2117_v31 = vld [vmem:[#allocation2 + $0x18] sm:$0xff] }
 0x1b6   :  { %7829 = vst [vmem:[#allocation51_spill] sm:$0xff] %v6044_v35 }
 0x1b8   :  { %2273 = vperm.xlu1 %4755, %v5725_v59   ;;  %4756 = vset.pattern.permute.xlu2 %v7830_v36 }
 0x1b9   :  { %v6052_v37 = vpop.permute.xlu1 %1800  ;;  %2586 = vperm.xlu2 %4756, %v5734_v21  }
 0x1ba   :  { %2634 = vperm.xlu0 %4757, %v5773_v0   ;;  %v6059_v38 = vpop.permute.xlu0 %1832  ;;  %v2150_v35 = vpop.permute.xlu2 %2149  ;;  %4475 = vmatmul.msk.f32.gmra.mxu2 %vm299_vm2, %v598_v16 }
 0x1bb   :  { %7831 = vst [vmem:[#allocation52_spill] sm:$0xff] %v6059_v38  ;;  %v2276_v52 = vmul.f32 %v2150_v35, %v2116_v13  ;;  %v6072_v38 = vld [vmem:[#allocation2 + $0x5f] sm:$0xff]  ;;  %v1423_v35 = vmul.f32 %v5685_v23, %v1263_v1  ;;  %v6094_v1 = vld [vmem:[#allocation2 + $0x67] sm:$0xff] }
 0x1bc   :  { %4521 = vmatmul.msk.f32.gmra.mxu3 %vm299_vm2, %v1422_v44  ;;  %4542 = vmatmul.msk.f32.gmra.mxu0 %vm299_vm2, %v1848_v55  ;;  %v1849_v16 = vmul.f32 %v5953_v48, %v6072_v38  ;;  %v1264_v23 = vld [vmem:[#allocation2 + $0xb9] sm:$0xff]  ;;  %v600_v48 = vmul.f32 %v5999_v46, %v5210_v39 }
 0x1bd   :  { %4565 = vmatmul.msk.f32.vlgmr.msrb.gmra.mxu1 %vm299_vm2, %v2276_v52  ;;  %v6065_v57 = vpop.f32.mrf.mxu2  ;;  %v6090_v52 = vpop.f32.mrf.mxu1 }
 0x1be   :  { %7832 = vst [vmem:[#allocation53_spill] sm:$0xff] %v6065_v57  ;;  %v7840_v57 = vld [vmem:[#allocation33_spill] sm:$0xff] }
 0x1c0   :  { %4758 = vset.pattern.permute.xlu1 %v7830_v36 }
 0x1c1   :  { %2594 = vperm.xlu1 %4758, %v5759_v3   ;;  %v6075_v13 = vpop.permute.xlu1 %1812  ;;  %2598 = vperm.xlu2 %4756, %v5767_v27  }
 0x1c2   :  { %7833 = vst [vmem:[#allocation54_spill] sm:$0xff] %v6075_v13  ;;  %2646 = vperm.xlu0 %4757, %v5804_v26   ;;  %v6082_v44 = vpop.permute.xlu2 %2161  ;;  %4476 = vmatmul.msk.f32.gmra.mxu2 %vm299_vm2, %v599_v33  ;;  %v7848_v13 = vld [vmem:[#allocation29_spill] sm:$0xff] }
 0x1c3   :  { %v2154_v51 = vpop.permute.xlu0 %2153 }
 0x1c4   :  { %v2277_v36 = vmul.f32 %v2154_v51, %v2117_v31  ;;  %4522 = vmatmul.msk.f32.gmra.mxu3 %vm299_vm2, %v1423_v35  ;;  %4543 = vmatmul.msk.f32.gmra.mxu0 %vm299_vm2, %v1849_v16  ;;  %v1424_v35 = vmul.f32 %v5729_v4, %v1264_v23  ;;  %v1850_v16 = vmul.f32 %v5868_v14, %v6094_v1  ;;  %v1265_v31 = vld [vmem:[#allocation2 + $0xc1] sm:$0xff]  ;;  %v6117_v14 = vld [vmem:[#allocation2 + $0x6f] sm:$0xff] }
 0x1c5   :  { %v6087_v55 = vpop.f32.mrf.mxu2  ;;  %v601_v4 = vmul.f32 %v6024_v32, %v5297_v61 }
 0x1c6   :  { %7834 = vst [vmem:[#allocation55_spill] sm:$0xff] %v6087_v55  ;;  %4566 = vmatmul.msk.f32.gmra.mxu1 %vm299_vm2, %v2277_v36  ;;  %v6113_v36 = vpop.f32.mrf.mxu3  ;;  %v6142_v55 = vld [vmem:[#allocation2 + $0x77] sm:$0xff] }
 0x1c7   :  { %7837 = vst [vmem:[#allocation58_spill] sm:$0xff] %v6113_v36  ;;  %v7841_v36 = vld [vmem:[#allocation34_spill] sm:$0xff] }
 0x1c9   :  { %2602 = vperm.xlu1 %4758, %v5790_v40   ;;  %v6097_v33 = vpop.permute.xlu1 %1824  ;;  %2606 = vperm.xlu2 %4756, %v5798_v8  }
 0x1ca   :  { %7835 = vst [vmem:[#allocation56_spill] sm:$0xff] %v6097_v33  ;;  %2658 = vperm.xlu0 %4757, %v5837_v17   ;;  %v6104_v51 = vpop.permute.xlu2 %2169  ;;  %4477 = vmatmul.msk.f32.gmra.mxu2 %vm299_vm2, %v600_v48  ;;  %v1425_v48 = vmul.f32 %v5654_v10, %v1265_v31  ;;  %v1266_v10 = vld [vmem:[#allocation2 + $0xc9] sm:$0xff] }
 0x1cb   :  { %v6107_v39 = vpop.permute.xlu0 %2173 }
 0x1cc   :  { %4523 = vmatmul.msk.f32.gmra.mxu3 %vm299_vm2, %v1424_v35  ;;  %4544 = vmatmul.msk.f32.gmra.mxu0 %vm299_vm2, %v1850_v16  ;;  %v6124_v35 = vpop.f32.mrf.mxu1  ;;  %v1851_v16 = vmul.f32 %v5903_v2, %v6117_v14  ;;  %v602_v2 = vmul.f32 %v6050_v15, %v5295_v60 }
 0x1cd   :  { %v6111_v46 = vpop.f32.mrf.mxu2 }
 0x1ce   :  { %7836 = vst [vmem:[#allocation57_spill] sm:$0xff] %v6111_v46  ;;  %v6138_v31 = vpop.f32.mrf.mxu3 }
 0x1d1   :  { %2614 = vperm.xlu1 %4758, %v5823_v49   ;;  %v6120_v23 = vpop.permute.xlu1 %1836  ;;  %2618 = vperm.xlu2 %4756, %v5831_v50  }
 0x1d2   :  { %7838 = vst [vmem:[#allocation59_spill] sm:$0xff] %v6120_v23  ;;  %2670 = vperm.xlu0 %4757, %v5863_v22   ;;  %v6129_v46 = vpop.permute.xlu2 %2181  ;;  %4478 = vmatmul.msk.f32.gmra.mxu2 %vm299_vm2, %v601_v4  ;;  %v7842_v4 = vld [vmem:[#allocation27_spill] sm:$0xff] }
 0x1d3   :  { %v6132_v61 = vpop.permute.xlu0 %2185  ;;  %v1426_v23 = vmul.f32 %v7842_v4, %v1266_v10  ;;  %v1267_v10 = vld [vmem:[#allocation2 + $0xd1] sm:$0xff]  ;;  %v7845_v4 = vld [vmem:[#allocation3_spill] sm:$0xff] }
 0x1d4   :  { %4524 = vmatmul.msk.f32.gmra.mxu3 %vm299_vm2, %v1425_v48  ;;  %4545 = vmatmul.msk.f32.gmra.mxu0 %vm299_vm2, %v1851_v16  ;;  %v1852_v48 = vmul.f32 %v5974_v24, %v6142_v55  ;;  %v6155_v33 = vpop.f32.mrf.mxu1  ;;  %v603_v19 = vmul.f32 %v6072_v38, %v7845_v4 }
 0x1d5   :  { %v6136_v32 = vpop.f32.mrf.mxu2  ;;  %7843 = vst [vmem:[#allocation33_spill] sm:$0xff] %v6155_v33 }
 0x1d6   :  { %7839 = vst [vmem:[#allocation60_spill] sm:$0xff] %v6136_v32  ;;  %v2118_v32 = vld [vmem:[#allocation2 + $0x20] sm:$0xff] }
 0x1d9   :  { %2626 = vperm.xlu1 %4758, %v7840_v57   ;;  %2630 = vperm.xlu2 %4756, %v7841_v36  }
 0x1da   :  { %2682 = vperm.xlu0 %4757, %v5895_v42   ;;  %v2158_v16 = vpop.permute.xlu1 %2157  ;;  %v6150_v20 = vpop.permute.xlu2 %2193  ;;  %4479 = vmatmul.msk.f32.gmra.mxu2 %vm299_vm2, %v602_v2 }
 0x1db   :  { %v2278_v60 = vmul.f32 %v2158_v16, %v2118_v32  ;;  %v6153_v15 = vpop.permute.xlu0 %2197  ;;  %v6166_v2 = vpop.f32.mrf.mxu3  ;;  %v7846_v32 = vld [vmem:[#allocation35_spill] sm:$0xff]  ;;  %v7847_v16 = vld [vmem:[#allocation36_spill] sm:$0xff] }
 0x1dc   :  { %4525 = vmatmul.msk.f32.gmra.mxu3 %vm299_vm2, %v1426_v23  ;;  %4546 = vmatmul.msk.f32.gmra.mxu0 %vm299_vm2, %v1852_v48  ;;  %v1427_v23 = vmul.f32 %v7848_v13, %v1267_v10  ;;  %v1853_v48 = vmul.f32 %v5898_v7, %v6164_v28  ;;  %v6185_v7 = vpop.f32.mrf.mxu1  ;;  %v2747_v10 = vld [vmem:[%s7760_s2 + $0xb0] sm:$0xff] }
 0x1dd   :  { %4567 = vmatmul.msk.f32.gmra.mxu1 %vm299_vm2, %v2278_v60  ;;  %v6160_v24 = vpop.f32.mrf.mxu2  ;;  %v2119_v60 = vld [vmem:[#allocation2 + $0x28] sm:$0xff]  ;;  %7852 = vst [vmem:[#allocation61_spill] sm:$0xff] %v6185_v7  ;;  %2858 = vmatpush.msra.mxu2 %v2747_v10 }
 0x1de   :  { %7844 = vst [vmem:[#allocation34_spill] sm:$0xff] %v6160_v24  ;;  %v2279_v38 = vmul.f32 %v6082_v44, %v2119_v60  ;;  %v7853_v44 = vld [vmem:[#allocation9_spill] sm:$0xff]  ;;  %v7854_v60 = vld [vmem:[#allocation38_spill] sm:$0xff] }
 0x1e1   :  { %2638 = vperm.xlu1 %4758, %v7846_v32   ;;  %2642 = vperm.xlu2 %4756, %v7847_v16  }
 0x1e2   :  { %2694 = vperm.xlu0 %4757, %v5924_v18   ;;  %v2166_v24 = vpop.permute.xlu1 %2165  ;;  %v6174_v33 = vpop.permute.xlu2 %2205  ;;  %4480 = vmatmul.msk.f32.gmra.mxu2 %vm299_vm2, %v603_v19  ;;  %v1268_v18 = vld [vmem:[#allocation2 + $0xd9] sm:$0xff]  ;;  %v3184_v19 = vld [vmem:[%s7760_s2 + $0xd0] sm:$0xff] }
 0x1e3   :  { %7849 = vst [vmem:[#allocation27_spill] sm:$0xff] %v6174_v33  ;;  %v6178_v4 = vpop.permute.xlu0 %2209  ;;  %3295 = vmatpush.msra.mxu3 %v3184_v19  ;;  %v2120_v33 = vld [vmem:[#allocation2 + $0x30] sm:$0xff]  ;;  %v6210_v19 = vpop.f32.mrf.mxu3 }
 0x1e4   :  { %7850 = vst [vmem:[#allocation3_spill] sm:$0xff] %v6178_v4  ;;  %4526 = vmatmul.msk.f32.gmra.mxu3 %vm299_vm2, %v1427_v23  ;;  %4547 = vmatmul.msk.f32.gmra.mxu0 %vm299_vm2, %v1853_v48  ;;  %v604_v23 = vmul.f32 %v6094_v1, %v7853_v44  ;;  %v6195_v48 = vld [vmem:[#allocation2 + $0x87] sm:$0xff]  ;;  %v2280_v1 = vmul.f32 %v2166_v24, %v2120_v33  ;;  %v3621_v33 = vld [vmem:[%s7760_s2 + $0xf0] sm:$0xff] }
 0x1e5   :  { %4568 = vmatmul.msk.f32.gmra.mxu1 %vm299_vm2, %v2279_v38  ;;  %v6183_v13 = vpop.f32.mrf.mxu2  ;;  %v7855_v38 = vld [vmem:[#allocation24_spill] sm:$0xff]  ;;  %v1854_v7 = vmul.f32 %v5931_v58, %v6195_v48  ;;  %3732 = vmatpush.msra.mxu0 %v3621_v33  ;;  %v6253_v33 = vld [vmem:[#allocation2 + $0x97] sm:$0xff] }
 0x1e6   :  { %7851 = vst [vmem:[#allocation29_spill] sm:$0xff] %v6183_v13  ;;  %v7856_v13 = vld [vmem:[#allocation25_spill] sm:$0xff] }
 0x1e7   :  { %v1428_v4 = vmul.f32 %v7856_v13, %v1268_v18  ;;  %v6217_v13 = vpop.f32.mrf.mxu1  ;;  %v7858_v18 = vld [vmem:[#allocation8_spill] sm:$0xff] }
 0x1e8   :  { %v605_v44 = vmul.f32 %v6117_v14, %v7858_v18  ;;  %v6224_v24 = vld [vmem:[#allocation2 + $0x8f] sm:$0xff] }
 0x1e9   :  { %2650 = vperm.xlu1 %4758, %v7854_v60   ;;  %2654 = vperm.xlu2 %4756, %v7855_v38   ;;  %v2121_v38 = vld [vmem:[#allocation2 + $0x38] sm:$0xff] }
 0x1ea   :  { %2706 = vperm.xlu0 %4757, %v5950_v29   ;;  %v6203_v16 = vpop.permute.xlu1 %2177  ;;  %v6205_v32 = vpop.permute.xlu2 %2217  ;;  %4481 = vmatmul.msk.f32.gmra.mxu2 %vm299_vm2, %v604_v23  ;;  %v1269_v29 = vld [vmem:[#allocation2 + $0xe1] sm:$0xff]  ;;  %v1855_v23 = vmul.f32 %v6001_v47, %v6224_v24  ;;  %v2281_v18 = vmul.f32 %v6104_v51, %v2121_v38 }
 0x1eb   :  { %v6208_v10 = vpop.permute.xlu0 %2221  ;;  %v6249_v51 = vpop.f32.mrf.mxu3  ;;  %v7864_v38 = vld [vmem:[#allocation39_spill] sm:$0xff] }
 0x1ec   :  { %4527 = vmatmul.msk.f32.gmra.mxu3 %vm299_vm2, %v1428_v4  ;;  %4548 = vmatmul.msk.f32.gmra.mxu0 %vm299_vm2, %v1854_v7  ;;  %v7859_v4 = vld [vmem:[#allocation28_spill] sm:$0xff] }
 0x1ed   :  { %4569 = vmatmul.msk.f32.gmra.mxu1 %vm299_vm2, %v2280_v1  ;;  %v6215_v58 = vpop.f32.mrf.mxu2  ;;  %v1429_v7 = vmul.f32 %v7859_v4, %v1269_v29  ;;  %v7775_v1 = vmov 15   ;;  %v1270_v29 = vld [vmem:[#allocation2 + $0xe9] sm:$0xff]  ;;  %v7862_v4 = vld [vmem:[#allocation31_spill] sm:$0xff] }
 0x1ee   :  { %7857 = vst [vmem:[#allocation9_spill] sm:$0xff] %v6215_v58 }
 0x1f1   :  { %2662 = vperm.xlu1 %4758, %v5607_v62   ;;  %2666 = vperm.xlu2 %4756, %v5613_v54   ;;  %v4058_v54 = vld [vmem:[%s7760_s2 + $0x110] sm:$0xff] }
 0x1f2   :  { %4760 = vset.pattern.permute.xlu0 %v7775_v1  ;;  %v6232_v14 = vpop.permute.xlu1 %2189  ;;  %4482 = vmatmul.msk.f32.gmra.mxu2 %vm299_vm2, %v605_v44  ;;  %v6236_v58 = vpop.permute.xlu2 %2229  ;;  %v2122_v1 = vld [vmem:[#allocation2 + $0x40] sm:$0xff] }
 0x1f3   :  { %3027 = vperm.xlu0 %4760, %v5682_v30   ;;  %v6239_v62 = vpop.permute.xlu0 %2233  ;;  %4169 = vmatpush.msra.mxu1 %v4058_v54  ;;  %v7861_v30 = vld [vmem:[#allocation4_spill] sm:$0xff] }
 0x1f4   :  { %4528 = vmatmul.msk.f32.gmra.mxu3 %vm299_vm2, %v1429_v7  ;;  %4549 = vmatmul.msk.f32.gmra.mxu0 %vm299_vm2, %v1855_v23  ;;  %v606_v44 = vmul.f32 %v6142_v55, %v7861_v30  ;;  %v1430_v7 = vmul.f32 %v7862_v4, %v1270_v29  ;;  %v6258_v23 = vpop.f32.mrf.mxu1  ;;  %v2282_v55 = vmul.f32 %v6107_v39, %v2122_v1  ;;  %v1271_v29 = vld [vmem:[#allocation2 + $0xf1] sm:$0xff]  ;;  %v6276_v30 = vpop.f32.mrf.mxu3  ;;  %v1697_v1 = vld [vmem:[#allocation2 + $0x9f] sm:$0xff] }
 0x1f5   :  { %4570 = vmatmul.msk.f32.gmra.mxu1 %vm299_vm2, %v2281_v18  ;;  %v6247_v47 = vpop.f32.mrf.mxu2  ;;  %7863 = vst [vmem:[#allocation24_spill] sm:$0xff] %v6258_v23  ;;  %v1856_v18 = vmul.f32 %v7864_v38, %v6253_v33  ;;  %v2123_v38 = vld [vmem:[#allocation2 + $0x48] sm:$0xff] }
 0x1f6   :  { %7860 = vst [vmem:[#allocation38_spill] sm:$0xff] %v6247_v47  ;;  %v7880_v23 = vld [vmem:[#allocation44_spill] sm:$0xff] }
 0x1f9   :  { %2674 = vperm.xlu1 %4758, %v5641_v63   ;;  %2678 = vperm.xlu2 %4756, %v5647_v6  }
 0x1fa   :  { %v6262_v47 = vpop.permute.xlu1 %2201  ;;  %4483 = vmatmul.msk.f32.gmra.mxu2 %vm299_vm2, %v606_v44  ;;  %v6266_v54 = vpop.permute.xlu2 %2241  ;;  %v7866_v44 = vld [vmem:[#allocation12_spill] sm:$0xff] }
 0x1fb   :  { %3047 = vperm.xlu0 %4760, %v5714_v25   ;;  %v6269_v63 = vpop.permute.xlu0 %2245  ;;  %v607_v39 = vmul.f32 %v6164_v28, %v7866_v44  ;;  %v7867_v25 = vld [vmem:[#allocation26_spill] sm:$0xff] }
 0x1fc   :  { %4529 = vmatmul.msk.f32.gmra.mxu3 %vm299_vm2, %v1430_v7  ;;  %4550 = vmatmul.msk.f32.gmra.mxu0 %vm299_vm2, %v1856_v18  ;;  %v1431_v4 = vmul.f32 %v7867_v25, %v1271_v29  ;;  %v1857_v7 = vmul.f32 %v5960_v41, %v1697_v1  ;;  %v1272_v41 = vld [vmem:[#allocation2 + $0xf9] sm:$0xff]  ;;  %v6300_v29 = vpop.f32.mrf.mxu0 }
 0x1fd   :  { %4571 = vmatmul.msk.f32.gmra.mxu1 %vm299_vm2, %v2282_v55  ;;  %v6274_v6 = vpop.f32.mrf.mxu2  ;;  %v2283_v55 = vmul.f32 %v6203_v16, %v2123_v38  ;;  %7870 = vst [vmem:[#allocation4_spill] sm:$0xff] %v6300_v29  ;;  %v7871_v16 = vld [vmem:[#allocation11_spill] sm:$0xff] }
 0x1fe   :  { %7865 = vst [vmem:[#allocation25_spill] sm:$0xff] %v6274_v6  ;;  %v608_v44 = vmul.f32 %v6195_v48, %v7871_v16 }
 0x201   :  { %2686 = vperm.xlu1 %4758, %v5665_v34   ;;  %2690 = vperm.xlu2 %4756, %v5671_v9   ;;  %v6293_v34 = vpop.f32.mrf.mxu1 }
 0x202   :  { %v6284_v18 = vpop.permute.xlu1 %2213  ;;  %4484 = vmatmul.msk.f32.gmra.mxu2 %vm299_vm2, %v607_v39  ;;  %v6288_v6 = vpop.permute.xlu2 %2253  ;;  %7868 = vst [vmem:[#allocation8_spill] sm:$0xff] %v6293_v34  ;;  %v6304_v39 = vld [vmem:[#allocation2 + $0xa7] sm:$0xff]  ;;  %v2125_v34 = vld [vmem:[#allocation2 + $0x58] sm:$0xff] }
 0x203   :  { %3059 = vperm.xlu0 %4760, %v5740_v5   ;;  %v6291_v28 = vpop.permute.xlu0 %2257  ;;  %v7872_v5 = vld [vmem:[#allocation30_spill] sm:$0xff]  ;;  %v1858_v25 = vmul.f32 %v6026_v56, %v6304_v39 }
 0x204   :  { %4530 = vmatmul.msk.f32.gmra.mxu3 %vm299_vm2, %v1431_v4  ;;  %4551 = vmatmul.msk.f32.gmra.mxu0 %vm299_vm2, %v1857_v7  ;;  %v1432_v1 = vmul.f32 %v7872_v5, %v1272_v41  ;;  %v6311_v4 = vpop.f32.mrf.mxu3  ;;  %v2124_v7 = vld [vmem:[#allocation2 + $0x50] sm:$0xff]  ;;  %v1273_v41 = vld [vmem:[#allocation2 + $0x101] sm:$0xff]  ;;  %v1991_v16 = vpop.f32.mrf.mxu0 }
 0x205   :  { %4572 = vmatmul.msk.f32.gmra.mxu1 %vm299_vm2, %v2283_v55  ;;  %v6298_v9 = vpop.f32.mrf.mxu2  ;;  %v2284_v48 = vmul.f32 %v6129_v46, %v2124_v7  ;;  %v1699_v5 = vld [vmem:[#allocation2 + $0xaf] sm:$0xff] }
 0x206   :  { %7869 = vst [vmem:[#allocation28_spill] sm:$0xff] %v6298_v9  ;;  %v7876_v7 = vld [vmem:[#allocation32_spill] sm:$0xff]  ;;  %v7877_v9 = vld [vmem:[#allocation41_spill] sm:$0xff] }
 0x209   :  { %2698 = vperm.xlu1 %4758, %v5697_v43   ;;  %2702 = vperm.xlu2 %4756, %v5703_v53   ;;  %v6327_v56 = vpop.f32.mrf.mxu1 }
 0x20a   :  { %v6313_v38 = vpop.permute.xlu1 %2225  ;;  %4485 = vmatmul.msk.f32.gmra.mxu2 %vm299_vm2, %v608_v44  ;;  %v6317_v55 = vpop.permute.xlu2 %2265  ;;  %7873 = vst [vmem:[#allocation31_spill] sm:$0xff] %v6327_v56  ;;  %v7874_v44 = vld [vmem:[#allocation5_spill] sm:$0xff]  ;;  %v2285_v56 = vmul.f32 %v6132_v61, %v2125_v34  ;;  %v7879_v34 = vld [vmem:[#allocation15_spill] sm:$0xff] }
 0x20b   :  { %3071 = vperm.xlu0 %4760, %v5773_v0   ;;  %v6320_v43 = vpop.permute.xlu0 %2269  ;;  %v609_v46 = vmul.f32 %v6224_v24, %v7874_v44  ;;  %v7875_v0 = vmov 15   ;;  %v1700_v61 = vld [vmem:[#allocation2 + $0xb7] sm:$0xff] }
 0x20c   :  { %4531 = vmatmul.msk.f32.gmra.mxu3 %vm299_vm2, %v1432_v1  ;;  %4552 = vmatmul.msk.f32.gmra.mxu0 %vm299_vm2, %v1858_v25  ;;  %v1433_v1 = vmul.f32 %v7876_v7, %v1273_v41  ;;  %v1859_v25 = vmul.f32 %v7877_v9, %v1699_v5  ;;  %v610_v7 = vmul.f32 %v6253_v33, %v7879_v34 }
 0x20d   :  { %4573 = vmatmul.msk.f32.gmra.mxu1 %vm299_vm2, %v2284_v48  ;;  %v6325_v53 = vpop.f32.mrf.mxu2 }
 0x211   :  { %2710 = vperm.xlu1 %4758, %v5725_v59   ;;  %4759 = vset.pattern.permute.xlu2 %v7875_v0  ;;  %v6343_v59 = vpop.f32.mrf.mxu3  ;;  %v6351_v5 = vpop.f32.mrf.mxu1 }
 0x212   :  { %v6335_v48 = vpop.permute.xlu1 %2237  ;;  %3023 = vperm.xlu2 %4759, %v5734_v21   ;;  %4486 = vmatmul.msk.f32.gmra.mxu2 %vm299_vm2, %v609_v46  ;;  %v1994_v46 = vpop.f32.mrf.mxu0  ;;  %7878 = vst [vmem:[#allocation39_spill] sm:$0xff] %v6351_v5 }
 0x213   :  { %3083 = vperm.xlu0 %4760, %v5804_v26   ;;  %v6341_v24 = vpop.permute.xlu2 %2586 }
 0x214   :  { %v6345_v44 = vpop.permute.xlu0 %2590  ;;  %4532 = vmatmul.msk.f32.gmra.mxu3 %vm299_vm2, %v1433_v1  ;;  %4553 = vmatmul.msk.f32.gmra.mxu0 %vm299_vm2, %v1859_v25  ;;  %v1860_v1 = vmul.f32 %v7880_v23, %v1700_v61  ;;  %v387_v23 = vld [vmem:[#allocation2 + $0x9f] sm:$0xff] }
 0x215   :  { %4574 = vmatmul.msk.f32.gmra.mxu1 %vm299_vm2, %v2285_v56  ;;  %v1149_v9 = vpop.f32.mrf.mxu2  ;;  %v4830_v56 = vld [vmem:[#allocation2 + $0x60] sm:$0xff] }
 0x216   :  { %v1150_v41 = vadd.f32 %v1149_v9, %v6040_v12  ;;  %v2286_v9 = vmul.f32 %v4830_v56, %v6232_v14  ;;  %v6378_v61 = vld [vmem:[#allocation2 + $0xbf] sm:$0xff]  ;;  %v2127_v56 = vld [vmem:[#allocation2 + $0x68] sm:$0xff] }
 0x218   :  { %v1648_v26 = vadd.f32 %v6138_v31, %v1150_v41 }
 0x219   :  { %4761 = vset.pattern.permute.xlu1 %v7875_v0  ;;  %v6374_v41 = vpop.f32.mrf.mxu3 }
 0x21a   :  { %3031 = vperm.xlu1 %4761, %v5759_v3   ;;  %v6359_v25 = vpop.permute.xlu1 %2249  ;;  %3035 = vperm.xlu2 %4759, %v5767_v27   ;;  %v6362_v12 = vadd.f32 %v1991_v16, %v1648_v26  ;;  %7882 = vst [vmem:[#allocation26_spill] sm:$0xff] %v6374_v41  ;;  %v7883_v26 = vld [vmem:[#allocation14_spill] sm:$0xff]  ;;  %v1997_v34 = vpop.f32.mrf.mxu0  ;;  %v6577_v41 = vld [vmem:[%s7758_s0 + $0xb0] sm:$0xff] }
 0x21b   :  { %3095 = vperm.xlu0 %4760, %v5837_v17   ;;  %v6366_v31 = vpop.permute.xlu2 %2598  ;;  %4487 = vmatmul.msk.f32.gmra.mxu2 %vm299_vm2, %v610_v7  ;;  %v611_v17 = vmul.f32 %v7883_v26, %v387_v23  ;;  %v6380_v7 = vpop.f32.mrf.mxu1  ;;  %v7887_v26 = vld [vmem:[#allocation43_spill] sm:$0xff] }
 0x21c   :  { %7881 = vst [vmem:[#allocation12_spill] sm:$0xff] %v6362_v12  ;;  %v6369_v33 = vpop.permute.xlu0 %2610  ;;  %4554 = vmatmul.msk.f32.gmra.mxu0 %vm299_vm2, %v1860_v1  ;;  %v1861_v1 = vmul.f32 %v6052_v37, %v6378_v61  ;;  %v4845_v12 = vld [vmem:[%s7758_s0 + $0x8] sm:$0xff] }
 0x21d   :  { %4575 = vmatmul.msk.f32.gmra.mxu1 %vm299_vm2, %v2286_v9  ;;  %v1152_v3 = vpop.f32.mrf.mxu2  ;;  %7884 = vst [vmem:[#allocation11_spill] sm:$0xff] %v6380_v7  ;;  %v7901_v7 = vld [vmem:[#allocation27_spill] sm:$0xff] }
 0x21e   :  { %v1153_v16 = vadd.f32 %v1152_v3, %v6067_v11 }
 0x220   :  { %v1649_v14 = vadd.f32 %v6166_v2, %v1153_v16  ;;  %v2287_v2 = vmul.f32 %v6150_v20, %v2127_v56  ;;  %v2746_v20 = vld [vmem:[%s7760_s2 + $0xa8] sm:$0xff]  ;;  %v7886_v16 = vld [vmem:[#allocation6_spill] sm:$0xff] }
 0x221   :  { %2859 = vmatpush.msra.mxu2 %v2746_v20 }
 0x222   :  { %3039 = vperm.xlu1 %4761, %v5790_v40   ;;  %v6385_v9 = vpop.permute.xlu1 %2261  ;;  %3043 = vperm.xlu2 %4759, %v5798_v8   ;;  %v6388_v11 = vadd.f32 %v1994_v46, %v1649_v14  ;;  %v6407_v46 = vld [vmem:[#allocation2 + $0xc7] sm:$0xff]  ;;  %v612_v14 = vmul.f32 %v6304_v39, %v7886_v16  ;;  %v6438_v16 = vld [vmem:[#allocation2 + $0xcf] sm:$0xff] }
 0x223   :  { %3107 = vperm.xlu0 %4760, %v5863_v22   ;;  %v6392_v3 = vpop.permute.xlu2 %2606  ;;  %4488 = vmatmul.msk.f32.gmra.mxu2 %vm299_vm2, %v611_v17  ;;  %v3183_v22 = vld [vmem:[%s7760_s2 + $0xc8] sm:$0xff]  ;;  %v2128_v17 = vld [vmem:[#allocation2 + $0x70] sm:$0xff] }
 0x224   :  { %7885 = vst [vmem:[#allocation30_spill] sm:$0xff] %v6388_v11  ;;  %v6395_v23 = vpop.permute.xlu0 %2622  ;;  %4555 = vmatmul.msk.f32.gmra.mxu0 %vm299_vm2, %v1861_v1  ;;  %3296 = vmatpush.msra.mxu3 %v3183_v22 }
 0x225   :  { %4576 = vmatmul.msk.f32.gmra.mxu1 %vm299_vm2, %v2287_v2  ;;  %v1155_v40 = vpop.f32.mrf.mxu2  ;;  %v2288_v2 = vmul.f32 %v6153_v15, %v2128_v17 }
 0x226   :  { %v1156_v37 = vadd.f32 %v1155_v40, %v6090_v52  ;;  %v1862_v52 = vmul.f32 %v7887_v26, %v6407_v46  ;;  %v2000_v40 = vpop.f32.mrf.mxu0 }
 0x228   :  { %v1650_v8 = vadd.f32 %v6210_v19, %v1156_v37  ;;  %v6413_v19 = vpop.f32.mrf.mxu3  ;;  %v6426_v37 = vpop.f32.mrf.mxu1 }
 0x229   :  { %7888 = vst [vmem:[#allocation5_spill] sm:$0xff] %v6413_v19 }
 0x22a   :  { %3051 = vperm.xlu1 %4761, %v5823_v49   ;;  %v6416_v1 = vpop.permute.xlu1 %2273  ;;  %3055 = vperm.xlu2 %4759, %v5831_v50   ;;  %v6419_v56 = vadd.f32 %v1997_v34, %v1650_v8  ;;  %7890 = vst [vmem:[#allocation41_spill] sm:$0xff] %v6426_v37  ;;  %v389_v50 = vld [vmem:[#allocation2 + $0xaf] sm:$0xff] }
 0x22b   :  { %3119 = vperm.xlu0 %4760, %v5895_v42   ;;  %v6423_v39 = vpop.permute.xlu2 %2618  ;;  %4489 = vmatmul.msk.f32.gmra.mxu2 %vm299_vm2, %v612_v14  ;;  %v3620_v42 = vld [vmem:[%s7760_s2 + $0xe8] sm:$0xff]  ;;  %v7891_v8 = vld [vmem:[#allocation17_spill] sm:$0xff]  ;;  %v1863_v14 = vmul.f32 %v6008_v45, %v6438_v16 }
 0x22c   :  { %7889 = vst [vmem:[#allocation32_spill] sm:$0xff] %v6419_v56  ;;  %v6428_v20 = vpop.permute.xlu0 %2634  ;;  %4556 = vmatmul.msk.f32.gmra.mxu0 %vm299_vm2, %v1862_v52  ;;  %v613_v22 = vmul.f32 %v7891_v8, %v389_v50  ;;  %v7777_v52 = vmov 17   ;;  %v4057_v45 = vld [vmem:[%s7760_s2 + $0x108] sm:$0xff] }
 0x22d   :  { %4577 = vmatmul.msk.f32.gmra.mxu1 %vm299_vm2, %v2288_v2  ;;  %v1158_v49 = vpop.f32.mrf.mxu2  ;;  %3733 = vmatpush.msra.mxu0 %v3620_v42  ;;  %v7896_v8 = vld [vmem:[#allocation16_spill] sm:$0xff] }
 0x22e   :  { %v1159_v34 = vadd.f32 %v1158_v49, %v6124_v35  ;;  %v4831_v35 = vld [vmem:[#allocation2 + $0x78] sm:$0xff]  ;;  %4170 = vmatpush.msra.mxu1 %v4057_v45 }
 0x230   :  { %v1651_v15 = vadd.f32 %v6249_v51, %v1159_v34  ;;  %v2289_v51 = vmul.f32 %v4831_v35, %v6262_v47  ;;  %v6461_v49 = vpop.f32.mrf.mxu1  ;;  %v7895_v34 = vld [vmem:[#allocation33_spill] sm:$0xff] }
 0x231   :  { %7894 = vst [vmem:[#allocation14_spill] sm:$0xff] %v6461_v49  ;;  %v6468_v35 = vld [vmem:[#allocation2 + $0xd7] sm:$0xff]  ;;  %v4832_v49 = vld [vmem:[#allocation2 + $0x80] sm:$0xff] }
 0x232   :  { %3063 = vperm.xlu1 %4761, %v7840_v57   ;;  %3067 = vperm.xlu2 %4759, %v7841_v36   ;;  %v6444_v26 = vadd.f32 %v2000_v40, %v1651_v15  ;;  %v6456_v57 = vpop.f32.mrf.mxu3  ;;  %v2003_v36 = vpop.f32.mrf.mxu0  ;;  %v390_v40 = vld [vmem:[#allocation2 + $0xb7] sm:$0xff]  ;;  %v2290_v5 = vmul.f32 %v4832_v49, %v7901_v7 }
 0x233   :  { %4763 = vset.pattern.permute.xlu0 %v7777_v52  ;;  %v6448_v17 = vpop.permute.xlu1 %2594  ;;  %v6450_v2 = vpop.permute.xlu2 %2630  ;;  %4490 = vmatmul.msk.f32.gmra.mxu2 %vm299_vm2, %v613_v22  ;;  %7893 = vst [vmem:[#allocation44_spill] sm:$0xff] %v6456_v57  ;;  %v614_v22 = vmul.f32 %v7896_v8, %v390_v40  ;;  %v7898_v52 = vld [vmem:[#allocation35_spill] sm:$0xff] }
 0x234   :  { %7892 = vst [vmem:[#allocation15_spill] sm:$0xff] %v6444_v26  ;;  %3897 = vperm.xlu0 %4763, %v5734_v21   ;;  %4557 = vmatmul.msk.f32.gmra.mxu0 %vm299_vm2, %v1863_v14  ;;  %v6463_v50 = vpop.permute.xlu0 %2646  ;;  %v7897_v21 = vld [vmem:[#allocation54_spill] sm:$0xff] }
 0x235   :  { %4578 = vmatmul.msk.f32.gmra.mxu1 %vm299_vm2, %v2289_v51  ;;  %v1161_v47 = vpop.f32.mrf.mxu2  ;;  %v1864_v14 = vmul.f32 %v7897_v21, %v6468_v35  ;;  %v7899_v51 = vld [vmem:[#allocation36_spill] sm:$0xff]  ;;  %v1705_v8 = vld [vmem:[#allocation2 + $0xdf] sm:$0xff] }
 0x236   :  { %v1162_v15 = vadd.f32 %v1161_v47, %v7895_v34 }
 0x238   :  { %v1652_v42 = vadd.f32 %v6276_v30, %v1162_v15  ;;  %v7779_v30 = vmov 16   ;;  %v6489_v49 = vpop.f32.mrf.mxu1 }
 0x239   :  { %7904 = vst [vmem:[#allocation17_spill] sm:$0xff] %v6489_v49 }
 0x23a   :  { %3075 = vperm.xlu1 %4761, %v7898_v52   ;;  %3079 = vperm.xlu2 %4759, %v7899_v51   ;;  %v6474_v37 = vadd.f32 %v2003_v36, %v1652_v42  ;;  %v7902_v36 = vld [vmem:[#allocation61_spill] sm:$0xff]  ;;  %v6487_v34 = vpop.f32.mrf.mxu3  ;;  %v2006_v7 = vpop.f32.mrf.mxu0 }
 0x23b   :  { %v6477_v47 = vpop.permute.xlu1 %2602  ;;  %v6479_v45 = vpop.permute.xlu2 %2642  ;;  %4491 = vmatmul.msk.f32.gmra.mxu2 %vm299_vm2, %v614_v22  ;;  %7903 = vst [vmem:[#allocation43_spill] sm:$0xff] %v6487_v34  ;;  %v7905_v22 = vld [vmem:[#allocation7_spill] sm:$0xff]  ;;  %v2132_v34 = vld [vmem:[#allocation2 + $0x90] sm:$0xff] }
 0x23c   :  { %7900 = vst [vmem:[#allocation6_spill] sm:$0xff] %v6474_v37  ;;  %4766 = vset.pattern.permute.xlu0 %v7779_v30  ;;  %4558 = vmatmul.msk.f32.gmra.mxu0 %vm299_vm2, %v1864_v14  ;;  %v6491_v15 = vpop.permute.xlu0 %2658  ;;  %v615_v21 = vmul.f32 %v6378_v61, %v7905_v22  ;;  %v7906_v14 = vld [vmem:[#allocation46_spill] sm:$0xff] }
 0x23d   :  { %3472 = vperm.xlu0 %4766, %v5767_v27   ;;  %4579 = vmatmul.msk.f32.gmra.mxu1 %vm299_vm2, %v2290_v5  ;;  %v1164_v52 = vpop.f32.mrf.mxu2  ;;  %v1865_v27 = vmul.f32 %v7906_v14, %v1705_v8  ;;  %v6501_v5 = vld [vmem:[%s7758_s0 + $0x88] sm:$0xff]  ;;  %v7913_v30 = vld [vmem:[#allocation50_spill] sm:$0xff] }
 0x23e   :  { %v1165_v40 = vadd.f32 %v1164_v52, %v7902_v36  ;;  %v4834_v52 = vld [vmem:[#allocation2 + $0x88] sm:$0xff]  ;;  %v7908_v36 = vld [vmem:[#allocation3_spill] sm:$0xff] }
 0x23f   :  { %v1706_v14 = vld [vmem:[#allocation2 + $0xe7] sm:$0xff] }
 0x240   :  { %v1653_v42 = vadd.f32 %v6311_v4, %v1165_v40  ;;  %v2291_v4 = vmul.f32 %v4834_v52, %v7908_v36  ;;  %v6522_v22 = vpop.f32.mrf.mxu1  ;;  %v7912_v36 = vld [vmem:[#allocation19_spill] sm:$0xff]  ;;  %v1866_v49 = vmul.f32 %v7913_v30, %v1706_v14  ;;  %v2292_v30 = vmul.f32 %v6284_v18, %v2132_v34  ;;  %v6566_v34 = vld [vmem:[#allocation2 + $0xef] sm:$0xff] }
 0x241   :  { %7910 = vst [vmem:[#allocation16_spill] sm:$0xff] %v6522_v22  ;;  %v6563_v18 = vld [vmem:[%s7758_s0 + $0x40] sm:$0xff]  ;;  %v4847_v22 = vld [vmem:[%s7758_s0 + $0x10] sm:$0xff] }
 0x242   :  { %3087 = vperm.xlu1 %4761, %v7854_v60   ;;  %3091 = vperm.xlu2 %4759, %v6501_v5   ;;  %v6504_v51 = vadd.f32 %v2006_v7, %v1653_v42  ;;  %v7909_v60 = vmov 17   ;;  %v6518_v7 = vld [vmem:[%s7758_s0 + $0x28] sm:$0xff]  ;;  %v2009_v52 = vpop.f32.mrf.mxu0 }
 0x243   :  { %v6507_v40 = vpop.permute.xlu1 %2614  ;;  %4492 = vmatmul.msk.f32.gmra.mxu2 %vm299_vm2, %v615_v21  ;;  %v6510_v61 = vpop.permute.xlu2 %2654 }
 0x244   :  { %7907 = vst [vmem:[#allocation33_spill] sm:$0xff] %v6504_v51  ;;  %4559 = vmatmul.msk.f32.gmra.mxu0 %vm299_vm2, %v1865_v27  ;;  %v6525_v27 = vpop.f32.mrf.mxu3  ;;  %v6530_v57 = vpop.permute.xlu0 %2670 }
 0x245   :  { %4769 = vset.pattern.permute.xlu0 %v7909_v60  ;;  %4580 = vmatmul.msk.f32.gmra.mxu1 %vm299_vm2, %v2291_v4  ;;  %v1167_v8 = vpop.f32.mrf.mxu2  ;;  %7911 = vst [vmem:[#allocation54_spill] sm:$0xff] %v6525_v27  ;;  %v616_v4 = vmul.f32 %v6407_v46, %v7912_v36  ;;  %v7916_v36 = vmov 16   ;;  %v2133_v27 = vld [vmem:[#allocation2 + $0x98] sm:$0xff] }
 0x246   :  { %3917 = vperm.xlu0 %4769, %v6518_v7   ;;  %v1168_v42 = vadd.f32 %v1167_v8, %v6217_v13  ;;  %v6535_v13 = vld [vmem:[%s7758_s0 + $0x98] sm:$0xff] }
 0x248   :  { %v1654_v21 = vadd.f32 %v6343_v59, %v1168_v42  ;;  %v6541_v59 = vld [vmem:[%s7758_s0 + $0xa0] sm:$0xff]  ;;  %v6572_v19 = vpop.f32.mrf.mxu1 }
 0x249   :  { %7919 = vst [vmem:[#allocation27_spill] sm:$0xff] %v6572_v19 }
 0x24a   :  { %3099 = vperm.xlu1 %4761, %v6535_v13   ;;  %3103 = vperm.xlu2 %4759, %v6541_v59   ;;  %v6544_v46 = vadd.f32 %v2009_v52, %v1654_v21  ;;  %v3182_v21 = vld [vmem:[%s7760_s2 + $0xc0] sm:$0xff]  ;;  %v6600_v37 = vpop.f32.mrf.mxu0 }
 0x24b   :  { %v6547_v8 = vpop.permute.xlu1 %2626  ;;  %4493 = vmatmul.msk.f32.gmra.mxu2 %vm299_vm2, %v616_v4  ;;  %v6550_v42 = vpop.permute.xlu2 %2666  ;;  %3297 = vmatpush.msra.mxu3 %v3182_v21  ;;  %v7918_v4 = vld [vmem:[#allocation56_spill] sm:$0xff]  ;;  %v6583_v21 = vld [vmem:[%s7758_s0 + $0xb8] sm:$0xff]  ;;  %7924 = vst [vmem:[#allocation19_spill] sm:$0xff] %v6600_v37 }
 0x24c   :  { %7914 = vst [vmem:[#allocation35_spill] sm:$0xff] %v6544_v46  ;;  %4560 = vmatmul.msk.f32.gmra.mxu0 %vm299_vm2, %v1866_v49  ;;  %v7917_v49 = vld [vmem:[#allocation18_spill] sm:$0xff]  ;;  %v6592_v46 = vpop.permute.xlu0 %2682  ;;  %v6615_v37 = vld [vmem:[%s7758_s0 + $0xc8] sm:$0xff] }
 0x24d   :  { %4581 = vmatmul.msk.f32.gmra.mxu1 %vm299_vm2, %v2292_v30  ;;  %v6554_v14 = vpop.f32.mrf.mxu2  ;;  %v617_v52 = vmul.f32 %v6438_v16, %v7917_v49  ;;  %v1867_v30 = vmul.f32 %v7918_v4, %v6566_v34  ;;  %v2293_v16 = vmul.f32 %v6205_v32, %v2133_v27  ;;  %v6587_v49 = vpop.f32.mrf.mxu3  ;;  %7921 = vst [vmem:[#allocation7_spill] sm:$0xff] %v6592_v46  ;;  %v6606_v32 = vld [vmem:[%s7758_s0 + $0x50] sm:$0xff] }
 0x24e   :  { %7915 = vst [vmem:[#allocation36_spill] sm:$0xff] %v6554_v14  ;;  %4772 = vset.pattern.permute.xlu0 %v7916_v36  ;;  %v1708_v27 = vld [vmem:[#allocation2 + $0xf7] sm:$0xff] }
 0x24f   :  { %3492 = vperm.xlu0 %4772, %v6563_v18   ;;  %7920 = vst [vmem:[#allocation61_spill] sm:$0xff] %v6587_v49 }
 0x252   :  { %3111 = vperm.xlu1 %4761, %v6577_v41   ;;  %3115 = vperm.xlu2 %4759, %v6583_v21  }
 0x253   :  { %v6589_v4 = vpop.permute.xlu1 %2638  ;;  %4494 = vmatmul.msk.f32.gmra.mxu2 %vm299_vm2, %v617_v52  ;;  %v6594_v14 = vpop.permute.xlu2 %2678  ;;  %v7925_v52 = vld [vmem:[#allocation10_spill] sm:$0xff] }
 0x254   :  { %7922 = vst [vmem:[#allocation46_spill] sm:$0xff] %v6594_v14  ;;  %4561 = vmatmul.msk.f32.gmra.mxu0 %vm299_vm2, %v1867_v30  ;;  %v618_v49 = vmul.f32 %v6468_v35, %v7925_v52  ;;  %v7926_v30 = vld [vmem:[#allocation49_spill] sm:$0xff]  ;;  %v4843_v35 = vld [vmem:[%s7758_s0] sm:$0xff] }
 0x255   :  { %4582 = vmatmul.msk.f32.gmra.mxu1 %vm299_vm2, %v2293_v16  ;;  %v6598_v51 = vpop.f32.mrf.mxu2  ;;  %v1868_v26 = vmul.f32 %v7926_v30, %v1708_v27  ;;  %v2134_v16 = vld [vmem:[#allocation2 + $0xa0] sm:$0xff]  ;;  %v6631_v52 = vpop.f32.mrf.mxu3 }
 0x256   :  { %7923 = vst [vmem:[#allocation3_spill] sm:$0xff] %v6598_v51  ;;  %v2294_v56 = vmul.f32 %v6208_v10, %v2134_v16  ;;  %v6636_v10 = vpop.permute.xlu0 %2694  ;;  %v395_v16 = vld [vmem:[#allocation2 + $0xdf] sm:$0xff] }
 0x257   :  { %4775 = vset.pattern.permute.xlu0 %v7909_v60  ;;  %7929 = vst [vmem:[#allocation56_spill] sm:$0xff] %v6631_v52  ;;  %v7934_v52 = vld [vmem:[#allocation21_spill] sm:$0xff] }
 0x258   :  { %3937 = vperm.xlu0 %4775, %v6606_v32   ;;  %7931 = vst [vmem:[#allocation49_spill] sm:$0xff] %v6636_v10  ;;  %v7935_v10 = vld [vmem:[#allocation52_spill] sm:$0xff] }
 0x25a   :  { %3123 = vperm.xlu1 %4761, %v6615_v37   ;;  %4762 = vset.pattern.permute.xlu2 %v7916_v36  ;;  %v6619_v51 = vpop.f32.mrf.mxu1 }
 0x25b   :  { %7927 = vst [vmem:[#allocation50_spill] sm:$0xff] %v6619_v51  ;;  %v6622_v11 = vpop.permute.xlu1 %2650  ;;  %3460 = vperm.xlu2 %4762, %v4843_v35   ;;  %4495 = vmatmul.msk.f32.gmra.mxu2 %vm299_vm2, %v618_v49  ;;  %v6628_v27 = vpop.permute.xlu2 %2690  ;;  %v6644_v49 = vld [vmem:[%s7758_s0 + $0x68] sm:$0xff] }
 0x25c   :  { %7928 = vst [vmem:[#allocation18_spill] sm:$0xff] %v6628_v27  ;;  %4562 = vmatmul.msk.f32.gmra.mxu0 %vm299_vm2, %v1868_v26  ;;  %v6639_v51 = vpop.f32.mrf.mxu0  ;;  %v1709_v26 = vld [vmem:[#allocation2 + $0xff] sm:$0xff]  ;;  %v2135_v35 = vld [vmem:[#allocation2 + $0xa8] sm:$0xff] }
 0x25d   :  { %4583 = vmatmul.msk.f32.gmra.mxu1 %vm299_vm2, %v2294_v56  ;;  %v6634_v30 = vpop.f32.mrf.mxu2  ;;  %7932 = vst [vmem:[#allocation62_spill] sm:$0xff] %v6639_v51  ;;  %v1869_v27 = vmul.f32 %v7935_v10, %v1709_v26  ;;  %v2295_v19 = vmul.f32 %v6313_v38, %v2135_v35  ;;  %v6666_v38 = vpop.f32.mrf.mxu3  ;;  %v396_v10 = vld [vmem:[#allocation2 + $0xe7] sm:$0xff] }
 0x25e   :  { %7930 = vst [vmem:[#allocation10_spill] sm:$0xff] %v6634_v30  ;;  %v619_v30 = vmul.f32 %v7934_v52, %v395_v16  ;;  %v6668_v16 = vpop.permute.xlu0 %2706  ;;  %v2745_v26 = vld [vmem:[%s7760_s2 + $0xa0] sm:$0xff]  ;;  %v7941_v35 = vld [vmem:[#allocation20_spill] sm:$0xff] }
 0x25f   :  { %7938 = vst [vmem:[#allocation64_spill] sm:$0xff] %v6666_v38  ;;  %2860 = vmatpush.msra.mxu2 %v2745_v26  ;;  %v620_v38 = vmul.f32 %v7941_v35, %v396_v10  ;;  %v2991_v35 = vld [vmem:[#allocation2 + $0x1f] sm:$0xff] }
 0x260   :  { %4778 = vset.pattern.permute.xlu0 %v7916_v36  ;;  %7939 = vst [vmem:[#allocation65_spill] sm:$0xff] %v6668_v16 }
 0x261   :  { %3512 = vperm.xlu0 %4778, %v6644_v49  }
 0x262   :  { %4764 = vset.pattern.permute.xlu1 %v7916_v36  ;;  %v6648_v56 = vpop.f32.mrf.mxu1 }
 0x263   :  { %7933 = vst [vmem:[#allocation63_spill] sm:$0xff] %v6648_v56  ;;  %v6653_v51 = vpop.permute.xlu1 %2662  ;;  %3464 = vperm.xlu1 %4764, %v4845_v12   ;;  %4765 = vset.pattern.permute.xlu2 %v7909_v60  ;;  %v6659_v46 = vpop.permute.xlu2 %2702 }
 0x264   :  { %7936 = vst [vmem:[#allocation21_spill] sm:$0xff] %v6659_v46  ;;  %4496 = vmatmul.msk.f32.gmra.mxu2 %vm299_vm2, %v619_v30  ;;  %3901 = vperm.xlu2 %4765, %v4845_v12   ;;  %v1710_v30 = vld [vmem:[#allocation2 + $0x107] sm:$0xff]  ;;  %v2136_v12 = vld [vmem:[#allocation2 + $0xb0] sm:$0xff]  ;;  %v6685_v56 = vpop.f32.mrf.mxu0 }
 0x265   :  { %4563 = vmatmul.msk.f32.gmra.mxu0 %vm299_vm2, %v1869_v27  ;;  %4584 = vmatmul.msk.f32.gmra.mxu1 %vm299_vm2, %v2295_v19  ;;  %v6664_v52 = vpop.f32.mrf.mxu2  ;;  %v6677_v19 = vld [vmem:[%s7758_s0 + $0x78] sm:$0xff]  ;;  %v2296_v46 = vmul.f32 %v6236_v58, %v2136_v12  ;;  %7943 = vst [vmem:[#allocation20_spill] sm:$0xff] %v6685_v56  ;;  %v6701_v10 = vpop.f32.mrf.mxu3 }
 0x266   :  { %7937 = vst [vmem:[#allocation52_spill] sm:$0xff] %v6664_v52  ;;  %v7942_v52 = vld [vmem:[#allocation59_spill] sm:$0xff] }
 0x267   :  { %v1870_v16 = vmul.f32 %v7942_v52, %v1710_v30  ;;  %v3619_v52 = vld [vmem:[%s7760_s2 + $0xe0] sm:$0xff]  ;;  %7946 = vst [vmem:[#allocation68_spill] sm:$0xff] %v6701_v10 }
 0x268   :  { %3734 = vmatpush.msra.mxu0 %v3619_v52  ;;  %v2138_v10 = vld [vmem:[#allocation2 + $0xc0] sm:$0xff] }
 0x269   :  { %4781 = vset.pattern.permute.xlu0 %v7909_v60 }
 0x26a   :  { %3957 = vperm.xlu0 %4781, %v6677_v19   ;;  %v6680_v27 = vpop.f32.mrf.mxu1 }
 0x26b   :  { %7940 = vst [vmem:[#allocation66_spill] sm:$0xff] %v6680_v27  ;;  %v6687_v26 = vpop.permute.xlu1 %2674  ;;  %3468 = vperm.xlu1 %4764, %v4847_v22   ;;  %v2990_v27 = vld [vmem:[#allocation2 + $0x17] sm:$0xff] }
 0x26c   :  { %7944 = vst [vmem:[#allocation59_spill] sm:$0xff] %v6687_v26  ;;  %4497 = vmatmul.msk.f32.gmra.mxu2 %vm299_vm2, %v620_v38  ;;  %3905 = vperm.xlu2 %4765, %v4847_v22   ;;  %v3024_v14 = vpop.permute.xlu2 %3023  ;;  %v2137_v38 = vld [vmem:[#allocation2 + $0xb8] sm:$0xff]  ;;  %v3028_v22 = vpop.permute.xlu0 %3027 }
 0x26d   :  { %v3150_v29 = vmul.f32 %v3024_v14, %v2990_v27  ;;  %4564 = vmatmul.msk.f32.gmra.mxu0 %vm299_vm2, %v1870_v16  ;;  %4585 = vmatmul.msk.f32.gmra.mxu1 %vm299_vm2, %v2296_v46  ;;  %v6695_v58 = vpop.f32.mrf.mxu2  ;;  %v7948_v16 = vld [vmem:[#allocation13_spill] sm:$0xff]  ;;  %v2297_v30 = vmul.f32 %v6239_v62, %v2137_v38  ;;  %v4056_v27 = vld [vmem:[%s7760_s2 + $0x100] sm:$0xff]  ;;  %v4849_v62 = vld [vmem:[%s7758_s0 + $0x18] sm:$0xff]  ;;  %v6727_v52 = vpop.f32.mrf.mxu0  ;;  %v3151_v38 = vmul.f32 %v3028_v22, %v2991_v35 }
 0x26e   :  { %7945 = vst [vmem:[#allocation67_spill] sm:$0xff] %v6695_v58  ;;  %v621_v46 = vmul.f32 %v6566_v34, %v7948_v16  ;;  %4171 = vmatpush.msra.mxu1 %v4056_v27  ;;  %v2298_v35 = vmul.f32 %v6335_v48, %v2138_v10  ;;  %v6741_v56 = vpop.f32.mrf.mxu3  ;;  %v399_v10 = vld [vmem:[#allocation2 + $0xff] sm:$0xff] }
 0x26f   :  { %4629 = vmatmul.msk.f32.vlgmr.msra.gmra.mxu3 %vm299_vm2, %v3150_v29  ;;  %v6712_v29 = vld [vmem:[%s7758_s0 + $0x90] sm:$0xff]  ;;  %7950 = vst [vmem:[#allocation70_spill] sm:$0xff] %v6727_v52  ;;  %v7953_v52 = vld [vmem:[#allocation23_spill] sm:$0xff] }
 0x270   :  { %7954 = vst [vmem:[#allocation23_spill] sm:$0xff] %v6741_v56 }
 0x272   :  { %4784 = vset.pattern.permute.xlu0 %v7916_v36  ;;  %v6704_v14 = vpop.f32.mrf.mxu1 }
 0x273   :  { %7947 = vst [vmem:[#allocation69_spill] sm:$0xff] %v6704_v14  ;;  %3532 = vperm.xlu0 %4784, %v6712_v29   ;;  %v6715_v12 = vpop.permute.xlu1 %2686  ;;  %4767 = vset.pattern.permute.xlu1 %v7909_v60 }
 0x274   :  { %7949 = vst [vmem:[#allocation13_spill] sm:$0xff] %v6715_v12  ;;  %4498 = vmatmul.msk.f32.gmra.mxu2 %vm299_vm2, %v621_v46  ;;  %3909 = vperm.xlu1 %4767, %v4849_v62   ;;  %v6725_v34 = vpop.permute.xlu2 %3035  ;;  %v4850_v46 = vld [vmem:[%s7758_s0 + $0x20] sm:$0xff]  ;;  %v398_v62 = vld [vmem:[#allocation2 + $0xf7] sm:$0xff]  ;;  %v2143_v12 = vld [vmem:[#allocation2 + $0xe8] sm:$0xff] }
 0x275   :  { %4768 = vset.pattern.permute.xlu2 %v7916_v36  ;;  %4586 = vmatmul.msk.f32.gmra.mxu1 %vm299_vm2, %v2297_v30  ;;  %v6731_v16 = vpop.f32.mrf.mxu2  ;;  %v622_v22 = vmul.f32 %v7953_v52, %v398_v62  ;;  %v6754_v48 = vpop.f32.mrf.mxu0  ;;  %v7959_v62 = vld [vmem:[#allocation22_spill] sm:$0xff] }
 0x276   :  { %7951 = vst [vmem:[#allocation71_spill] sm:$0xff] %v6731_v16  ;;  %3476 = vperm.xlu2 %4768, %v4850_v46   ;;  %v623_v56 = vmul.f32 %v7959_v62, %v399_v10  ;;  %v6759_v16 = vpop.permute.xlu0 %3047  ;;  %v4851_v62 = vld [vmem:[%s7758_s0 + $0x30] sm:$0xff] }
 0x277   :  { %4630 = vmatmul.msk.f32.gmra.mxu3 %vm299_vm2, %v3151_v38  ;;  %7957 = vst [vmem:[#allocation75_spill] sm:$0xff] %v6754_v48  ;;  %v2992_v48 = vld [vmem:[#allocation2 + $0x27] sm:$0xff] }
 0x27a   :  { %v6737_v58 = vpop.f32.mrf.mxu1 }
 0x27b   :  { %7952 = vst [vmem:[#allocation72_spill] sm:$0xff] %v6737_v58  ;;  %4787 = vset.pattern.permute.xlu0 %v7909_v60  ;;  %v6744_v30 = vpop.permute.xlu1 %2698 }
 0x27c   :  { %7955 = vst [vmem:[#allocation73_spill] sm:$0xff] %v6744_v30  ;;  %3977 = vperm.xlu0 %4787, %v6541_v59   ;;  %4499 = vmatmul.msk.f32.gmra.mxu2 %vm299_vm2, %v622_v22  ;;  %v6748_v27 = vpop.permute.xlu2 %3043  ;;  %v2139_v22 = vld [vmem:[#allocation2 + $0xc8] sm:$0xff] }
 0x27d   :  { %3913 = vperm.xlu1 %4767, %v4850_v46   ;;  %4587 = vmatmul.msk.f32.gmra.mxu1 %vm299_vm2, %v2298_v35  ;;  %v6751_v38 = vpop.f32.mrf.mxu2  ;;  %v6768_v35 = vpop.f32.mrf.mxu3 }
 0x27e   :  { %7956 = vst [vmem:[#allocation74_spill] sm:$0xff] %v6751_v38  ;;  %3480 = vperm.xlu2 %4768, %v6518_v7   ;;  %v2299_v7 = vmul.f32 %v6266_v54, %v2139_v22  ;;  %v6779_v54 = vpop.f32.mrf.mxu0  ;;  %v2140_v38 = vld [vmem:[#allocation2 + $0xd0] sm:$0xff]  ;;  %v6788_v14 = vpop.permute.xlu0 %3059 }
 0x27f   :  { %7961 = vst [vmem:[#allocation77_spill] sm:$0xff] %v6768_v35 }
 0x280   :  { %7963 = vst [vmem:[#allocation79_spill] sm:$0xff] %v6779_v54 }
 0x282   :  { %v6756_v52 = vpop.f32.mrf.mxu1 }
 0x283   :  { %7958 = vst [vmem:[#allocation76_spill] sm:$0xff] %v6756_v52  ;;  %v6761_v58 = vpop.permute.xlu1 %2710  ;;  %v2300_v52 = vmul.f32 %v6269_v63, %v2140_v38  ;;  %v6800_v63 = vld [vmem:[#allocation2 + $0x19] sm:$0xff] }
 0x284   :  { %7960 = vst [vmem:[#allocation22_spill] sm:$0xff] %v6761_v58  ;;  %4790 = vset.pattern.permute.xlu0 %v7916_v36  ;;  %4500 = vmatmul.msk.f32.gmra.mxu2 %vm299_vm2, %v623_v56  ;;  %v6765_v46 = vpop.permute.xlu2 %3055  ;;  %v2553_v56 = vld [vmem:[#allocation2 + $0x11] sm:$0xff]  ;;  %v2714_v38 = vmul.f32 %v6345_v44, %v6800_v63 }
 0x285   :  { %4770 = vset.pattern.permute.xlu1 %v7916_v36  ;;  %3552 = vperm.xlu0 %4790, %v6583_v21   ;;  %v6772_v10 = vpop.f32.mrf.mxu2  ;;  %v2713_v22 = vmul.f32 %v6341_v24, %v2553_v56  ;;  %v4852_v24 = vld [vmem:[%s7758_s0 + $0x38] sm:$0xff]  ;;  %v6796_v56 = vpop.f32.mrf.mxu3 }
 0x286   :  { %7962 = vst [vmem:[#allocation78_spill] sm:$0xff] %v6772_v10  ;;  %3484 = vperm.xlu1 %4770, %v4851_v62   ;;  %4771 = vset.pattern.permute.xlu2 %v7909_v60 }
 0x287   :  { %4588 = vmatmul.msk.f32.gmra.mxu1 %vm299_vm2, %v2299_v7  ;;  %3921 = vperm.xlu2 %4771, %v4851_v62   ;;  %7966 = vst [vmem:[#allocation82_spill] sm:$0xff] %v6796_v56 }
 0x28a   :  { %v6782_v35 = vpop.f32.mrf.mxu1 }
 0x28b   :  { %7964 = vst [vmem:[#allocation80_spill] sm:$0xff] %v6782_v35  ;;  %v6850_v35 = vld [vmem:[%s7758_s0 + $0xd8] sm:$0xff] }
 0x28c   :  { %4597 = vmatmul.msk.f32.vlgmr.msra.gmra.mxu2 %vm299_vm2, %v2713_v22  ;;  %v3032_v10 = vpop.permute.xlu1 %3031  ;;  %v6785_v58 = vpop.permute.xlu2 %3067  ;;  %v2141_v22 = vld [vmem:[#allocation2 + $0xd8] sm:$0xff] }
 0x28d   :  { %v3152_v7 = vmul.f32 %v3032_v10, %v2992_v48  ;;  %3560 = vperm.xlu0 %4790, %v6615_v37   ;;  %v6791_v62 = vpop.f32.mrf.mxu2  ;;  %v6806_v10 = vpop.f32.mrf.mxu0 }
 0x28e   :  { %7965 = vst [vmem:[#allocation81_spill] sm:$0xff] %v6791_v62  ;;  %3488 = vperm.xlu1 %4770, %v4852_v24  }
 0x28f   :  { %4589 = vmatmul.msk.f32.gmra.mxu1 %vm299_vm2, %v2300_v52  ;;  %3925 = vperm.xlu2 %4771, %v4852_v24   ;;  %7968 = vst [vmem:[#allocation84_spill] sm:$0xff] %v6806_v10  ;;  %v2301_v52 = vmul.f32 %v6359_v25, %v2141_v22  ;;  %v2993_v24 = vld [vmem:[#allocation2 + $0x2f] sm:$0xff]  ;;  %v6828_v25 = vld [vmem:[#allocation2 + $0x21] sm:$0xff]  ;;  %v6830_v22 = vpop.f32.mrf.mxu3 }
 0x290   :  { %4631 = vmatmul.msk.f32.gmra.mxu3 %vm299_vm2, %v3152_v7  ;;  %v6815_v7 = vld [vmem:[%s7758_s0 + $0xd0] sm:$0xff]  ;;  %v3153_v56 = vmul.f32 %v6725_v34, %v2993_v24  ;;  %7970 = vst [vmem:[#allocation86_spill] sm:$0xff] %v6830_v22  ;;  %v4854_v34 = vld [vmem:[%s7758_s0 + $0x48] sm:$0xff]  ;;  %v2715_v24 = vmul.f32 %v6448_v17, %v6828_v25 }
 0x292   :  { %v6804_v48 = vpop.f32.mrf.mxu1 }
 0x293   :  { %7967 = vst [vmem:[#allocation83_spill] sm:$0xff] %v6804_v48  ;;  %v2994_v48 = vld [vmem:[#allocation2 + $0x37] sm:$0xff] }
 0x294   :  { %4598 = vmatmul.msk.f32.gmra.mxu2 %vm299_vm2, %v2714_v38  ;;  %v3040_v62 = vpop.permute.xlu1 %3039  ;;  %v6809_v54 = vpop.permute.xlu2 %3079 }
 0x295   :  { %3564 = vperm.xlu0 %4790, %v6815_v7   ;;  %v6818_v44 = vpop.f32.mrf.mxu2  ;;  %v6822_v38 = vpop.permute.xlu0 %3071  ;;  %v3154_v17 = vmul.f32 %v3040_v62, %v2994_v48 }
 0x296   :  { %7969 = vst [vmem:[#allocation85_spill] sm:$0xff] %v6818_v44  ;;  %4773 = vset.pattern.permute.xlu1 %v7909_v60  ;;  %v6845_v22 = vpop.f32.mrf.mxu0 }
 0x297   :  { %4590 = vmatmul.msk.f32.gmra.mxu1 %vm299_vm2, %v2301_v52  ;;  %3929 = vperm.xlu1 %4773, %v6563_v18   ;;  %v2142_v52 = vld [vmem:[#allocation2 + $0xe0] sm:$0xff]  ;;  %7972 = vst [vmem:[#allocation88_spill] sm:$0xff] %v6845_v22  ;;  %v6863_v30 = vpop.f32.mrf.mxu3 }
 0x298   :  { %4774 = vset.pattern.permute.xlu2 %v7916_v36  ;;  %4632 = vmatmul.msk.f32.gmra.mxu3 %vm299_vm2, %v3153_v56  ;;  %v2302_v10 = vmul.f32 %v6288_v6, %v2142_v52  ;;  %7975 = vst [vmem:[#allocation91_spill] sm:$0xff] %v6863_v30 }
 0x299   :  { %3496 = vperm.xlu2 %4774, %v4854_v34  }
 0x29a   :  { %v6837_v44 = vpop.f32.mrf.mxu1 }
 0x29b   :  { %7971 = vst [vmem:[#allocation87_spill] sm:$0xff] %v6837_v44 }
 0x29c   :  { %4599 = vmatmul.msk.f32.gmra.mxu2 %vm299_vm2, %v2715_v24  ;;  %v6840_v18 = vpop.permute.xlu1 %3051  ;;  %v6842_v56 = vpop.permute.xlu2 %3091  ;;  %v2556_v24 = vld [vmem:[#allocation2 + $0x29] sm:$0xff] }
 0x29d   :  { %3568 = vperm.xlu0 %4790, %v6850_v35   ;;  %v6857_v6 = vpop.permute.xlu0 %3083  ;;  %v2716_v52 = vmul.f32 %v6366_v31, %v2556_v24 }
 0x29e   :  { %v6853_v44 = vpop.f32.mrf.mxu2  ;;  %v6880_v24 = vpop.f32.mrf.mxu0 }
 0x29f   :  { %7973 = vst [vmem:[#allocation89_spill] sm:$0xff] %v6853_v44  ;;  %4591 = vmatmul.msk.f32.gmra.mxu1 %vm299_vm2, %v2302_v10  ;;  %3933 = vperm.xlu1 %4773, %v4854_v34   ;;  %v2303_v10 = vmul.f32 %v6291_v28, %v2143_v12  ;;  %v2995_v34 = vld [vmem:[#allocation2 + $0x3f] sm:$0xff]  ;;  %v2557_v12 = vld [vmem:[#allocation2 + $0x31] sm:$0xff] }
 0x2a0   :  { %4633 = vmatmul.msk.f32.gmra.mxu3 %vm299_vm2, %v3154_v17  ;;  %v3155_v31 = vmul.f32 %v6748_v27, %v2995_v34  ;;  %7977 = vst [vmem:[#allocation93_spill] sm:$0xff] %v6880_v24  ;;  %v4857_v28 = vld [vmem:[%s7758_s0 + $0x58] sm:$0xff]  ;;  %v2717_v27 = vmul.f32 %v6477_v47, %v2557_v12  ;;  %v6903_v24 = vld [vmem:[%s7758_s0 + $0xe8] sm:$0xff]  ;;  %v6906_v47 = vpop.f32.mrf.mxu3 }
 0x2a1   :  { %3500 = vperm.xlu2 %4774, %v6606_v32   ;;  %v6874_v32 = vld [vmem:[%s7758_s0 + $0xe0] sm:$0xff]  ;;  %7979 = vst [vmem:[#allocation95_spill] sm:$0xff] %v6906_v47 }
 0x2a2   :  { %v6861_v22 = vpop.f32.mrf.mxu1 }
 0x2a3   :  { %7974 = vst [vmem:[#allocation90_spill] sm:$0xff] %v6861_v22 }
 0x2a4   :  { %4600 = vmatmul.msk.f32.gmra.mxu2 %vm299_vm2, %v2716_v52  ;;  %v6866_v62 = vpop.permute.xlu1 %3063  ;;  %v6868_v48 = vpop.permute.xlu2 %3103 }
 0x2a5   :  { %3572 = vperm.xlu0 %4790, %v6874_v32   ;;  %v6892_v34 = vpop.permute.xlu0 %3095 }
 0x2a6   :  { %v6878_v17 = vpop.f32.mrf.mxu2 }
 0x2a7   :  { %7976 = vst [vmem:[#allocation92_spill] sm:$0xff] %v6878_v17  ;;  %4592 = vmatmul.msk.f32.gmra.mxu1 %vm299_vm2, %v2303_v10  ;;  %4776 = vset.pattern.permute.xlu1 %v7916_v36  ;;  %v2144_v10 = vld [vmem:[#allocation2 + $0xf0] sm:$0xff] }
 0x2a8   :  { %3504 = vperm.xlu1 %4776, %v4857_v28   ;;  %4634 = vmatmul.msk.f32.gmra.mxu3 %vm299_vm2, %v3155_v31  ;;  %v2304_v44 = vmul.f32 %v6385_v9, %v2144_v10  ;;  %v2996_v31 = vld [vmem:[#allocation2 + $0x47] sm:$0xff]  ;;  %v6916_v10 = vpop.f32.mrf.mxu0 }
 0x2a9   :  { %4777 = vset.pattern.permute.xlu2 %v7909_v60  ;;  %v4859_v9 = vld [vmem:[%s7758_s0 + $0x60] sm:$0xff]  ;;  %7981 = vst [vmem:[#allocation97_spill] sm:$0xff] %v6916_v10 }
 0x2aa   :  { %3941 = vperm.xlu2 %4777, %v4857_v28   ;;  %v6890_v52 = vpop.f32.mrf.mxu1  ;;  %v3156_v28 = vmul.f32 %v6759_v16, %v2996_v31  ;;  %v2145_v16 = vld [vmem:[#allocation2 + $0xf8] sm:$0xff] }
 0x2ab   :  { %7978 = vst [vmem:[#allocation94_spill] sm:$0xff] %v6890_v52 }
 0x2ac   :  { %4601 = vmatmul.msk.f32.gmra.mxu2 %vm299_vm2, %v2717_v27  ;;  %v6895_v30 = vpop.permute.xlu1 %3075  ;;  %v6897_v17 = vpop.permute.xlu2 %3115  ;;  %v2558_v27 = vld [vmem:[#allocation2 + $0x39] sm:$0xff] }
 0x2ad   :  { %3576 = vperm.xlu0 %4790, %v6903_v24   ;;  %v2718_v52 = vmul.f32 %v6392_v3, %v2558_v27  ;;  %v3427_v3 = vld [vmem:[#allocation2 + $0x18] sm:$0xff] }
 0x2ae   :  { %v6909_v12 = vpop.f32.mrf.mxu2 }
 0x2af   :  { %7980 = vst [vmem:[#allocation96_spill] sm:$0xff] %v6909_v12  ;;  %4593 = vmatmul.msk.f32.gmra.mxu1 %vm299_vm2, %v2304_v44  ;;  %v2305_v44 = vmul.f32 %v6317_v55, %v2145_v16  ;;  %v2997_v12 = vld [vmem:[#allocation2 + $0x4f] sm:$0xff]  ;;  %v6937_v55 = vpop.f32.mrf.mxu3  ;;  %v6941_v16 = vld [vmem:[#allocation2 + $0x41] sm:$0xff] }
 0x2b0   :  { %3508 = vperm.xlu1 %4776, %v4859_v9   ;;  %4635 = vmatmul.msk.f32.gmra.mxu3 %vm299_vm2, %v3156_v28  ;;  %v6928_v28 = vld [vmem:[%s7758_s0 + $0xf0] sm:$0xff]  ;;  %v3157_v27 = vmul.f32 %v6840_v18, %v2997_v12  ;;  %7984 = vst [vmem:[#allocation100_spill] sm:$0xff] %v6937_v55  ;;  %v2719_v18 = vmul.f32 %v6369_v33, %v6941_v16 }
 0x2b2   :  { %3945 = vperm.xlu2 %4777, %v4859_v9   ;;  %v6919_v47 = vpop.f32.mrf.mxu1  ;;  %v6931_v9 = vpop.permute.xlu0 %3107 }
 0x2b3   :  { %7982 = vst [vmem:[#allocation98_spill] sm:$0xff] %v6919_v47 }
 0x2b4   :  { %4602 = vmatmul.msk.f32.gmra.mxu2 %vm299_vm2, %v2718_v52  ;;  %v6922_v31 = vpop.permute.xlu1 %3087 }
 0x2b5   :  { %3580 = vperm.xlu0 %4790, %v6928_v28   ;;  %v3461_v10 = vpop.permute.xlu2 %3460 }
 0x2b6   :  { %v3587_v47 = vmul.f32 %v3461_v10, %v3427_v3  ;;  %v6934_v52 = vpop.f32.mrf.mxu2  ;;  %v6950_v10 = vpop.f32.mrf.mxu0  ;;  %v2146_v3 = vld [vmem:[#allocation2 + $0x100] sm:$0xff] }
 0x2b7   :  { %7983 = vst [vmem:[#allocation99_spill] sm:$0xff] %v6934_v52  ;;  %4594 = vmatmul.msk.f32.gmra.mxu1 %vm299_vm2, %v2305_v44  ;;  %v4861_v44 = vld [vmem:[%s7758_s0 + $0x70] sm:$0xff] }
 0x2b8   :  { %4779 = vset.pattern.permute.xlu1 %v7909_v60  ;;  %4636 = vmatmul.msk.f32.gmra.mxu3 %vm299_vm2, %v3157_v27  ;;  %7986 = vst [vmem:[#allocation102_spill] sm:$0xff] %v6950_v10  ;;  %v2998_v27 = vld [vmem:[#allocation2 + $0x57] sm:$0xff] }
 0x2b9   :  { %3949 = vperm.xlu1 %4779, %v6644_v49   ;;  %4661 = vmatmul.msk.f32.vlgmr.msra.gmra.mxu0 %vm299_vm2, %v3587_v47  ;;  %v2306_v47 = vmul.f32 %v6320_v43, %v2146_v3  ;;  %v3158_v33 = vmul.f32 %v6765_v46, %v2998_v27  ;;  %v6966_v10 = vld [vmem:[%s7758_s0 + $0xf8] sm:$0xff]  ;;  %v6973_v43 = vld [vmem:[#allocation2 + $0x49] sm:$0xff]  ;;  %v6977_v27 = vpop.f32.mrf.mxu3 }
 0x2ba   :  { %4780 = vset.pattern.permute.xlu2 %v7916_v36  ;;  %v6948_v12 = vpop.f32.mrf.mxu1  ;;  %v2147_v46 = vld [vmem:[#allocation2 + $0x108] sm:$0xff]  ;;  %v2720_v3 = vmul.f32 %v6507_v40, %v6973_v43  ;;  %7989 = vst [vmem:[#allocation105_spill] sm:$0xff] %v6977_v27  ;;  %v2561_v40 = vld [vmem:[#allocation2 + $0x51] sm:$0xff] }
 0x2bb   :  { %7985 = vst [vmem:[#allocation101_spill] sm:$0xff] %v6948_v12  ;;  %3516 = vperm.xlu2 %4780, %v4861_v44   ;;  %v2307_v12 = vmul.f32 %v6416_v1, %v2147_v46  ;;  %v4863_v1 = vld [vmem:[%s7758_s0 + $0x80] sm:$0xff] }
 0x2bc   :  { %4603 = vmatmul.msk.f32.gmra.mxu2 %vm299_vm2, %v2719_v18  ;;  %v6956_v49 = vpop.permute.xlu1 %3099  ;;  %v6970_v18 = vpop.permute.xlu0 %3119 }
 0x2bd   :  { %4795 = vset.pattern.permute.xlu0 %v7909_v60  ;;  %7988 = vst [vmem:[#allocation104_spill] sm:$0xff] %v6970_v18 }
 0x2be   :  { %v3902_v55 = vpop.permute.xlu2 %3901  ;;  %v6961_v52 = vpop.f32.mrf.mxu2  ;;  %4021 = vperm.xlu0 %4795, %v6966_v10  }
 0x2bf   :  { %7987 = vst [vmem:[#allocation103_spill] sm:$0xff] %v6961_v52  ;;  %4595 = vmatmul.msk.f32.gmra.mxu1 %vm299_vm2, %v2306_v47  ;;  %v6986_v22 = vpop.f32.mrf.mxu0 }
 0x2c0   :  { %4637 = vmatmul.msk.f32.gmra.mxu3 %vm299_vm2, %v3158_v33  ;;  %v2999_v33 = vld [vmem:[#allocation2 + $0x5f] sm:$0xff] }
 0x2c1   :  { %3953 = vperm.xlu1 %4779, %v4861_v44   ;;  %v3159_v44 = vmul.f32 %v6788_v14, %v2999_v33  ;;  %v7001_v14 = vpop.f32.mrf.mxu3  ;;  %v3000_v33 = vld [vmem:[#allocation2 + $0x67] sm:$0xff] }
 0x2c2   :  { %v6979_v52 = vpop.f32.mrf.mxu1  ;;  %7991 = vst [vmem:[#allocation107_spill] sm:$0xff] %v7001_v14 }
 0x2c3   :  { %3520 = vperm.xlu2 %4780, %v6677_v19   ;;  %v2721_v19 = vmul.f32 %v6423_v39, %v2561_v40 }
 0x2c4   :  { %4604 = vmatmul.msk.f32.gmra.mxu2 %vm299_vm2, %v2720_v3  ;;  %v6983_v47 = vpop.permute.xlu1 %3111  ;;  %v3898_v3 = vpop.permute.xlu0 %3897 }
 0x2c5   :  { %v4024_v39 = vmul.f32 %v3898_v3, %v6800_v63  ;;  %v3001_v63 = vld [vmem:[#allocation2 + $0x6f] sm:$0xff] }
 0x2c6   :  { %v3906_v18 = vpop.permute.xlu2 %3905  ;;  %v6989_v26 = vpop.f32.mrf.mxu2 }
 0x2c7   :  { %7990 = vst [vmem:[#allocation106_spill] sm:$0xff] %v6989_v26  ;;  %4596 = vmatmul.msk.f32.gmra.mxu1 %vm299_vm2, %v2307_v12  ;;  %v7011_v27 = vpop.f32.mrf.mxu0 }
 0x2c8   :  { %4638 = vmatmul.msk.f32.gmra.mxu3 %vm299_vm2, %v3159_v44  ;;  %v3160_v44 = vmul.f32 %v6866_v62, %v3000_v33  ;;  %7993 = vst [vmem:[#allocation109_spill] sm:$0xff] %v7011_v27  ;;  %v4025_v62 = vmul.f32 %v3902_v55, %v6828_v25  ;;  %v3428_v33 = vld [vmem:[#allocation2 + $0x20] sm:$0xff] }
 0x2c9   :  { %4782 = vset.pattern.permute.xlu1 %v7916_v36 }
 0x2ca   :  { %3524 = vperm.xlu1 %4782, %v4863_v1   ;;  %v6998_v46 = vpop.f32.mrf.mxu1 }
 0x2cb   :  { %4783 = vset.pattern.permute.xlu2 %v7909_v60 }
 0x2cc   :  { %3961 = vperm.xlu2 %4783, %v4863_v1   ;;  %4605 = vmatmul.msk.f32.gmra.mxu2 %vm299_vm2, %v2721_v19  ;;  %v7004_v12 = vpop.permute.xlu1 %3123  ;;  %v2562_v1 = vld [vmem:[#allocation2 + $0x59] sm:$0xff] }
 0x2cd   :  { %v2722_v19 = vmul.f32 %v6395_v23, %v2562_v1 }
 0x2ce   :  { %v7008_v40 = vpop.f32.mrf.mxu2 }
 0x2cf   :  { %7992 = vst [vmem:[#allocation108_spill] sm:$0xff] %v7008_v40  ;;  %4693 = vmatmul.msk.f32.vlgmr.msra.gmra.mxu1 %vm299_vm2, %v4024_v39  ;;  %v7023_v39 = vpop.f32.mrf.mxu3  ;;  %v7034_v55 = vpop.f32.mrf.mxu0 }
 0x2d0   :  { %v7013_v26 = vpop.permute.xlu2 %3476  ;;  %4639 = vmatmul.msk.f32.gmra.mxu3 %vm299_vm2, %v3160_v44  ;;  %7994 = vst [vmem:[#allocation110_spill] sm:$0xff] %v7023_v39  ;;  %v3161_v44 = vmul.f32 %v6785_v58, %v3001_v63  ;;  %v3866_v58 = vld [vmem:[#allocation2 + $0x29] sm:$0xff] }
 0x2d1   :  { %v4026_v63 = vmul.f32 %v3906_v18, %v3866_v58 }
 0x2d2   :  { %3528 = vperm.xlu1 %4782, %v6501_v5   ;;  %v7018_v14 = vpop.f32.mrf.mxu1 }
 0x2d4   :  { %3965 = vperm.xlu2 %4783, %v6501_v5   ;;  %4606 = vmatmul.msk.f32.gmra.mxu2 %vm299_vm2, %v2722_v19  ;;  %v2563_v5 = vld [vmem:[#allocation2 + $0x61] sm:$0xff]  ;;  %v3002_v19 = vld [vmem:[#allocation2 + $0x77] sm:$0xff] }
 0x2d5   :  { %v3465_v3 = vpop.permute.xlu1 %3464  ;;  %v2723_v25 = vmul.f32 %v6547_v8, %v2563_v5  ;;  %v3162_v8 = vmul.f32 %v6822_v38, %v3002_v19  ;;  %v3473_v38 = vpop.permute.xlu0 %3472  ;;  %v3003_v19 = vld [vmem:[#allocation2 + $0x7f] sm:$0xff] }
 0x2d6   :  { %v3588_v40 = vmul.f32 %v3465_v3, %v3428_v33  ;;  %v7026_v27 = vpop.f32.mrf.mxu2 }
 0x2d7   :  { %4694 = vmatmul.msk.f32.gmra.mxu1 %vm299_vm2, %v4025_v62  ;;  %v3429_v62 = vld [vmem:[#allocation2 + $0x28] sm:$0xff]  ;;  %v7060_v58 = vpop.f32.mrf.mxu0 }
 0x2d8   :  { %v7029_v23 = vpop.permute.xlu2 %3480  ;;  %4640 = vmatmul.msk.f32.gmra.mxu3 %vm299_vm2, %v3161_v44  ;;  %4662 = vmatmul.msk.f32.gmra.mxu0 %vm299_vm2, %v3588_v40  ;;  %v7047_v44 = vpop.f32.mrf.mxu3 }
 0x2d9   :  { %7995 = vst [vmem:[#allocation111_spill] sm:$0xff] %v7047_v44 }
 0x2da   :  { %4785 = vset.pattern.permute.xlu1 %v7909_v60  ;;  %v7037_v1 = vpop.f32.mrf.mxu1 }
 0x2db   :  { %3969 = vperm.xlu1 %4785, %v6712_v29   ;;  %v7051_v29 = vld [vmem:[#allocation2 + $0x69] sm:$0xff] }
 0x2dc   :  { %4786 = vset.pattern.permute.xlu2 %v7916_v36  ;;  %4607 = vmatmul.msk.f32.gmra.mxu2 %vm299_vm2, %v2723_v25  ;;  %v2724_v5 = vmul.f32 %v6450_v2, %v7051_v29 }
 0x2dd   :  { %3536 = vperm.xlu2 %4786, %v6535_v13   ;;  %v3469_v40 = vpop.permute.xlu1 %3468 }
 0x2de   :  { %v3589_v3 = vmul.f32 %v3469_v40, %v3429_v62  ;;  %v7044_v33 = vpop.f32.mrf.mxu2  ;;  %v3163_v40 = vmul.f32 %v6895_v30, %v3003_v19  ;;  %v3004_v19 = vld [vmem:[#allocation2 + $0x87] sm:$0xff] }
 0x2df   :  { %4695 = vmatmul.msk.f32.gmra.mxu1 %vm299_vm2, %v4026_v63  ;;  %v3430_v63 = vld [vmem:[#allocation2 + $0x30] sm:$0xff] }
 0x2e0   :  { %4641 = vmatmul.msk.f32.gmra.mxu3 %vm299_vm2, %v3162_v8  ;;  %4663 = vmatmul.msk.f32.gmra.mxu0 %vm299_vm2, %v3589_v3  ;;  %v3590_v62 = vmul.f32 %v3473_v38, %v3430_v63  ;;  %v3867_v3 = vld [vmem:[#allocation2 + $0x31] sm:$0xff]  ;;  %v4864_v38 = vld [vmem:[%s7758_s0 + $0xa8] sm:$0xff] }
 0x2e1   :  { %v7053_v18 = vpop.permute.xlu2 %3921  ;;  %v3431_v63 = vld [vmem:[#allocation2 + $0x38] sm:$0xff] }
 0x2e2   :  { %v7057_v25 = vpop.f32.mrf.mxu1 }
 0x2e3   :  { %3973 = vperm.xlu1 %4785, %v6535_v13   ;;  %v2565_v13 = vld [vmem:[#allocation2 + $0x71] sm:$0xff] }
 0x2e4   :  { %4608 = vmatmul.msk.f32.gmra.mxu2 %vm299_vm2, %v2724_v5  ;;  %v2725_v5 = vmul.f32 %v6428_v20, %v2565_v13  ;;  %v7084_v20 = vpop.f32.mrf.mxu0 }
 0x2e5   :  { %3540 = vperm.xlu2 %4786, %v6541_v59   ;;  %v7073_v59 = vpop.f32.mrf.mxu3 }
 0x2e6   :  { %v3910_v8 = vpop.permute.xlu1 %3909  ;;  %7996 = vst [vmem:[#allocation112_spill] sm:$0xff] %v7073_v59 }
 0x2e7   :  { %v4027_v44 = vmul.f32 %v3910_v8, %v3867_v3  ;;  %v7065_v2 = vpop.f32.mrf.mxu2  ;;  %v3868_v8 = vld [vmem:[#allocation2 + $0x39] sm:$0xff] }
 0x2e8   :  { %4642 = vmatmul.msk.f32.gmra.mxu3 %vm299_vm2, %v3163_v40  ;;  %4664 = vmatmul.msk.f32.gmra.mxu0 %vm299_vm2, %v3590_v62  ;;  %v3591_v40 = vmul.f32 %v7013_v26, %v3431_v63  ;;  %v3918_v63 = vpop.permute.xlu0 %3917 }
 0x2e9   :  { %v7069_v39 = vpop.permute.xlu2 %3925  ;;  %4696 = vmatmul.msk.f32.gmra.mxu1 %vm299_vm2, %v4027_v44  ;;  %v3164_v44 = vmul.f32 %v6809_v54, %v3004_v19 }
 0x2ea   :  { %v7075_v30 = vpop.f32.mrf.mxu1 }
 0x2eb   :  { %4788 = vset.pattern.permute.xlu1 %v7916_v36 }
 0x2ec   :  { %3544 = vperm.xlu1 %4788, %v4864_v38   ;;  %4609 = vmatmul.msk.f32.gmra.mxu2 %vm299_vm2, %v2725_v5  ;;  %v2566_v5 = vld [vmem:[#allocation2 + $0x79] sm:$0xff] }
 0x2ed   :  { %4789 = vset.pattern.permute.xlu2 %v7909_v60  ;;  %v2726_v59 = vmul.f32 %v6589_v4, %v2566_v5  ;;  %v7097_v26 = vpop.f32.mrf.mxu3  ;;  %v2567_v5 = vld [vmem:[#allocation2 + $0x81] sm:$0xff] }
 0x2ee   :  { %3981 = vperm.xlu2 %4789, %v4864_v38   ;;  %7997 = vst [vmem:[#allocation113_spill] sm:$0xff] %v7097_v26  ;;  %v3005_v38 = vld [vmem:[#allocation2 + $0x8f] sm:$0xff]  ;;  %v2727_v26 = vmul.f32 %v6479_v45, %v2567_v5  ;;  %v4865_v45 = vld [vmem:[%s7758_s0 + $0xc0] sm:$0xff] }
 0x2ef   :  { %v3914_v62 = vpop.permute.xlu1 %3913  ;;  %v7087_v3 = vpop.f32.mrf.mxu2  ;;  %v3007_v5 = vld [vmem:[#allocation2 + $0x9f] sm:$0xff] }
 0x2f0   :  { %v4028_v13 = vmul.f32 %v3914_v62, %v3868_v8  ;;  %4643 = vmatmul.msk.f32.gmra.mxu3 %vm299_vm2, %v3164_v44  ;;  %4665 = vmatmul.msk.f32.gmra.mxu0 %vm299_vm2, %v3591_v40  ;;  %v3432_v44 = vld [vmem:[#allocation2 + $0x40] sm:$0xff]  ;;  %v3165_v40 = vmul.f32 %v6857_v6, %v3005_v38  ;;  %v4029_v8 = vmul.f32 %v3918_v63, %v6941_v16  ;;  %v3433_v16 = vld [vmem:[#allocation2 + $0x48] sm:$0xff] }
 0x2f1   :  { %v3592_v62 = vmul.f32 %v7029_v23, %v3432_v44 }
 0x2f2   :  { %4697 = vmatmul.msk.f32.gmra.mxu1 %vm299_vm2, %v4028_v13  ;;  %v7093_v54 = vpop.f32.mrf.mxu1 }
 0x2f3   :  { %v7095_v19 = vpop.permute.xlu2 %3496 }
 0x2f4   :  { %3548 = vperm.xlu1 %4788, %v6577_v41   ;;  %4610 = vmatmul.msk.f32.gmra.mxu2 %vm299_vm2, %v2726_v59  ;;  %v7109_v59 = vpop.f32.mrf.mxu0 }
 0x2f5   :  { %v7120_v38 = vpop.f32.mrf.mxu3 }
 0x2f6   :  { %3985 = vperm.xlu2 %4789, %v6577_v41   ;;  %v3006_v41 = vld [vmem:[#allocation2 + $0x97] sm:$0xff]  ;;  %7999 = vst [vmem:[#allocation115_spill] sm:$0xff] %v7120_v38 }
 0x2f7   :  { %v7104_v4 = vpop.f32.mrf.mxu2  ;;  %v3166_v63 = vmul.f32 %v6922_v31, %v3006_v41  ;;  %v3871_v41 = vld [vmem:[#allocation2 + $0x51] sm:$0xff] }
 0x2f8   :  { %7998 = vst [vmem:[#allocation114_spill] sm:$0xff] %v7104_v4  ;;  %v3485_v13 = vpop.permute.xlu1 %3484  ;;  %4644 = vmatmul.msk.f32.gmra.mxu3 %vm299_vm2, %v3165_v40  ;;  %4666 = vmatmul.msk.f32.gmra.mxu0 %vm299_vm2, %v3592_v62 }
 0x2f9   :  { %v3593_v44 = vmul.f32 %v3485_v13, %v3433_v16 }
 0x2fa   :  { %4698 = vmatmul.msk.f32.gmra.mxu1 %vm299_vm2, %v4029_v8  ;;  %v7113_v6 = vpop.f32.mrf.mxu1 }
 0x2fb   :  { %v7115_v23 = vpop.permute.xlu2 %3500 }
 0x2fc   :  { %4791 = vset.pattern.permute.xlu1 %v7909_v60  ;;  %4611 = vmatmul.msk.f32.gmra.mxu2 %vm299_vm2, %v2727_v26  ;;  %v4030_v60 = vmul.f32 %v7053_v18, %v6973_v43  ;;  %v7135_v62 = vpop.f32.mrf.mxu0  ;;  %v3167_v43 = vmul.f32 %v6842_v56, %v3007_v5  ;;  %v3434_v18 = vld [vmem:[#allocation2 + $0x50] sm:$0xff] }
 0x2fd   :  { %3989 = vperm.xlu1 %4791, %v6583_v21   ;;  %v2568_v21 = vld [vmem:[#allocation2 + $0x89] sm:$0xff] }
 0x2fe   :  { %4792 = vset.pattern.permute.xlu2 %v7916_v36  ;;  %v2728_v31 = vmul.f32 %v6463_v50, %v2568_v21 }
 0x2ff   :  { %3556 = vperm.xlu2 %4792, %v4865_v45   ;;  %v7127_v40 = vpop.f32.mrf.mxu2 }
 0x300   :  { %8000 = vst [vmem:[#allocation116_spill] sm:$0xff] %v7127_v40  ;;  %v3489_v26 = vpop.permute.xlu1 %3488  ;;  %4645 = vmatmul.msk.f32.gmra.mxu3 %vm299_vm2, %v3166_v63  ;;  %4667 = vmatmul.msk.f32.gmra.mxu0 %vm299_vm2, %v3593_v44  ;;  %v7146_v63 = vpop.f32.mrf.mxu3  ;;  %v4031_v44 = vmul.f32 %v7069_v39, %v3871_v41  ;;  %v3008_v39 = vld [vmem:[#allocation2 + $0xa7] sm:$0xff]  ;;  %v3872_v41 = vld [vmem:[#allocation2 + $0x59] sm:$0xff] }
 0x301   :  { %v3594_v16 = vmul.f32 %v3489_v26, %v3434_v18  ;;  %8002 = vst [vmem:[#allocation118_spill] sm:$0xff] %v7146_v63  ;;  %v3168_v5 = vmul.f32 %v6892_v34, %v3008_v39  ;;  %v2576_v40 = vld [vmem:[#allocation2 + $0xc9] sm:$0xff] }
 0x302   :  { %4699 = vmatmul.msk.f32.gmra.mxu1 %vm299_vm2, %v4030_v60  ;;  %v7151_v60 = vld [vmem:[#allocation2 + $0x91] sm:$0xff] }
 0x303   :  { %v2729_v56 = vmul.f32 %v6622_v11, %v7151_v60 }
 0x304   :  { %v7137_v8 = vpop.permute.xlu2 %3941  ;;  %v7139_v13 = vpop.f32.mrf.mxu1  ;;  %4612 = vmatmul.msk.f32.gmra.mxu2 %vm299_vm2, %v2728_v31 }
 0x305   :  { %3993 = vperm.xlu1 %4791, %v4865_v45   ;;  %v7162_v31 = vpop.f32.mrf.mxu0 }
 0x307   :  { %4793 = vset.pattern.permute.xlu2 %v7875_v0  ;;  %v7144_v50 = vpop.f32.mrf.mxu2  ;;  %v3493_v0 = vpop.permute.xlu0 %3492 }
 0x308   :  { %8001 = vst [vmem:[#allocation117_spill] sm:$0xff] %v7144_v50  ;;  %3127 = vperm.xlu2 %4793, %v6815_v7   ;;  %4646 = vmatmul.msk.f32.gmra.mxu3 %vm299_vm2, %v3167_v43  ;;  %v3435_v43 = vld [vmem:[#allocation2 + $0x58] sm:$0xff] }
 0x309   :  { %v3930_v45 = vpop.permute.xlu1 %3929  ;;  %4668 = vmatmul.msk.f32.gmra.mxu0 %vm299_vm2, %v3594_v16  ;;  %v3595_v18 = vmul.f32 %v3493_v0, %v3435_v43  ;;  %v7168_v16 = vpop.f32.mrf.mxu3  ;;  %v3009_v0 = vld [vmem:[#allocation2 + $0xaf] sm:$0xff] }
 0x30a   :  { %4700 = vmatmul.msk.f32.gmra.mxu1 %vm299_vm2, %v4031_v44  ;;  %v4032_v44 = vmul.f32 %v3930_v45, %v3872_v41  ;;  %v3169_v45 = vmul.f32 %v6956_v49, %v3009_v0  ;;  %v3873_v41 = vld [vmem:[#allocation2 + $0x61] sm:$0xff] }
 0x30c   :  { %v7157_v26 = vpop.permute.xlu2 %3945  ;;  %v7159_v21 = vpop.f32.mrf.mxu1  ;;  %4613 = vmatmul.msk.f32.gmra.mxu2 %vm299_vm2, %v2729_v56  ;;  %v2570_v56 = vld [vmem:[#allocation2 + $0x99] sm:$0xff] }
 0x30d   :  { %3997 = vperm.xlu1 %4791, %v6615_v37   ;;  %v2730_v37 = vmul.f32 %v6510_v61, %v2570_v56  ;;  %v7182_v43 = vpop.f32.mrf.mxu0  ;;  %v2571_v56 = vld [vmem:[#allocation2 + $0xa1] sm:$0xff] }
 0x30f   :  { %v7166_v11 = vpop.f32.mrf.mxu2 }
 0x310   :  { %3131 = vperm.xlu2 %4793, %v6850_v35   ;;  %4647 = vmatmul.msk.f32.gmra.mxu3 %vm299_vm2, %v3168_v5  ;;  %v3436_v5 = vld [vmem:[#allocation2 + $0x60] sm:$0xff] }
 0x311   :  { %v3934_v63 = vpop.permute.xlu1 %3933  ;;  %4669 = vmatmul.msk.f32.gmra.mxu0 %vm299_vm2, %v3595_v18  ;;  %v3596_v18 = vmul.f32 %v7095_v19, %v3436_v5  ;;  %v3010_v19 = vld [vmem:[#allocation2 + $0xb7] sm:$0xff] }
 0x312   :  { %4701 = vmatmul.msk.f32.gmra.mxu1 %vm299_vm2, %v4032_v44  ;;  %v4033_v44 = vmul.f32 %v3934_v63, %v3873_v41  ;;  %v3938_v63 = vpop.permute.xlu0 %3937 }
 0x314   :  { %v7175_v34 = vpop.f32.mrf.mxu1  ;;  %4614 = vmatmul.msk.f32.gmra.mxu2 %vm299_vm2, %v2730_v37  ;;  %v7191_v37 = vpop.f32.mrf.mxu3 }
 0x315   :  { %v7178_v39 = vpop.permute.xlu2 %3516  ;;  %4001 = vperm.xlu1 %4791, %v6815_v7   ;;  %v2731_v7 = vmul.f32 %v6491_v15, %v2571_v56  ;;  %v4034_v56 = vmul.f32 %v3938_v63, %v7051_v29  ;;  %v3011_v29 = vld [vmem:[#allocation2 + $0xbf] sm:$0xff]  ;;  %v3438_v63 = vld [vmem:[#allocation2 + $0x70] sm:$0xff] }
 0x317   :  { %v7185_v61 = vpop.f32.mrf.mxu2 }
 0x318   :  { %3135 = vperm.xlu2 %4793, %v6874_v32   ;;  %4648 = vmatmul.msk.f32.gmra.mxu3 %vm299_vm2, %v3169_v45  ;;  %v3170_v45 = vmul.f32 %v6868_v48, %v3010_v19  ;;  %v3171_v19 = vmul.f32 %v6931_v9, %v3011_v29 }
 0x319   :  { %4670 = vmatmul.msk.f32.gmra.mxu0 %vm299_vm2, %v3596_v18  ;;  %v3437_v18 = vld [vmem:[#allocation2 + $0x68] sm:$0xff] }
 0x31a   :  { %v3505_v49 = vpop.permute.xlu1 %3504  ;;  %4702 = vmatmul.msk.f32.gmra.mxu1 %vm299_vm2, %v4033_v44  ;;  %v3597_v15 = vmul.f32 %v7115_v23, %v3437_v18  ;;  %v2572_v44 = vld [vmem:[#allocation2 + $0xa9] sm:$0xff]  ;;  %v3875_v18 = vld [vmem:[#allocation2 + $0x71] sm:$0xff] }
 0x31c   :  { %v7194_v0 = vpop.f32.mrf.mxu1  ;;  %4615 = vmatmul.msk.f32.gmra.mxu2 %vm299_vm2, %v2731_v7  ;;  %v7207_v7 = vpop.f32.mrf.mxu0 }
 0x31d   :  { %v7197_v5 = vpop.permute.xlu2 %3520  ;;  %4005 = vperm.xlu1 %4791, %v6850_v35   ;;  %8003 = vst [vmem:[#allocation119_spill] sm:$0xff] %v7207_v7  ;;  %v2732_v35 = vmul.f32 %v6653_v51, %v2572_v44  ;;  %v7211_v50 = vpop.f32.mrf.mxu3  ;;  %v4035_v44 = vmul.f32 %v7137_v8, %v3875_v18  ;;  %v3012_v8 = vld [vmem:[#allocation2 + $0xc7] sm:$0xff] }
 0x31f   :  { %v7202_v41 = vpop.f32.mrf.mxu2 }
 0x320   :  { %3139 = vperm.xlu2 %4793, %v6903_v24   ;;  %4649 = vmatmul.msk.f32.gmra.mxu3 %vm299_vm2, %v3170_v45 }
 0x321   :  { %4671 = vmatmul.msk.f32.gmra.mxu0 %vm299_vm2, %v3597_v15  ;;  %v3598_v15 = vmul.f32 %v3505_v49, %v3438_v63  ;;  %v3439_v63 = vld [vmem:[#allocation2 + $0x78] sm:$0xff] }
 0x322   :  { %v3509_v48 = vpop.permute.xlu1 %3508  ;;  %4703 = vmatmul.msk.f32.gmra.mxu1 %vm299_vm2, %v4034_v56  ;;  %v2573_v56 = vld [vmem:[#allocation2 + $0xb1] sm:$0xff] }
 0x324   :  { %v7214_v23 = vpop.f32.mrf.mxu1  ;;  %4616 = vmatmul.msk.f32.gmra.mxu2 %vm299_vm2, %v2732_v35  ;;  %v7229_v9 = vpop.f32.mrf.mxu0 }
 0x325   :  { %4009 = vperm.xlu1 %4791, %v6874_v32   ;;  %v2733_v32 = vmul.f32 %v6550_v42, %v2573_v56  ;;  %8004 = vst [vmem:[#allocation120_spill] sm:$0xff] %v7229_v9  ;;  %v7231_v29 = vpop.f32.mrf.mxu3  ;;  %v3876_v42 = vld [vmem:[#allocation2 + $0x79] sm:$0xff] }
 0x326   :  { %v7219_v45 = vpop.permute.xlu2 %3961  ;;  %v2574_v56 = vld [vmem:[#allocation2 + $0xb9] sm:$0xff] }
 0x327   :  { %v7221_v51 = vpop.f32.mrf.mxu2 }
 0x328   :  { %3143 = vperm.xlu2 %4793, %v6928_v28   ;;  %4650 = vmatmul.msk.f32.gmra.mxu3 %vm299_vm2, %v3171_v19  ;;  %v3172_v19 = vmul.f32 %v6983_v47, %v3012_v8 }
 0x329   :  { %4672 = vmatmul.msk.f32.gmra.mxu0 %vm299_vm2, %v3598_v15  ;;  %v3599_v15 = vmul.f32 %v3509_v48, %v3439_v63 }
 0x32a   :  { %4704 = vmatmul.msk.f32.gmra.mxu1 %vm299_vm2, %v4035_v44  ;;  %v4036_v44 = vmul.f32 %v7157_v26, %v3876_v42  ;;  %v3013_v26 = vld [vmem:[#allocation2 + $0xcf] sm:$0xff] }
 0x32b   :  { %v3950_v35 = vpop.permute.xlu1 %3949  ;;  %v3173_v48 = vmul.f32 %v6897_v17, %v3013_v26  ;;  %v8009_v17 = vld [vmem:[#allocation59_spill] sm:$0xff] }
 0x32c   :  { %v7233_v49 = vpop.f32.mrf.mxu1  ;;  %4617 = vmatmul.msk.f32.gmra.mxu2 %vm299_vm2, %v2733_v32  ;;  %v3513_v32 = vpop.permute.xlu0 %3512 }
 0x32d   :  { %8005 = vst [vmem:[#allocation121_spill] sm:$0xff] %v7233_v49  ;;  %4013 = vperm.xlu1 %4791, %v6903_v24   ;;  %v2734_v24 = vmul.f32 %v6530_v57, %v2574_v56  ;;  %v7253_v63 = vpop.f32.mrf.mxu0  ;;  %v7255_v42 = vpop.f32.mrf.mxu3  ;;  %v3877_v57 = vld [vmem:[#allocation2 + $0x81] sm:$0xff] }
 0x32e   :  { %v7238_v18 = vpop.permute.xlu2 %3965  ;;  %8007 = vst [vmem:[#allocation123_spill] sm:$0xff] %v7253_v63  ;;  %v3441_v63 = vld [vmem:[#allocation2 + $0x88] sm:$0xff] }
 0x32f   :  { %v7243_v38 = vpop.f32.mrf.mxu2  ;;  %v2579_v49 = vld [vmem:[#allocation2 + $0xe1] sm:$0xff] }
 0x330   :  { %3147 = vperm.xlu2 %4793, %v6966_v10   ;;  %4651 = vmatmul.msk.f32.gmra.mxu3 %vm299_vm2, %v3172_v19  ;;  %v3440_v19 = vld [vmem:[#allocation2 + $0x80] sm:$0xff] }
 0x331   :  { %4673 = vmatmul.msk.f32.gmra.mxu0 %vm299_vm2, %v3599_v15  ;;  %v3600_v15 = vmul.f32 %v3513_v32, %v3440_v19 }
 0x332   :  { %4705 = vmatmul.msk.f32.gmra.mxu1 %vm299_vm2, %v4036_v44  ;;  %v4037_v44 = vmul.f32 %v3950_v35, %v3877_v57  ;;  %v3014_v57 = vld [vmem:[#allocation2 + $0xd7] sm:$0xff] }
 0x333   :  { %v3954_v47 = vpop.permute.xlu1 %3953 }
 0x334   :  { %v7248_v8 = vpop.f32.mrf.mxu1  ;;  %4618 = vmatmul.msk.f32.gmra.mxu2 %vm299_vm2, %v2734_v24  ;;  %v8008_v24 = vld [vmem:[#allocation47_spill] sm:$0xff] }
 0x335   :  { %8006 = vst [vmem:[#allocation122_spill] sm:$0xff] %v7248_v8  ;;  %4017 = vperm.xlu1 %4791, %v6928_v28   ;;  %v1147_v8 = vadd.f32 %v6325_v53, %v8008_v24  ;;  %v2575_v28 = vld [vmem:[#allocation2 + $0xc1] sm:$0xff] }
 0x336   :  { %v2735_v26 = vmul.f32 %v8009_v17, %v2575_v28  ;;  %v8012_v53 = vld [vmem:[#allocation104_spill] sm:$0xff]  ;;  %v7277_v28 = vpop.f32.mrf.mxu0 }
 0x337   :  { %v7257_v56 = vpop.permute.xlu2 %3536  ;;  %v7267_v32 = vpop.f32.mrf.mxu2  ;;  %v3174_v24 = vmul.f32 %v8012_v53, %v3014_v57  ;;  %8013 = vst [vmem:[#allocation59_spill] sm:$0xff] %v7277_v28 }
 0x338   :  { %4652 = vmatmul.msk.f32.gmra.mxu3 %vm299_vm2, %v3173_v48  ;;  %4794 = vset.pattern.permute.xlu2 %v7916_v36  ;;  %v8011_v36 = vld [vmem:[#allocation58_spill] sm:$0xff]  ;;  %v3958_v53 = vpop.permute.xlu0 %3957 }
 0x339   :  { %4674 = vmatmul.msk.f32.gmra.mxu0 %vm299_vm2, %v3600_v15  ;;  %3584 = vperm.xlu2 %4794, %v6966_v10   ;;  %v1647_v48 = vadd.f32 %v8011_v36, %v1147_v8  ;;  %v3601_v15 = vmul.f32 %v7178_v39, %v3441_v63  ;;  %v3878_v10 = vld [vmem:[#allocation2 + $0x89] sm:$0xff]  ;;  %v8015_v8 = vld [vmem:[#allocation46_spill] sm:$0xff] }
 0x33a   :  { %4706 = vmatmul.msk.f32.gmra.mxu1 %vm299_vm2, %v4037_v44  ;;  %v7279_v44 = vpop.f32.mrf.mxu3  ;;  %v4038_v17 = vmul.f32 %v3954_v47, %v3878_v10  ;;  %v2736_v36 = vmul.f32 %v8015_v8, %v2576_v40  ;;  %v8016_v39 = vld [vmem:[#allocation16_spill] sm:$0xff]  ;;  %v2577_v8 = vld [vmem:[#allocation2 + $0xd1] sm:$0xff] }
 0x33c   :  { %v7269_v19 = vpop.f32.mrf.mxu1  ;;  %v3525_v35 = vpop.permute.xlu1 %3524  ;;  %4619 = vmatmul.msk.f32.gmra.mxu2 %vm299_vm2, %v2735_v26 }
 0x33d   :  { %8010 = vst [vmem:[#allocation47_spill] sm:$0xff] %v7269_v19  ;;  %v8014_v19 = vld [vmem:[#allocation4_spill] sm:$0xff] }
 0x33e   :  { %v2084_v26 = vadd.f32 %v8014_v19, %v1647_v48  ;;  %v3442_v48 = vld [vmem:[#allocation2 + $0x90] sm:$0xff] }
 0x33f   :  { %v7275_v9 = vpop.permute.xlu2 %3540  ;;  %v7292_v28 = vpop.f32.mrf.mxu2  ;;  %v3602_v40 = vmul.f32 %v7197_v5, %v3442_v48  ;;  %v3880_v48 = vld [vmem:[#allocation2 + $0x99] sm:$0xff] }
 0x340   :  { %4653 = vmatmul.msk.f32.gmra.mxu3 %vm299_vm2, %v3174_v24  ;;  %v2521_v63 = vadd.f32 %v8016_v39, %v2084_v26  ;;  %v4866_v24 = vld [vmem:[#allocation2 + $0xdf] sm:$0xff] }
 0x341   :  { %4675 = vmatmul.msk.f32.gmra.mxu0 %vm299_vm2, %v3601_v15  ;;  %v3175_v19 = vmul.f32 %v4866_v24, %v7004_v12  ;;  %v4039_v15 = vmul.f32 %v3958_v53, %v7151_v60  ;;  %v7308_v60 = vld [vmem:[%s7759_s3 + $0x1] ss:$0 sm:$0xff]  ;;  %v8019_v24 = vld [vmem:[#allocation12_spill] sm:$0xff] }
 0x342   :  { %4707 = vmatmul.msk.f32.gmra.mxu1 %vm299_vm2, %v4038_v17  ;;  %v2958_v47 = vadd.f32 %v7166_v11, %v2521_v63  ;;  %v3736_v17 = vpop.f32.mrf.mxu0  ;;  %v8018_v11 = vld [vmem:[#allocation7_spill] sm:$0xff]  ;;  %v7302_v12 = vpop.f32.mrf.mxu3 }
 0x343   :  { %v2737_v39 = vmul.f32 %v8018_v11, %v2577_v8 }
 0x344   :  { %v7287_v57 = vpop.f32.mrf.mxu1  ;;  %4620 = vmatmul.msk.f32.gmra.mxu2 %vm299_vm2, %v2736_v36  ;;  %v3529_v10 = vpop.permute.xlu1 %3528  ;;  %v3395_v36 = vadd.f32 %v7168_v16, %v2958_v47  ;;  %v8020_v16 = vld [vmem:[#allocation27_spill] sm:$0xff] }
 0x345   :  { %8017 = vst [vmem:[#allocation58_spill] sm:$0xff] %v7287_v57  ;;  %v2522_v47 = vadd.f32 %v8020_v16, %v8019_v24  ;;  %v8022_v16 = vld [vmem:[#allocation30_spill] sm:$0xff] }
 0x346   :  { %v3832_v63 = vadd.f32 %v3736_v17, %v3395_v36  ;;  %v4040_v17 = vmul.f32 %v7219_v45, %v3880_v48  ;;  %v3444_v48 = vld [vmem:[#allocation2 + $0xa0] sm:$0xff] }
 0x347   :  { %v7316_v36 = vpop.f32.mrf.mxu2 }
 0x348   :  { %v7296_v26 = vpop.permute.xlu2 %3981  ;;  %4654 = vmatmul.msk.f32.gmra.mxu3 %vm299_vm2, %v3175_v19  ;;  %v3443_v19 = vld [vmem:[#allocation2 + $0x98] sm:$0xff] }
 0x349   :  { %4676 = vmatmul.msk.f32.gmra.mxu0 %vm299_vm2, %v3602_v40  ;;  %v3603_v40 = vmul.f32 %v3525_v35, %v3443_v19 }
 0x34a   :  { %4708 = vmatmul.msk.f32.gmra.mxu1 %vm299_vm2, %v4039_v15  ;;  %v2959_v15 = vadd.f32 %v7185_v61, %v2522_v47  ;;  %v7327_v61 = vpop.f32.mrf.mxu3  ;;  %v8023_v47 = vld [vmem:[#allocation50_spill] sm:$0xff] }
 0x34b   :  { %v2523_v19 = vadd.f32 %v8023_v47, %v8022_v16 }
 0x34c   :  { %v4173_v5 = vpop.f32.mrf.mxu1  ;;  %4621 = vmatmul.msk.f32.gmra.mxu2 %vm299_vm2, %v2737_v39  ;;  %v2578_v39 = vld [vmem:[#allocation2 + $0xd9] sm:$0xff]  ;;  %v3396_v35 = vadd.f32 %v7191_v37, %v2959_v15 }
 0x34d   :  { %v4269_v53 = vadd.f32 %v4173_v5, %v3832_v63  ;;  %v3970_v11 = vpop.permute.xlu1 %3969  ;;  %v8021_v5 = vld [vmem:[#allocation13_spill] sm:$0xff]  ;;  %v8024_v37 = vld [vmem:[#allocation18_spill] sm:$0xff] }
 0x34e   :  { %v2738_v24 = vmul.f32 %v8021_v5, %v2578_v39  ;;  %v2960_v39 = vadd.f32 %v7202_v41, %v2523_v19  ;;  %v2739_v15 = vmul.f32 %v8024_v37, %v2579_v49  ;;  %v3445_v19 = vld [vmem:[#allocation2 + $0xa8] sm:$0xff]  ;;  %v8027_v37 = vld [vmem:[#allocation49_spill] sm:$0xff] }
 0x34f   :  { %v4303_v8 = vadd.f32 %v7308_v60, %v4269_v53 }
 0x350   :  { %v7318_v57 = vpop.permute.xlu2 %3985  ;;  %v3397_v41 = vadd.f32 %v7211_v50, %v2960_v39  ;;  %v2580_v39 = vld [vmem:[#allocation2 + $0xe9] sm:$0xff] }
 0x351   :  { %v4335_v63 = vmax.f32 %v4303_v8, 0.0  ;;  %4677 = vmatmul.msk.f32.gmra.mxu0 %vm299_vm2, %v3603_v40  ;;  %v3881_v8 = vld [vmem:[#allocation2 + $0xa1] sm:$0xff] }
 0x352   :  { %4709 = vmatmul.msk.f32.gmra.mxu1 %vm299_vm2, %v4040_v17  ;;  %v3604_v17 = vmul.f32 %v3529_v10, %v3444_v48  ;;  %v4041_v5 = vmul.f32 %v7238_v18, %v3881_v8  ;;  %v3533_v10 = vpop.permute.xlu0 %3532  ;;  %v7347_v48 = vpop.f32.mrf.mxu3 }
 0x353   :  { %4368 = vst.msk [vmem:[%s7761_s4] sm:$0xff] %vm4367_vm3, %v4335_v63  ;;  %v3605_v8 = vmul.f32 %v3533_v10, %v3445_v19  ;;  %v8029_v19 = vld [vmem:[#allocation66_spill] sm:$0xff] }
 0x354   :  { %v4176_v45 = vpop.f32.mrf.mxu1  ;;  %4622 = vmatmul.msk.f32.gmra.mxu2 %vm299_vm2, %v2738_v24  ;;  %v7339_v24 = vpop.f32.mrf.mxu2 }
 0x355   :  { %v3739_v53 = vpop.f32.mrf.mxu0  ;;  %v3974_v7 = vpop.permute.xlu1 %3973 }
 0x356   :  { %v3833_v40 = vadd.f32 %v3739_v53, %v3396_v35  ;;  %v8026_v53 = vld [vmem:[#allocation63_spill] sm:$0xff] }
 0x358   :  { %v4270_v63 = vadd.f32 %v4176_v45, %v3833_v40  ;;  %v8025_v45 = vld [vmem:[#allocation32_spill] sm:$0xff] }
 0x359   :  { %v7335_v4 = vpop.permute.xlu2 %3556  ;;  %4678 = vmatmul.msk.f32.gmra.mxu0 %vm299_vm2, %v3604_v17  ;;  %v2524_v47 = vadd.f32 %v8026_v53, %v8025_v45  ;;  %v3882_v17 = vld [vmem:[#allocation2 + $0xa9] sm:$0xff] }
 0x35a   :  { %v4304_v16 = vadd.f32 %v7308_v60, %v4270_v63  ;;  %4710 = vmatmul.msk.f32.gmra.mxu1 %vm299_vm2, %v4041_v5  ;;  %v4042_v63 = vmul.f32 %v3970_v11, %v3882_v17  ;;  %v3016_v53 = vld [vmem:[#allocation2 + $0xe7] sm:$0xff] }
 0x35b   :  { %v2961_v5 = vadd.f32 %v7221_v51, %v2524_v47  ;;  %v8028_v47 = vld [vmem:[#allocation15_spill] sm:$0xff] }
 0x35c   :  { %v4336_v35 = vmax.f32 %v4304_v16, 0.0  ;;  %4623 = vmatmul.msk.f32.gmra.mxu2 %vm299_vm2, %v2739_v15  ;;  %v4179_v49 = vpop.f32.mrf.mxu1  ;;  %v2740_v15 = vmul.f32 %v8027_v37, %v2580_v39  ;;  %v7360_v10 = vpop.f32.mrf.mxu2 }
 0x35d   :  { %v3742_v18 = vpop.f32.mrf.mxu0  ;;  %v3398_v51 = vadd.f32 %v7231_v29, %v2961_v5  ;;  %v7373_v29 = vpop.f32.mrf.mxu3 }
 0x35e   :  { %4369 = vst.msk [vmem:[%s7761_s4 + $0x8] sm:$0xff] %vm4367_vm3, %v4336_v35  ;;  %v3834_v40 = vadd.f32 %v3742_v18, %v3397_v41  ;;  %v7358_v35 = vpop.permute.xlu1 %3544 }
 0x360   :  { %v4271_v50 = vadd.f32 %v4179_v49, %v3834_v40  ;;  %v2525_v49 = vadd.f32 %v8029_v19, %v8028_v47  ;;  %v3446_v40 = vld [vmem:[#allocation2 + $0xb0] sm:$0xff]  ;;  %v8031_v19 = vld [vmem:[#allocation6_spill] sm:$0xff] }
 0x361   :  { %4679 = vmatmul.msk.f32.gmra.mxu0 %vm299_vm2, %v3605_v8 }
 0x362   :  { %v4305_v16 = vadd.f32 %v7308_v60, %v4271_v50  ;;  %v3128_v45 = vpop.permute.xlu2 %3127  ;;  %4711 = vmatmul.msk.f32.gmra.mxu1 %vm299_vm2, %v4042_v63  ;;  %v3606_v63 = vmul.f32 %v7257_v56, %v3446_v40  ;;  %v3883_v50 = vld [vmem:[#allocation2 + $0xb1] sm:$0xff]  ;;  %v2962_v39 = vadd.f32 %v7243_v38, %v2525_v49  ;;  %v3978_v56 = vpop.permute.xlu0 %3977 }
 0x363   :  { %v3176_v41 = vmul.f32 %v3128_v45, %v3016_v53  ;;  %v4043_v5 = vmul.f32 %v3974_v7, %v3883_v50  ;;  %v8032_v49 = vld [vmem:[#allocation69_spill] sm:$0xff]  ;;  %v3884_v50 = vld [vmem:[#allocation2 + $0xb9] sm:$0xff] }
 0x364   :  { %v4337_v18 = vmax.f32 %v4305_v16, 0.0  ;;  %4624 = vmatmul.msk.f32.gmra.mxu2 %vm299_vm2, %v2740_v15  ;;  %v2581_v15 = vld [vmem:[#allocation2 + $0xf1] sm:$0xff]  ;;  %v3399_v38 = vadd.f32 %v7255_v42, %v2962_v39  ;;  %v2526_v40 = vadd.f32 %v8032_v49, %v8031_v19  ;;  %v4044_v42 = vmul.f32 %v3978_v56, %v3884_v50  ;;  %v8035_v19 = vld [vmem:[#allocation72_spill] sm:$0xff] }
 0x365   :  { %4655 = vmatmul.msk.f32.gmra.mxu3 %vm299_vm2, %v3176_v41  ;;  %v3745_v11 = vpop.f32.mrf.mxu0  ;;  %v8030_v16 = vld [vmem:[#allocation73_spill] sm:$0xff] }
 0x366   :  { %4370 = vst.msk [vmem:[%s7761_s4 + $0x10] sm:$0xff] %vm4367_vm3, %v4337_v18  ;;  %v3835_v8 = vadd.f32 %v3745_v11, %v3398_v51  ;;  %v4182_v17 = vpop.f32.mrf.mxu1  ;;  %v2741_v45 = vmul.f32 %v8030_v16, %v2581_v15  ;;  %v3017_v18 = vld [vmem:[#allocation2 + $0xef] sm:$0xff]  ;;  %v3549_v7 = vpop.permute.xlu1 %3548  ;;  %v2963_v39 = vadd.f32 %v7267_v32, %v2526_v40  ;;  %v2582_v15 = vld [vmem:[#allocation2 + $0xf9] sm:$0xff] }
 0x367   :  { %v3448_v40 = vld [vmem:[#allocation2 + $0xc0] sm:$0xff] }
 0x368   :  { %v4272_v37 = vadd.f32 %v4182_v17, %v3835_v8  ;;  %v3447_v8 = vld [vmem:[#allocation2 + $0xb8] sm:$0xff]  ;;  %v7384_v17 = vpop.f32.mrf.mxu2  ;;  %v3608_v50 = vmul.f32 %v7358_v35, %v3448_v40  ;;  %v8039_v40 = vld [vmem:[#allocation35_spill] sm:$0xff] }
 0x369   :  { %4680 = vmatmul.msk.f32.gmra.mxu0 %vm299_vm2, %v3606_v63 }
 0x36a   :  { %v4306_v53 = vadd.f32 %v7308_v60, %v4272_v37  ;;  %v3132_v41 = vpop.permute.xlu2 %3131  ;;  %4712 = vmatmul.msk.f32.gmra.mxu1 %vm299_vm2, %v4043_v5  ;;  %v3607_v5 = vmul.f32 %v7275_v9, %v3447_v8  ;;  %v3400_v9 = vadd.f32 %v7279_v44, %v2963_v39 }
 0x36b   :  { %v3177_v51 = vmul.f32 %v3132_v41, %v3017_v18  ;;  %v7394_v41 = vpop.f32.mrf.mxu3 }
 0x36c   :  { %v4338_v11 = vmax.f32 %v4306_v53, 0.0  ;;  %4625 = vmatmul.msk.f32.gmra.mxu2 %vm299_vm2, %v2741_v45  ;;  %v8033_v45 = vld [vmem:[#allocation21_spill] sm:$0xff] }
 0x36d   :  { %4656 = vmatmul.msk.f32.gmra.mxu3 %vm299_vm2, %v3177_v51  ;;  %v3748_v47 = vpop.f32.mrf.mxu0  ;;  %v2742_v53 = vmul.f32 %v8033_v45, %v2582_v15  ;;  %v3018_v51 = vld [vmem:[#allocation2 + $0xf7] sm:$0xff]  ;;  %v2583_v15 = vld [vmem:[#allocation2 + $0x101] sm:$0xff] }
 0x36e   :  { %4371 = vst.msk [vmem:[%s7761_s4 + $0x18] sm:$0xff] %vm4367_vm3, %v4338_v11  ;;  %v3836_v63 = vadd.f32 %v3748_v47, %v3399_v38  ;;  %v8034_v47 = vld [vmem:[#allocation33_spill] sm:$0xff] }
 0x36f   :  { %v4185_v37 = vpop.f32.mrf.mxu1  ;;  %v2527_v49 = vadd.f32 %v8035_v19, %v8034_v47  ;;  %v8036_v45 = vld [vmem:[#allocation65_spill] sm:$0xff]  ;;  %v3449_v19 = vld [vmem:[#allocation2 + $0xc8] sm:$0xff] }
 0x370   :  { %v4273_v16 = vadd.f32 %v4185_v37, %v3836_v63  ;;  %v3885_v63 = vld [vmem:[#allocation2 + $0xc1] sm:$0xff]  ;;  %v7410_v39 = vpop.f32.mrf.mxu2 }
 0x371   :  { %4681 = vmatmul.msk.f32.gmra.mxu0 %vm299_vm2, %v3607_v5  ;;  %v3990_v5 = vpop.permute.xlu1 %3989  ;;  %v2964_v44 = vadd.f32 %v7292_v28, %v2527_v49 }
 0x372   :  { %v3136_v18 = vpop.permute.xlu2 %3135  ;;  %4713 = vmatmul.msk.f32.gmra.mxu1 %vm299_vm2, %v4044_v42  ;;  %v4307_v11 = vadd.f32 %v7308_v60, %v4273_v16  ;;  %v4045_v42 = vmul.f32 %v7296_v26, %v3885_v63  ;;  %v8037_v26 = vld [vmem:[#allocation24_spill] sm:$0xff] }
 0x373   :  { %v3178_v38 = vmul.f32 %v3136_v18, %v3018_v51  ;;  %v3019_v18 = vld [vmem:[#allocation2 + $0xff] sm:$0xff]  ;;  %v3401_v28 = vadd.f32 %v7302_v12, %v2964_v44 }
 0x374   :  { %4626 = vmatmul.msk.f32.gmra.mxu2 %vm299_vm2, %v2742_v53  ;;  %v4339_v32 = vmax.f32 %v4307_v11, 0.0  ;;  %v2743_v53 = vmul.f32 %v8036_v45, %v2583_v15  ;;  %v8041_v15 = vld [vmem:[#allocation26_spill] sm:$0xff]  ;;  %v2584_v45 = vld [vmem:[#allocation2 + $0x109] sm:$0xff] }
 0x375   :  { %4657 = vmatmul.msk.f32.gmra.mxu3 %vm299_vm2, %v3178_v38  ;;  %v3751_v56 = vpop.f32.mrf.mxu0  ;;  %v7416_v38 = vpop.f32.mrf.mxu3 }
 0x376   :  { %v3837_v8 = vadd.f32 %v3751_v56, %v3400_v9  ;;  %4372 = vst.msk [vmem:[%s7761_s4 + $0x20] sm:$0xff] %vm4367_vm3, %v4339_v32  ;;  %v8038_v9 = vld [vmem:[#allocation36_spill] sm:$0xff] }
 0x377   :  { %v4188_v37 = vpop.f32.mrf.mxu1  ;;  %v1171_v32 = vadd.f32 %v8038_v9, %v8037_v26  ;;  %v3020_v26 = vld [vmem:[#allocation2 + $0x107] sm:$0xff] }
 0x378   :  { %v4274_v16 = vadd.f32 %v4188_v37, %v3837_v8  ;;  %v8040_v8 = vld [vmem:[#allocation76_spill] sm:$0xff]  ;;  %v3609_v37 = vmul.f32 %v3549_v7, %v3449_v19  ;;  %v7434_v7 = vpop.f32.mrf.mxu2 }
 0x379   :  { %4682 = vmatmul.msk.f32.gmra.mxu0 %vm299_vm2, %v3608_v50  ;;  %v2528_v63 = vadd.f32 %v8040_v8, %v8039_v40  ;;  %v3553_v50 = vpop.permute.xlu0 %3552  ;;  %v3450_v8 = vld [vmem:[#allocation2 + $0xd0] sm:$0xff] }
 0x37a   :  { %v3140_v35 = vpop.permute.xlu2 %3139  ;;  %4714 = vmatmul.msk.f32.gmra.mxu1 %vm299_vm2, %v4045_v42  ;;  %v4308_v51 = vadd.f32 %v7308_v60, %v4274_v16  ;;  %v3886_v42 = vld [vmem:[#allocation2 + $0xc9] sm:$0xff]  ;;  %v1655_v16 = vadd.f32 %v8041_v15, %v1171_v32  ;;  %v3887_v15 = vld [vmem:[#allocation2 + $0xd1] sm:$0xff] }
 0x37b   :  { %v3179_v11 = vmul.f32 %v3140_v35, %v3019_v18  ;;  %v4046_v12 = vmul.f32 %v7318_v57, %v3886_v42  ;;  %v3994_v35 = vpop.permute.xlu1 %3993  ;;  %v8043_v32 = vld [vmem:[#allocation8_spill] sm:$0xff] }
 0x37c   :  { %4627 = vmatmul.msk.f32.gmra.mxu2 %vm299_vm2, %v2743_v53  ;;  %v4340_v56 = vmax.f32 %v4308_v51, 0.0  ;;  %v2965_v53 = vadd.f32 %v7316_v36, %v2528_v63  ;;  %v8042_v51 = vld [vmem:[#allocation22_spill] sm:$0xff] }
 0x37d   :  { %4658 = vmatmul.msk.f32.gmra.mxu3 %vm299_vm2, %v3179_v11  ;;  %v3754_v47 = vpop.f32.mrf.mxu0  ;;  %v2744_v11 = vmul.f32 %v8042_v51, %v2584_v45  ;;  %v7444_v63 = vpop.f32.mrf.mxu3  ;;  %v8047_v51 = vld [vmem:[#allocation5_spill] sm:$0xff] }
 0x37e   :  { %v3838_v49 = vadd.f32 %v3754_v47, %v3401_v28  ;;  %4373 = vst.msk [vmem:[%s7761_s4 + $0x28] sm:$0xff] %vm4367_vm3, %v4340_v56  ;;  %v8044_v56 = vld [vmem:[#allocation3_spill] sm:$0xff]  ;;  %v3402_v40 = vadd.f32 %v7327_v61, %v2965_v53 }
 0x37f   :  { %v4191_v44 = vpop.f32.mrf.mxu1  ;;  %v1174_v36 = vadd.f32 %v8044_v56, %v8043_v32  ;;  %v8045_v47 = vld [vmem:[#allocation19_spill] sm:$0xff] }
 0x380   :  { %v4275_v18 = vadd.f32 %v4191_v44, %v3838_v49  ;;  %v2092_v19 = vadd.f32 %v8045_v47, %v1655_v16  ;;  %v3610_v44 = vmul.f32 %v3553_v50, %v3450_v8  ;;  %v4047_v16 = vmul.f32 %v3990_v5, %v3887_v15  ;;  %v7456_v56 = vpop.f32.mrf.mxu2  ;;  %v8048_v5 = vld [vmem:[#allocation31_spill] sm:$0xff]  ;;  %v8049_v47 = vld [vmem:[#allocation10_spill] sm:$0xff] }
 0x381   :  { %4683 = vmatmul.msk.f32.gmra.mxu0 %vm299_vm2, %v3609_v37  ;;  %v8046_v37 = vld [vmem:[#allocation80_spill] sm:$0xff]  ;;  %v3451_v8 = vld [vmem:[#allocation2 + $0xd8] sm:$0xff] }
 0x382   :  { %v3144_v28 = vpop.permute.xlu2 %3143  ;;  %4715 = vmatmul.msk.f32.gmra.mxu1 %vm299_vm2, %v4046_v12  ;;  %v4309_v57 = vadd.f32 %v7308_v60, %v4275_v18  ;;  %v2529_v12 = vadd.f32 %v8046_v37, %v2092_v19  ;;  %v1177_v19 = vadd.f32 %v8049_v47, %v8048_v5  ;;  %v8051_v37 = vld [vmem:[#allocation83_spill] sm:$0xff]  ;;  %v8055_v5 = vld [vmem:[#allocation20_spill] sm:$0xff] }
 0x383   :  { %v3180_v9 = vmul.f32 %v3144_v28, %v3020_v26  ;;  %v3561_v28 = vpop.permute.xlu0 %3560  ;;  %v3998_v50 = vpop.permute.xlu1 %3997  ;;  %v3888_v15 = vld [vmem:[#allocation2 + $0xd9] sm:$0xff] }
 0x384   :  { %4628 = vmatmul.msk.f32.gmra.mxu2 %vm299_vm2, %v2744_v11  ;;  %v4341_v49 = vmax.f32 %v4309_v57, 0.0  ;;  %v1656_v11 = vadd.f32 %v8047_v51, %v1174_v36  ;;  %v2966_v61 = vadd.f32 %v7339_v24, %v2529_v12  ;;  %v3021_v57 = vld [vmem:[#allocation2 + $0x10f] sm:$0xff]  ;;  %v8050_v36 = vld [vmem:[#allocation62_spill] sm:$0xff] }
 0x385   :  { %4659 = vmatmul.msk.f32.gmra.mxu3 %vm299_vm2, %v3180_v9 }
 0x386   :  { %v3757_v42 = vpop.f32.mrf.mxu0  ;;  %4374 = vst.msk [vmem:[%s7761_s4 + $0x30] sm:$0xff] %vm4367_vm3, %v4341_v49  ;;  %v2093_v49 = vadd.f32 %v8050_v36, %v1656_v11  ;;  %v3403_v24 = vadd.f32 %v7347_v48, %v2966_v61  ;;  %v8052_v11 = vld [vmem:[#allocation44_spill] sm:$0xff] }
 0x387   :  { %v3839_v45 = vadd.f32 %v3757_v42, %v3402_v40  ;;  %v4194_v18 = vpop.f32.mrf.mxu1 }
 0x388   :  { %v2530_v12 = vadd.f32 %v8051_v37, %v2093_v49  ;;  %v3889_v37 = vld [vmem:[#allocation2 + $0xe1] sm:$0xff] }
 0x389   :  { %v4276_v53 = vadd.f32 %v4194_v18, %v3839_v45  ;;  %4684 = vmatmul.msk.f32.gmra.mxu0 %vm299_vm2, %v3610_v44  ;;  %v3611_v44 = vmul.f32 %v7335_v4, %v3451_v8  ;;  %v4048_v18 = vmul.f32 %v3994_v35, %v3888_v15 }
 0x38a   :  { %v3148_v26 = vpop.permute.xlu2 %3147  ;;  %4716 = vmatmul.msk.f32.gmra.mxu1 %vm299_vm2, %v4047_v16  ;;  %v7469_v16 = vpop.f32.mrf.mxu3  ;;  %v2967_v48 = vadd.f32 %v7360_v10, %v2530_v12 }
 0x38b   :  { %v4310_v9 = vadd.f32 %v7308_v60, %v4276_v53  ;;  %v3181_v32 = vmul.f32 %v3148_v26, %v3021_v57  ;;  %v1657_v53 = vadd.f32 %v8052_v11, %v1177_v19  ;;  %v3565_v4 = vpop.permute.xlu0 %3564  ;;  %v8053_v57 = vld [vmem:[#allocation39_spill] sm:$0xff]  ;;  %v4002_v36 = vpop.permute.xlu1 %4001 }
 0x38c   :  { %v3404_v49 = vadd.f32 %v7373_v29, %v2967_v48  ;;  %v3452_v19 = vld [vmem:[#allocation2 + $0xe0] sm:$0xff] }
 0x38d   :  { %v4342_v40 = vmax.f32 %v4310_v9, 0.0  ;;  %4660 = vmatmul.msk.f32.gmra.mxu3 %vm299_vm2, %v3181_v32  ;;  %v8054_v9 = vld [vmem:[#allocation52_spill] sm:$0xff]  ;;  %v2094_v47 = vadd.f32 %v8055_v5, %v1657_v53  ;;  %v8058_v53 = vld [vmem:[#allocation11_spill] sm:$0xff] }
 0x38e   :  { %v3760_v42 = vpop.f32.mrf.mxu0  ;;  %v1180_v32 = vadd.f32 %v8054_v9, %v8053_v57  ;;  %v8059_v48 = vld [vmem:[#allocation67_spill] sm:$0xff]  ;;  %v3453_v5 = vld [vmem:[#allocation2 + $0xe8] sm:$0xff] }
 0x38f   :  { %4375 = vst.msk [vmem:[%s7761_s4 + $0x38] sm:$0xff] %vm4367_vm3, %v4342_v40  ;;  %v3840_v45 = vadd.f32 %v3760_v42, %v3403_v24  ;;  %v4197_v51 = vpop.f32.mrf.mxu1  ;;  %v7480_v40 = vpop.f32.mrf.mxu2  ;;  %v8056_v24 = vld [vmem:[#allocation87_spill] sm:$0xff]  ;;  %v3612_v42 = vmul.f32 %v3561_v28, %v3452_v19  ;;  %v3890_v19 = vld [vmem:[#allocation2 + $0xe9] sm:$0xff] }
 0x390   :  { %v2531_v8 = vadd.f32 %v8056_v24, %v2094_v47  ;;  %v8061_v47 = vld [vmem:[#allocation90_spill] sm:$0xff] }
 0x391   :  { %v4277_v61 = vadd.f32 %v4197_v51, %v3840_v45  ;;  %4685 = vmatmul.msk.f32.gmra.mxu0 %vm299_vm2, %v3611_v44  ;;  %v4049_v44 = vmul.f32 %v3998_v50, %v3889_v37  ;;  %v8057_v45 = vld [vmem:[#allocation43_spill] sm:$0xff] }
 0x392   :  { %4717 = vmatmul.msk.f32.gmra.mxu1 %vm299_vm2, %v4048_v18  ;;  %v1658_v18 = vadd.f32 %v8057_v45, %v1180_v32  ;;  %v2968_v29 = vadd.f32 %v7384_v17, %v2531_v8  ;;  %v7490_v11 = vpop.f32.mrf.mxu3  ;;  %v4050_v8 = vmul.f32 %v4002_v36, %v3890_v19  ;;  %v8065_v36 = vld [vmem:[#allocation75_spill] sm:$0xff] }
 0x393   :  { %v4311_v26 = vadd.f32 %v7308_v60, %v4277_v61  ;;  %v1183_v61 = vadd.f32 %v8059_v48, %v8058_v53  ;;  %v3569_v50 = vpop.permute.xlu0 %3568 }
 0x394   :  { %v3405_v32 = vadd.f32 %v7394_v41, %v2968_v29  ;;  %v8064_v29 = vld [vmem:[#allocation71_spill] sm:$0xff] }
 0x395   :  { %v4343_v35 = vmax.f32 %v4311_v26, 0.0  ;;  %v8060_v26 = vld [vmem:[#allocation70_spill] sm:$0xff] }
 0x396   :  { %v3763_v10 = vpop.f32.mrf.mxu0  ;;  %v2095_v57 = vadd.f32 %v8060_v26, %v1658_v18  ;;  %v8063_v18 = vld [vmem:[#allocation41_spill] sm:$0xff] }
 0x397   :  { %4376 = vst.msk [vmem:[%s7761_s4 + $0x40] sm:$0xff] %vm4367_vm3, %v4343_v35  ;;  %v3841_v12 = vadd.f32 %v3763_v10, %v3404_v49  ;;  %v4200_v15 = vpop.f32.mrf.mxu1  ;;  %v3613_v49 = vmul.f32 %v3565_v4, %v3453_v5  ;;  %v4006_v10 = vpop.permute.xlu1 %4005  ;;  %v3891_v5 = vld [vmem:[#allocation2 + $0xf1] sm:$0xff] }
 0x398   :  { %v2532_v35 = vadd.f32 %v8061_v47, %v2095_v57  ;;  %v4051_v47 = vmul.f32 %v4006_v10, %v3891_v5 }
 0x399   :  { %v4278_v51 = vadd.f32 %v4200_v15, %v3841_v12  ;;  %4686 = vmatmul.msk.f32.gmra.mxu0 %vm299_vm2, %v3612_v42  ;;  %v7503_v42 = vpop.f32.mrf.mxu2  ;;  %v8062_v12 = vld [vmem:[#allocation54_spill] sm:$0xff] }
 0x39a   :  { %4718 = vmatmul.msk.f32.gmra.mxu1 %vm299_vm2, %v4049_v44  ;;  %v1659_v44 = vadd.f32 %v8062_v12, %v1183_v61  ;;  %v2969_v41 = vadd.f32 %v7410_v39, %v2532_v35  ;;  %v7510_v45 = vpop.f32.mrf.mxu3  ;;  %v3454_v61 = vld [vmem:[#allocation2 + $0xf0] sm:$0xff]  ;;  %v8066_v39 = vld [vmem:[#allocation94_spill] sm:$0xff] }
 0x39b   :  { %v4312_v28 = vadd.f32 %v7308_v60, %v4278_v51  ;;  %v1186_v51 = vadd.f32 %v8064_v29, %v8063_v18  ;;  %v8068_v12 = vld [vmem:[#allocation14_spill] sm:$0xff] }
 0x39c   :  { %v3406_v48 = vadd.f32 %v7416_v38, %v2969_v41  ;;  %v3455_v29 = vld [vmem:[#allocation2 + $0xf8] sm:$0xff] }
 0x39d   :  { %v4344_v9 = vmax.f32 %v4312_v28, 0.0  ;;  %v2096_v28 = vadd.f32 %v8065_v36, %v1659_v44  ;;  %v8069_v44 = vld [vmem:[#allocation74_spill] sm:$0xff] }
 0x39e   :  { %v3766_v17 = vpop.f32.mrf.mxu0  ;;  %v1189_v41 = vadd.f32 %v8069_v44, %v8068_v12  ;;  %v8071_v36 = vld [vmem:[#allocation98_spill] sm:$0xff]  ;;  %v3456_v44 = vld [vmem:[#allocation2 + $0x100] sm:$0xff] }
 0x39f   :  { %4377 = vst.msk [vmem:[%s7761_s4 + $0x48] sm:$0xff] %vm4367_vm3, %v4344_v9  ;;  %v3842_v24 = vadd.f32 %v3766_v17, %v3405_v32  ;;  %v4203_v37 = vpop.f32.mrf.mxu1  ;;  %v2533_v57 = vadd.f32 %v8066_v39, %v2096_v28  ;;  %v3614_v9 = vmul.f32 %v3569_v50, %v3454_v61  ;;  %v3573_v32 = vpop.permute.xlu0 %3572 }
 0x3a0   :  { %v4010_v38 = vpop.permute.xlu1 %4009 }
 0x3a1   :  { %v4279_v15 = vadd.f32 %v4203_v37, %v3842_v24  ;;  %4687 = vmatmul.msk.f32.gmra.mxu0 %vm299_vm2, %v3613_v49  ;;  %v8067_v49 = vld [vmem:[#allocation61_spill] sm:$0xff]  ;;  %v2970_v24 = vadd.f32 %v7434_v7, %v2533_v57  ;;  %v7524_v37 = vpop.f32.mrf.mxu2  ;;  %v8072_v57 = vld [vmem:[#allocation56_spill] sm:$0xff] }
 0x3a2   :  { %4719 = vmatmul.msk.f32.gmra.mxu1 %vm299_vm2, %v4050_v8  ;;  %v1660_v19 = vadd.f32 %v8067_v49, %v1186_v51  ;;  %v7532_v7 = vpop.f32.mrf.mxu3  ;;  %v8073_v49 = vld [vmem:[#allocation17_spill] sm:$0xff] }
 0x3a3   :  { %v4313_v4 = vadd.f32 %v7308_v60, %v4279_v15  ;;  %v8070_v15 = vld [vmem:[#allocation79_spill] sm:$0xff]  ;;  %v3407_v18 = vadd.f32 %v7444_v63, %v2970_v24 }
 0x3a4   :  { %v2097_v10 = vadd.f32 %v8070_v15, %v1660_v19  ;;  %v8074_v19 = vld [vmem:[#allocation78_spill] sm:$0xff] }
 0x3a5   :  { %v4345_v53 = vmax.f32 %v4313_v4, 0.0  ;;  %v1192_v24 = vadd.f32 %v8074_v19, %v8073_v49  ;;  %v3457_v49 = vld [vmem:[#allocation2 + $0x108] sm:$0xff] }
 0x3a6   :  { %v3769_v26 = vpop.f32.mrf.mxu0  ;;  %v2534_v28 = vadd.f32 %v8071_v36, %v2097_v10 }
 0x3a7   :  { %4378 = vst.msk [vmem:[%s7761_s4 + $0x50] sm:$0xff] %vm4367_vm3, %v4345_v53  ;;  %v3843_v17 = vadd.f32 %v3769_v26, %v3406_v48  ;;  %v4206_v35 = vpop.f32.mrf.mxu1  ;;  %v3615_v53 = vmul.f32 %v3573_v32, %v3455_v29  ;;  %v3892_v48 = vld [vmem:[#allocation2 + $0xf9] sm:$0xff]  ;;  %v3577_v5 = vpop.permute.xlu0 %3576 }
 0x3a8   :  { %v4052_v26 = vmul.f32 %v4010_v38, %v3892_v48  ;;  %v2971_v63 = vadd.f32 %v7456_v56, %v2534_v28  ;;  %v4014_v32 = vpop.permute.xlu1 %4013  ;;  %v8075_v38 = vld [vmem:[#allocation84_spill] sm:$0xff]  ;;  %v3616_v10 = vmul.f32 %v3577_v5, %v3456_v44 }
 0x3a9   :  { %v4280_v8 = vadd.f32 %v4206_v35, %v3843_v17  ;;  %4688 = vmatmul.msk.f32.gmra.mxu0 %vm299_vm2, %v3614_v9  ;;  %v1661_v9 = vadd.f32 %v8072_v57, %v1189_v41  ;;  %v7544_v35 = vpop.f32.mrf.mxu2  ;;  %v8076_v41 = vld [vmem:[#allocation101_spill] sm:$0xff]  ;;  %v8077_v28 = vld [vmem:[#allocation64_spill] sm:$0xff] }
 0x3aa   :  { %4720 = vmatmul.msk.f32.gmra.mxu1 %vm299_vm2, %v4051_v47  ;;  %v3408_v12 = vadd.f32 %v7469_v16, %v2971_v63  ;;  %v7555_v29 = vpop.f32.mrf.mxu3  ;;  %v8079_v57 = vld [vmem:[#allocation81_spill] sm:$0xff]  ;;  %v8080_v5 = vld [vmem:[#allocation88_spill] sm:$0xff] }
 0x3ab   :  { %v4314_v50 = vadd.f32 %v7308_v60, %v4280_v8  ;;  %v2098_v8 = vadd.f32 %v8075_v38, %v1661_v9 }
 0x3ad   :  { %v4346_v4 = vmax.f32 %v4314_v50, 0.0  ;;  %v2535_v15 = vadd.f32 %v8076_v41, %v2098_v8  ;;  %v3894_v8 = vld [vmem:[#allocation2 + $0x109] sm:$0xff] }
 0x3ae   :  { %v3772_v51 = vpop.f32.mrf.mxu0 }
 0x3af   :  { %4379 = vst.msk [vmem:[%s7761_s4 + $0x58] sm:$0xff] %vm4367_vm3, %v4346_v4  ;;  %v3844_v61 = vadd.f32 %v3772_v51, %v3407_v18  ;;  %v4209_v39 = vpop.f32.mrf.mxu1  ;;  %v3893_v4 = vld [vmem:[#allocation2 + $0x101] sm:$0xff]  ;;  %v2972_v16 = vadd.f32 %v7480_v40, %v2535_v15 }
 0x3b0   :  { %v4053_v51 = vmul.f32 %v4014_v32, %v3893_v4  ;;  %v3585_v4 = vpop.permute.xlu2 %3584 }
 0x3b1   :  { %v4281_v17 = vadd.f32 %v4209_v39, %v3844_v61  ;;  %4689 = vmatmul.msk.f32.gmra.mxu0 %vm299_vm2, %v3615_v53  ;;  %v1662_v53 = vadd.f32 %v8077_v28, %v1192_v24  ;;  %v3581_v61 = vpop.permute.xlu0 %3580  ;;  %v8078_v39 = vld [vmem:[#allocation37_spill] sm:$0xff]  ;;  %v7566_v19 = vpop.f32.mrf.mxu2 }
 0x3b2   :  { %4721 = vmatmul.msk.f32.gmra.mxu1 %vm299_vm2, %v4052_v26  ;;  %v1195_v9 = vadd.f32 %v8079_v57, %v8078_v39  ;;  %v3617_v38 = vmul.f32 %v3581_v61, %v3457_v49  ;;  %v8082_v28 = vld [vmem:[#allocation93_spill] sm:$0xff] }
 0x3b3   :  { %v4315_v47 = vadd.f32 %v7308_v60, %v4281_v17  ;;  %v2099_v63 = vadd.f32 %v8080_v5, %v1662_v53  ;;  %v4018_v17 = vpop.permute.xlu1 %4017 }
 0x3b5   :  { %v4347_v50 = vmax.f32 %v4315_v47, 0.0  ;;  %v3409_v47 = vadd.f32 %v7490_v11, %v2972_v16  ;;  %v2536_v24 = vadd.f32 %v6979_v52, %v2099_v63  ;;  %v3458_v52 = vld [vmem:[#allocation2 + $0x110] sm:$0xff]  ;;  %v8083_v16 = vld [vmem:[#allocation40_spill] sm:$0xff] }
 0x3b6   :  { %v3775_v56 = vpop.f32.mrf.mxu0  ;;  %v3618_v39 = vmul.f32 %v3585_v4, %v3458_v52  ;;  %v8089_v4 = vld [vmem:[#allocation77_spill] sm:$0xff] }
 0x3b7   :  { %4380 = vst.msk [vmem:[%s7761_s4 + $0x60] sm:$0xff] %vm4367_vm3, %v4347_v50  ;;  %v3845_v18 = vadd.f32 %v3775_v56, %v3408_v12  ;;  %v4212_v36 = vpop.f32.mrf.mxu1  ;;  %v8081_v12 = vld [vmem:[#allocation68_spill] sm:$0xff]  ;;  %v4054_v56 = vmul.f32 %v4018_v17, %v3894_v8  ;;  %v2973_v11 = vadd.f32 %v7503_v42, %v2536_v24  ;;  %v8087_v8 = vld [vmem:[#allocation89_spill] sm:$0xff] }
 0x3b8   :  { %v1663_v44 = vadd.f32 %v8081_v12, %v1195_v9  ;;  %v8088_v12 = vld [vmem:[#allocation97_spill] sm:$0xff] }
 0x3b9   :  { %v4282_v48 = vadd.f32 %v4212_v36, %v3845_v18  ;;  %4690 = vmatmul.msk.f32.gmra.mxu0 %vm299_vm2, %v3616_v10  ;;  %v3353_v10 = vpop.f32.mrf.mxu3  ;;  %v4022_v36 = vpop.permute.xlu0 %4021  ;;  %v3410_v42 = vadd.f32 %v7510_v45, %v2973_v11 }
 0x3ba   :  { %4722 = vmatmul.msk.f32.gmra.mxu1 %vm299_vm2, %v4053_v51  ;;  %v3895_v51 = vld [vmem:[#allocation2 + $0x111] sm:$0xff]  ;;  %v2100_v53 = vadd.f32 %v8082_v28, %v1663_v44  ;;  %v2919_v17 = vpop.f32.mrf.mxu2 }
 0x3bb   :  { %v4316_v26 = vadd.f32 %v7308_v60, %v4282_v48  ;;  %v8084_v48 = vld [vmem:[#allocation85_spill] sm:$0xff]  ;;  %v4055_v9 = vmul.f32 %v4022_v36, %v3895_v51 }
 0x3bc   :  { %v1198_v61 = vadd.f32 %v8084_v48, %v8083_v16  ;;  %v2537_v5 = vadd.f32 %v6998_v46, %v2100_v53  ;;  %v8090_v16 = vld [vmem:[#allocation45_spill] sm:$0xff] }
 0x3bd   :  { %v4348_v32 = vmax.f32 %v4316_v26, 0.0 }
 0x3be   :  { %v3778_v40 = vpop.f32.mrf.mxu0 }
 0x3bf   :  { %4381 = vst.msk [vmem:[%s7761_s4 + $0x68] sm:$0xff] %vm4367_vm3, %v4348_v32  ;;  %v3846_v50 = vadd.f32 %v3778_v40, %v3409_v47  ;;  %v4215_v41 = vpop.f32.mrf.mxu1  ;;  %v8085_v47 = vld [vmem:[#allocation23_spill] sm:$0xff]  ;;  %v2974_v40 = vadd.f32 %v7524_v37, %v2537_v5 }
 0x3c0   :  { %v1664_v49 = vadd.f32 %v8085_v47, %v1198_v61  ;;  %v8092_v61 = vld [vmem:[#allocation102_spill] sm:$0xff] }
 0x3c1   :  { %v4283_v15 = vadd.f32 %v4215_v41, %v3846_v50  ;;  %4691 = vmatmul.msk.f32.gmra.mxu0 %vm299_vm2, %v3617_v38  ;;  %v3356_v46 = vpop.f32.mrf.mxu3  ;;  %v8086_v38 = vld [vmem:[#allocation42_spill] sm:$0xff]  ;;  %v3411_v41 = vadd.f32 %v7532_v7, %v2974_v40  ;;  %v8091_v7 = vld [vmem:[#allocation92_spill] sm:$0xff] }
 0x3c2   :  { %4723 = vmatmul.msk.f32.gmra.mxu1 %vm299_vm2, %v4054_v56  ;;  %v1201_v50 = vadd.f32 %v8087_v8, %v8086_v38  ;;  %v2101_v44 = vadd.f32 %v8088_v12, %v1664_v49  ;;  %v2922_v28 = vpop.f32.mrf.mxu2  ;;  %v1204_v48 = vadd.f32 %v8091_v7, %v8090_v16 }
 0x3c3   :  { %v4317_v18 = vadd.f32 %v7308_v60, %v4283_v15 }
 0x3c4   :  { %v2538_v15 = vadd.f32 %v7018_v14, %v2101_v44 }
 0x3c5   :  { %v4349_v26 = vmax.f32 %v4317_v18, 0.0  ;;  %v1665_v18 = vadd.f32 %v8089_v4, %v1201_v50 }
 0x3c6   :  { %v3781_v57 = vpop.f32.mrf.mxu0  ;;  %v2975_v51 = vadd.f32 %v7544_v35, %v2538_v15 }
 0x3c7   :  { %4382 = vst.msk [vmem:[%s7761_s4 + $0x70] sm:$0xff] %vm4367_vm3, %v4349_v26  ;;  %v3847_v63 = vadd.f32 %v3781_v57, %v3410_v42  ;;  %v4218_v32 = vpop.f32.mrf.mxu1  ;;  %v2102_v14 = vadd.f32 %v8092_v61, %v1665_v18  ;;  %v8098_v18 = vld [vmem:[#allocation99_spill] sm:$0xff] }
 0x3c9   :  { %v4284_v24 = vadd.f32 %v4218_v32, %v3847_v63  ;;  %4692 = vmatmul.msk.f32.gmra.mxu0 %vm299_vm2, %v3618_v39  ;;  %v3412_v39 = vadd.f32 %v7555_v29, %v2975_v51  ;;  %v3359_v42 = vpop.f32.mrf.mxu3  ;;  %v8093_v63 = vld [vmem:[#allocation82_spill] sm:$0xff]  ;;  %v8094_v29 = vld [vmem:[#allocation48_spill] sm:$0xff]  ;;  %v8099_v51 = vld [vmem:[#allocation109_spill] sm:$0xff] }
 0x3ca   :  { %4724 = vmatmul.msk.f32.gmra.mxu1 %vm299_vm2, %v4055_v9  ;;  %v2539_v9 = vadd.f32 %v7037_v1, %v2102_v14  ;;  %v1666_v32 = vadd.f32 %v8093_v63, %v1204_v48  ;;  %v8100_v14 = vld [vmem:[#allocation91_spill] sm:$0xff] }
 0x3cb   :  { %v4318_v45 = vadd.f32 %v7308_v60, %v4284_v24  ;;  %v2925_v24 = vpop.f32.mrf.mxu2 }
 0x3cc   :  { %v2976_v47 = vadd.f32 %v7566_v19, %v2539_v9  ;;  %v2103_v1 = vadd.f32 %v6986_v22, %v1666_v32  ;;  %v8097_v22 = vld [vmem:[#allocation51_spill] sm:$0xff] }
 0x3cd   :  { %v4350_v56 = vmax.f32 %v4318_v45, 0.0  ;;  %v8095_v45 = vld [vmem:[#allocation96_spill] sm:$0xff] }
 0x3ce   :  { %v3784_v11 = vpop.f32.mrf.mxu0  ;;  %v1207_v38 = vadd.f32 %v8095_v45, %v8094_v29  ;;  %v3413_v50 = vadd.f32 %v3353_v10, %v2976_v47  ;;  %v2540_v44 = vadd.f32 %v7057_v25, %v2103_v1  ;;  %v1210_v10 = vadd.f32 %v8098_v18, %v8097_v22 }
 0x3cf   :  { %4383 = vst.msk [vmem:[%s7761_s4 + $0x78] sm:$0xff] %vm4367_vm3, %v4350_v56  ;;  %v3848_v37 = vadd.f32 %v3784_v11, %v3411_v41  ;;  %v4221_v52 = vpop.f32.mrf.mxu1  ;;  %v8096_v11 = vld [vmem:[#allocation86_spill] sm:$0xff] }
 0x3d0   :  { %v1667_v15 = vadd.f32 %v8096_v11, %v1207_v38  ;;  %v8103_v38 = vld [vmem:[#allocation95_spill] sm:$0xff] }
 0x3d1   :  { %v4285_v36 = vadd.f32 %v4221_v52, %v3848_v37  ;;  %v3362_v56 = vpop.f32.mrf.mxu3  ;;  %v2977_v37 = vadd.f32 %v2919_v17, %v2540_v44  ;;  %v8104_v44 = vld [vmem:[#allocation55_spill] sm:$0xff] }
 0x3d3   :  { %v4319_v53 = vadd.f32 %v7308_v60, %v4285_v36  ;;  %v2104_v36 = vadd.f32 %v8099_v51, %v1667_v15  ;;  %v2928_v16 = vpop.f32.mrf.mxu2 }
 0x3d5   :  { %v4351_v26 = vmax.f32 %v4319_v53, 0.0  ;;  %v3414_v53 = vadd.f32 %v3356_v46, %v2977_v37  ;;  %v2541_v48 = vadd.f32 %v7075_v30, %v2104_v36  ;;  %v8102_v46 = vld [vmem:[#allocation103_spill] sm:$0xff] }
 0x3d6   :  { %v3787_v57 = vpop.f32.mrf.mxu0 }
 0x3d7   :  { %4384 = vst.msk [vmem:[%s7761_s4 + $0x80] sm:$0xff] %vm4367_vm3, %v4351_v26  ;;  %v3849_v35 = vadd.f32 %v3787_v57, %v3412_v39  ;;  %v4224_v5 = vpop.f32.mrf.mxu1  ;;  %v1668_v26 = vadd.f32 %v8100_v14, %v1210_v10  ;;  %v2978_v39 = vadd.f32 %v2922_v28, %v2541_v48 }
 0x3d9   :  { %v4286_v49 = vadd.f32 %v4224_v5, %v3849_v35  ;;  %v3365_v9 = vpop.f32.mrf.mxu3  ;;  %v8101_v5 = vld [vmem:[#allocation53_spill] sm:$0xff]  ;;  %v2105_v32 = vadd.f32 %v7034_v55, %v1668_v26  ;;  %v3415_v47 = vadd.f32 %v3359_v42, %v2978_v39  ;;  %v8105_v42 = vld [vmem:[#allocation106_spill] sm:$0xff] }
 0x3da   :  { %v1213_v63 = vadd.f32 %v8102_v46, %v8101_v5  ;;  %v8109_v26 = vld [vmem:[#allocation105_spill] sm:$0xff]  ;;  %v8110_v46 = vld [vmem:[#allocation60_spill] sm:$0xff] }
 0x3db   :  { %v4320_v40 = vadd.f32 %v7308_v60, %v4286_v49  ;;  %v2931_v29 = vpop.f32.mrf.mxu2 }
 0x3dc   :  { %v1669_v1 = vadd.f32 %v8103_v38, %v1213_v63 }
 0x3dd   :  { %v4352_v8 = vmax.f32 %v4320_v40, 0.0  ;;  %v2542_v40 = vadd.f32 %v7093_v54, %v2105_v32 }
 0x3de   :  { %v3790_v12 = vpop.f32.mrf.mxu0  ;;  %v2106_v54 = vadd.f32 %v7060_v58, %v1669_v1  ;;  %v8107_v58 = vld [vmem:[#allocation57_spill] sm:$0xff] }
 0x3df   :  { %4385 = vst.msk [vmem:[%s7761_s4 + $0x88] sm:$0xff] %vm4367_vm3, %v4352_v8  ;;  %v3850_v19 = vadd.f32 %v3790_v12, %v3413_v50  ;;  %v4227_v41 = vpop.f32.mrf.mxu1  ;;  %v2979_v8 = vadd.f32 %v2925_v24, %v2542_v40 }
 0x3e0   :  { %v2543_v37 = vadd.f32 %v7113_v6, %v2106_v54 }
 0x3e1   :  { %v4287_v52 = vadd.f32 %v4227_v41, %v3850_v19  ;;  %v3368_v55 = vpop.f32.mrf.mxu3  ;;  %v1216_v19 = vadd.f32 %v8105_v42, %v8104_v44  ;;  %v3416_v11 = vadd.f32 %v3362_v56, %v2979_v8 }
 0x3e2   :  { %v2980_v18 = vadd.f32 %v2928_v16, %v2543_v37 }
 0x3e3   :  { %v4321_v4 = vadd.f32 %v7308_v60, %v4287_v52  ;;  %v2934_v51 = vpop.f32.mrf.mxu2 }
 0x3e5   :  { %v4353_v25 = vmax.f32 %v4321_v4, 0.0  ;;  %v8106_v4 = vld [vmem:[#allocation100_spill] sm:$0xff] }
 0x3e6   :  { %v3793_v7 = vpop.f32.mrf.mxu0  ;;  %v1670_v22 = vadd.f32 %v8106_v4, %v1216_v19 }
 0x3e7   :  { %4386 = vst.msk [vmem:[%s7761_s4 + $0x90] sm:$0xff] %vm4367_vm3, %v4353_v25  ;;  %v3851_v17 = vadd.f32 %v3793_v7, %v3414_v53  ;;  %v4230_v61 = vpop.f32.mrf.mxu1  ;;  %v8108_v25 = vld [vmem:[#allocation108_spill] sm:$0xff]  ;;  %v3417_v7 = vadd.f32 %v3365_v9, %v2980_v18  ;;  %v1222_v9 = vadd.f32 %v7026_v27, %v8110_v46 }
 0x3e8   :  { %v1219_v56 = vadd.f32 %v8108_v25, %v8107_v58  ;;  %v2107_v53 = vadd.f32 %v7084_v20, %v1670_v22 }
 0x3e9   :  { %v4288_v57 = vadd.f32 %v4230_v61, %v3851_v17  ;;  %v3371_v48 = vpop.f32.mrf.mxu3 }
 0x3ea   :  { %v2544_v61 = vadd.f32 %v7139_v13, %v2107_v53  ;;  %v1671_v39 = vadd.f32 %v8109_v26, %v1219_v56  ;;  %v8115_v56 = vld [vmem:[#allocation111_spill] sm:$0xff] }
 0x3eb   :  { %v4322_v35 = vadd.f32 %v7308_v60, %v4288_v57  ;;  %v2937_v20 = vpop.f32.mrf.mxu2 }
 0x3ec   :  { %v2981_v57 = vadd.f32 %v2931_v29, %v2544_v61  ;;  %v2108_v63 = vadd.f32 %v7109_v59, %v1671_v39  ;;  %v8111_v29 = vld [vmem:[#allocation107_spill] sm:$0xff]  ;;  %v8116_v61 = vld [vmem:[#allocation9_spill] sm:$0xff] }
 0x3ed   :  { %v4354_v30 = vmax.f32 %v4322_v35, 0.0 }
 0x3ee   :  { %v3796_v49 = vpop.f32.mrf.mxu0  ;;  %v3418_v32 = vadd.f32 %v3368_v55, %v2981_v57  ;;  %v8112_v55 = vld [vmem:[#allocation34_spill] sm:$0xff] }
 0x3ef   :  { %4387 = vst.msk [vmem:[%s7761_s4 + $0x98] sm:$0xff] %vm4367_vm3, %v4354_v30  ;;  %v3852_v28 = vadd.f32 %v3796_v49, %v3415_v47  ;;  %v4233_v45 = vpop.f32.mrf.mxu1  ;;  %v2545_v47 = vadd.f32 %v7159_v21, %v2108_v63  ;;  %v1225_v44 = vadd.f32 %v7044_v33, %v8112_v55  ;;  %v8114_v33 = vld [vmem:[#allocation29_spill] sm:$0xff] }
 0x3f1   :  { %v4289_v50 = vadd.f32 %v4233_v45, %v3852_v28  ;;  %v3374_v40 = vpop.f32.mrf.mxu3  ;;  %v1672_v45 = vadd.f32 %v8111_v29, %v1222_v9  ;;  %v2982_v38 = vadd.f32 %v2934_v51, %v2545_v47  ;;  %v8121_v29 = vld [vmem:[#allocation121_spill] sm:$0xff] }
 0x3f3   :  { %v4323_v12 = vadd.f32 %v7308_v60, %v4289_v50  ;;  %v2109_v59 = vadd.f32 %v7135_v62, %v1672_v45  ;;  %v3419_v50 = vadd.f32 %v3371_v48, %v2982_v38  ;;  %v8113_v62 = vld [vmem:[#allocation110_spill] sm:$0xff] }
 0x3f4   :  { %v1673_v37 = vadd.f32 %v8113_v62, %v1225_v44 }
 0x3f5   :  { %v4355_v41 = vmax.f32 %v4323_v12, 0.0  ;;  %v2940_v12 = vpop.f32.mrf.mxu2  ;;  %v2546_v42 = vadd.f32 %v7175_v34, %v2109_v59  ;;  %v1228_v34 = vadd.f32 %v7065_v2, %v8114_v33  ;;  %v7698_v2 = vld [vmem:[%s7759_s3 + $0x1] ss:$0 sm:$0xff] }
 0x3f6   :  { %v3799_v15 = vpop.f32.mrf.mxu0  ;;  %v2110_v18 = vadd.f32 %v7162_v31, %v1673_v37  ;;  %v8126_v37 = vld [vmem:[#allocation122_spill] sm:$0xff] }
 0x3f7   :  { %4388 = vst.msk [vmem:[%s7761_s4 + $0xa0] sm:$0xff] %vm4367_vm3, %v4355_v41  ;;  %v3853_v24 = vadd.f32 %v3799_v15, %v3416_v11  ;;  %v4236_v52 = vpop.f32.mrf.mxu1  ;;  %v2983_v11 = vadd.f32 %v2937_v20, %v2546_v42  ;;  %v1674_v53 = vadd.f32 %v8115_v56, %v1228_v34  ;;  %v8123_v42 = vld [vmem:[#allocation25_spill] sm:$0xff]  ;;  %v8130_v56 = vld [vmem:[#allocation123_spill] sm:$0xff] }
 0x3f8   :  { %v2547_v58 = vadd.f32 %v7194_v0, %v2110_v18 }
 0x3f9   :  { %v4290_v10 = vadd.f32 %v4236_v52, %v3853_v24  ;;  %v3377_v54 = vpop.f32.mrf.mxu3  ;;  %v3420_v4 = vadd.f32 %v3374_v40, %v2983_v11  ;;  %v2111_v0 = vadd.f32 %v7182_v43, %v1674_v53 }
 0x3fb   :  { %v4324_v36 = vadd.f32 %v7308_v60, %v4290_v10  ;;  %v2548_v39 = vadd.f32 %v7214_v23, %v2111_v0 }
 0x3fd   :  { %v4356_v6 = vmax.f32 %v4324_v36, 0.0  ;;  %v2943_v51 = vpop.f32.mrf.mxu2 }
 0x3fe   :  { %v3802_v17 = vpop.f32.mrf.mxu0  ;;  %v2985_v46 = vadd.f32 %v2943_v51, %v2548_v39 }
 0x3ff   :  { %4389 = vst.msk [vmem:[%s7761_s4 + $0xa8] sm:$0xff] %vm4367_vm3, %v4356_v6  ;;  %v3854_v16 = vadd.f32 %v3802_v17, %v3417_v7  ;;  %v4239_v14 = vpop.f32.mrf.mxu1  ;;  %v2984_v6 = vadd.f32 %v2940_v12, %v2547_v58  ;;  %v8128_v58 = vld [vmem:[#allocation28_spill] sm:$0xff] }
 0x401   :  { %v4291_v35 = vadd.f32 %v4239_v14, %v3854_v16  ;;  %v3421_v7 = vadd.f32 %v3377_v54, %v2984_v6  ;;  %v1231_v16 = vadd.f32 %v7087_v3, %v8116_v61 }
 0x403   :  { %v4325_v5 = vadd.f32 %v7308_v60, %v4291_v35 }
 0x405   :  { %v4357_v13 = vmax.f32 %v4325_v5, 0.0  ;;  %v2946_v35 = vpop.f32.mrf.mxu2  ;;  %v8117_v5 = vld [vmem:[#allocation112_spill] sm:$0xff] }
 0x406   :  { %v3805_v30 = vpop.f32.mrf.mxu0  ;;  %v1675_v20 = vadd.f32 %v8117_v5, %v1231_v16  ;;  %v8132_v16 = vld [vmem:[#allocation118_spill] sm:$0xff]  ;;  %v8133_v5 = vld [vmem:[#allocation59_spill] sm:$0xff] }
 0x407   :  { %4390 = vst.msk [vmem:[%s7761_s4 + $0xb0] sm:$0xff] %vm4367_vm3, %v4357_v13  ;;  %v3855_v49 = vadd.f32 %v3805_v30, %v3418_v32  ;;  %v4242_v28 = vpop.f32.mrf.mxu1  ;;  %v8118_v32 = vld [vmem:[#allocation38_spill] sm:$0xff] }
 0x408   :  { %v8119_v30 = vld [vmem:[#allocation114_spill] sm:$0xff] }
 0x409   :  { %v4292_v1 = vadd.f32 %v4242_v28, %v3855_v49  ;;  %v1234_v47 = vadd.f32 %v8119_v30, %v8118_v32  ;;  %v8120_v49 = vld [vmem:[#allocation119_spill] sm:$0xff] }
 0x40a   :  { %v2112_v40 = vadd.f32 %v8120_v49, %v1675_v20 }
 0x40b   :  { %v4326_v27 = vadd.f32 %v7308_v60, %v4292_v1  ;;  %v8122_v1 = vld [vmem:[#allocation113_spill] sm:$0xff] }
 0x40c   :  { %v2549_v45 = vadd.f32 %v8121_v29, %v2112_v40 }
 0x40d   :  { %v4358_v8 = vmax.f32 %v4326_v27, 0.0  ;;  %v1676_v27 = vadd.f32 %v8122_v1, %v1234_v47 }
 0x40e   :  { %v3808_v21 = vpop.f32.mrf.mxu0  ;;  %v2986_v59 = vadd.f32 %v2946_v35, %v2549_v45 }
 0x40f   :  { %4391 = vst.msk [vmem:[%s7761_s4 + $0xb8] sm:$0xff] %vm4367_vm3, %v4358_v8  ;;  %v3856_v19 = vadd.f32 %v3808_v21, %v3419_v50  ;;  %v4245_v41 = vpop.f32.mrf.mxu1  ;;  %v2949_v50 = vpop.f32.mrf.mxu2 }
 0x411   :  { %v4293_v15 = vadd.f32 %v4245_v41, %v3856_v19  ;;  %v8124_v19 = vld [vmem:[#allocation116_spill] sm:$0xff] }
 0x412   :  { %v1237_v54 = vadd.f32 %v8124_v19, %v8123_v42  ;;  %v8125_v41 = vld [vmem:[#allocation120_spill] sm:$0xff] }
 0x413   :  { %v4327_v24 = vadd.f32 %v7308_v60, %v4293_v15  ;;  %v3380_v60 = vpop.f32.mrf.mxu3  ;;  %v2113_v11 = vadd.f32 %v8125_v41, %v1676_v27 }
 0x414   :  { %v3422_v3 = vadd.f32 %v3380_v60, %v2985_v46 }
 0x415   :  { %v4359_v52 = vmax.f32 %v4327_v24, 0.0  ;;  %v2550_v24 = vadd.f32 %v8126_v37, %v2113_v11 }
 0x416   :  { %v3811_v22 = vpop.f32.mrf.mxu0 }
 0x417   :  { %4392 = vst.msk [vmem:[%s7761_s4 + $0xc0] sm:$0xff] %vm4367_vm3, %v4359_v52  ;;  %v3857_v10 = vadd.f32 %v3811_v22, %v3420_v4  ;;  %v4248_v36 = vpop.f32.mrf.mxu1  ;;  %v8127_v4 = vld [vmem:[#allocation115_spill] sm:$0xff]  ;;  %v2987_v33 = vadd.f32 %v2949_v50, %v2550_v24  ;;  %v2952_v51 = vpop.f32.mrf.mxu2 }
 0x418   :  { %v1677_v22 = vadd.f32 %v8127_v4, %v1237_v54 }
 0x419   :  { %v4294_v25 = vadd.f32 %v4248_v36, %v3857_v10 }
 0x41a   :  { %v2114_v53 = vadd.f32 %v8130_v56, %v1677_v22 }
 0x41b   :  { %v4328_v31 = vadd.f32 %v7698_v2, %v4294_v25  ;;  %v3383_v63 = vpop.f32.mrf.mxu3  ;;  %v8129_v25 = vld [vmem:[#allocation117_spill] sm:$0xff] }
 0x41c   :  { %v3423_v12 = vadd.f32 %v3383_v63, %v2986_v59  ;;  %v1240_v60 = vadd.f32 %v8129_v25, %v8128_v58 }
 0x41d   :  { %v4360_v48 = vmax.f32 %v4328_v31, 0.0 }
 0x41e   :  { %v3814_v17 = vpop.f32.mrf.mxu0  ;;  %v1678_v0 = vadd.f32 %v8132_v16, %v1240_v60 }
 0x41f   :  { %4393 = vst.msk [vmem:[%s7761_s4 + $0xc8] sm:$0xff] %vm4367_vm3, %v4360_v48  ;;  %v3858_v14 = vadd.f32 %v3814_v17, %v3421_v7  ;;  %v4251_v26 = vpop.f32.mrf.mxu1  ;;  %v8131_v48 = vld [vmem:[#allocation47_spill] sm:$0xff] }
 0x420   :  { %v2551_v17 = vadd.f32 %v8131_v48, %v2114_v53  ;;  %v2115_v20 = vadd.f32 %v8133_v5, %v1678_v0 }
 0x421   :  { %v4295_v57 = vadd.f32 %v4251_v26, %v3858_v14 }
 0x422   :  { %v2988_v14 = vadd.f32 %v2952_v51, %v2551_v17 }
 0x423   :  { %v4329_v9 = vadd.f32 %v7698_v2, %v4295_v57  ;;  %v3386_v55 = vpop.f32.mrf.mxu3 }
 0x424   :  { %v3424_v18 = vadd.f32 %v3386_v55, %v2987_v33 }
 0x425   :  { %v4361_v13 = vmax.f32 %v4329_v9, 0.0  ;;  %v2955_v9 = vpop.f32.mrf.mxu2 }
 0x426   :  { %v3817_v43 = vpop.f32.mrf.mxu0 }
 0x427   :  { %4394 = vst.msk [vmem:[%s7761_s4 + $0xd0] sm:$0xff] %vm4367_vm3, %v4361_v13  ;;  %v3859_v23 = vadd.f32 %v3817_v43, %v3422_v3  ;;  %v4254_v28 = vpop.f32.mrf.mxu1  ;;  %v8134_v3 = vld [vmem:[#allocation58_spill] sm:$0xff] }
 0x428   :  { %v2552_v13 = vadd.f32 %v8134_v3, %v2115_v20 }
 0x429   :  { %v4296_v38 = vadd.f32 %v4254_v28, %v3859_v23 }
 0x42a   :  { %v2989_v30 = vadd.f32 %v2955_v9, %v2552_v13 }
 0x42b   :  { %v4330_v8 = vadd.f32 %v7698_v2, %v4296_v38  ;;  %v3389_v31 = vpop.f32.mrf.mxu3 }
 0x42c   :  { %v3425_v39 = vadd.f32 %v3389_v31, %v2988_v14 }
 0x42d   :  { %v4362_v21 = vmax.f32 %v4330_v8, 0.0 }
 0x42e   :  { %v3820_v44 = vpop.f32.mrf.mxu0 }
 0x42f   :  { %4395 = vst.msk [vmem:[%s7761_s4 + $0xd8] sm:$0xff] %vm4367_vm3, %v4362_v21  ;;  %v3860_v15 = vadd.f32 %v3820_v44, %v3423_v12  ;;  %v4257_v62 = vpop.f32.mrf.mxu1 }
 0x431   :  { %v4297_v52 = vadd.f32 %v4257_v62, %v3860_v15 }
 0x433   :  { %v4331_v34 = vadd.f32 %v7698_v2, %v4297_v52  ;;  %v3392_v32 = vpop.f32.mrf.mxu3 }
 0x434   :  { %v3426_v49 = vadd.f32 %v3392_v32, %v2989_v30 }
 0x435   :  { %v4363_v10 = vmax.f32 %v4331_v34, 0.0 }
 0x436   :  { %v3823_v36 = vpop.f32.mrf.mxu0 }
 0x437   :  { %4396 = vst.msk [vmem:[%s7761_s4 + $0xe0] sm:$0xff] %vm4367_vm3, %v4363_v10  ;;  %v3861_v6 = vadd.f32 %v3823_v36, %v3424_v18  ;;  %v4260_v7 = vpop.f32.mrf.mxu1 }
 0x439   :  { %v4298_v61 = vadd.f32 %v4260_v7, %v3861_v6 }
 0x43b   :  { %v4332_v26 = vadd.f32 %v7698_v2, %v4298_v61 }
 0x43d   :  { %v4364_v57 = vmax.f32 %v4332_v26, 0.0 }
 0x43e   :  { %v3826_v35 = vpop.f32.mrf.mxu0 }
 0x43f   :  { %4397 = vst.msk [vmem:[%s7761_s4 + $0xe8] sm:$0xff] %vm4367_vm3, %v4364_v57  ;;  %v3862_v46 = vadd.f32 %v3826_v35, %v3425_v39  ;;  %v4263_v63 = vpop.f32.mrf.mxu1 }
 0x441   :  { %v4299_v43 = vadd.f32 %v4263_v63, %v3862_v46 }
 0x443   :  { %v4333_v47 = vadd.f32 %v7698_v2, %v4299_v43 }
 0x445   :  { %v4365_v40 = vmax.f32 %v4333_v47, 0.0 }
 0x446   :  { %v3829_v23 = vpop.f32.mrf.mxu0 }
 0x447   :  { %4398 = vst.msk [vmem:[%s7761_s4 + $0xf0] sm:$0xff] %vm4367_vm3, %v4365_v40  ;;  %v3863_v28 = vadd.f32 %v3829_v23, %v3426_v49  ;;  %v4266_v29 = vpop.f32.mrf.mxu1 }
 0x449   :  { %v4300_v45 = vadd.f32 %v4266_v29, %v3863_v28 }
 0x44b   :  { %v4334_v38 = vadd.f32 %v7698_v2, %v4300_v45 }
 0x44d   :  { %v4366_v1 = vmax.f32 %v4334_v38, 0.0 }
 0x44f   :  { %4399 = vst.msk [vmem:[%s7761_s4 + $0xf8] sm:$0xff] %vm4367_vm3, %v4366_v1 }

</bundles_post_ra>
